<compile_context>
chip_gen: v7x
topology: tpu7x:2x2x1
jax: 0.10.0
libtpu: 0.0.40
codegen_flags: <defaults>
</compile_context>

<pallas_src>
import jax
import jax.numpy as jnp
from jax.experimental import pallas as pl
from jax.experimental.pallas import tpu as pltpu
import numpy as np

# ------------------------- small synthetic config -------------------------
BATCH = 8
SEQ = 8                      # n_ctx
VOCAB = 50
TOKEN_EMB = 16               # token_emb_dim
POS_VOCAB = 10
POS_EMB = 8                  # pos_emb_dim
ELMO_EMB = 32                # elmo_emb_dim
EMB_DIM = ELMO_EMB + TOKEN_EMB + POS_EMB          # 56
PAD_TOKEN_ID = 0
PAD_POS_ID = 0

HIDDEN = 32                  # lstm_hidden_dim  (4*H = 128 -> one full lane group)
LSTM_LAYERS = 2              # lstm_num_layers
LABEL_SIZE = 9
LABEL_PAD = 128              # lane-dense output width (sliced back to LABEL_SIZE)

ROWS = SEQ * BATCH           # time-major slab rows
H4 = 4 * HIDDEN              # 128
H8 = 8 * HIDDEN              # 256 (fwd gates | bwd gates)


# ------------------------------ Pallas kernel ------------------------------
def lstm_kernel(*refs):
    """refs layout:
       x (ROWS, EMB_DIM), mask (ROWS, H)  [mask pre-broadcast along lanes],
       per layer l: pack_l = [wih_f|wih_b ; whh_f|whh_b ; b_f|b_b]  (din+H+1, 8H),
       lin_pack = [w_lin ; b_lin]  (2H+1, LABEL_PAD),
       out (ROWS, LABEL_PAD),
       scratch: gx (ROWS, 8H), h_all (ROWS, 2H)
    """
    x_ref, m_ref = refs[0], refs[1]
    pack_refs = refs[2:2 + LSTM_LAYERS]
    lin_ref = refs[2 + LSTM_LAYERS]
    out_ref = refs[3 + LSTM_LAYERS]
    gx_ref = refs[4 + LSTM_LAYERS]
    h_ref = refs[5 + LSTM_LAYERS]

    H = HIDDEN

    def run_layer(pack_ref, din, layer_in):
        # unpack the per-layer weight slab with static, sublane-aligned slices
        wih = pack_ref[0:din, :]                     # (din, 8H)
        whh = pack_ref[din:din + H, :]               # (H, 8H)
        bias = pack_ref[din + H:din + H + 1, :]      # (1, 8H)

        # both-direction input projection: ONE slab matmul, bias folded in once.
        gx_ref[...] = (jnp.dot(layer_in, wih, preferred_element_type=jnp.float32)
                       + bias)

        whh_f = whh[:, 0:H4]                         # hoisted loop invariants
        whh_b = whh[:, H4:H8]

        hf = jnp.zeros((BATCH, H), jnp.float32)
        cf = jnp.zeros((BATCH, H), jnp.float32)
        hb = jnp.zeros((BATCH, H), jnp.float32)
        cb = jnp.zeros((BATCH, H), jnp.float32)

        # short fixed trip count -> static unroll; fwd & bwd interleaved so their
        # independent dependency chains overlap on MXU/EUP/VPU.
        for j in range(SEQ):
            rf = j * BATCH
            rb = (SEQ - 1 - j) * BATCH

            gf = gx_ref[rf:rf + BATCH, 0:H4] + jnp.dot(
                hf, whh_f, preferred_element_type=jnp.float32)
            gb = gx_ref[rb:rb + BATCH, H4:H8] + jnp.dot(
                hb, whh_b, preferred_element_type=jnp.float32)

            sf = jax.nn.sigmoid(gf)      # one EUP pass over the full (8,128) vreg
            sb = jax.nn.sigmoid(gb)

            # gate order [i, f, g, o] along the 4H axis (matches nn.LSTM)
            cf = sf[:, H:2 * H] * cf + sf[:, 0:H] * jnp.tanh(gf[:, 2 * H:3 * H])
            cb = sb[:, H:2 * H] * cb + sb[:, 0:H] * jnp.tanh(gb[:, 2 * H:3 * H])
            hf = sf[:, 3 * H:4 * H] * jnp.tanh(cf)
            hb = sb[:, 3 * H:4 * H] * jnp.tanh(cb)

            # packed-sequence emulation (trailing padding): zero state & output
            mf = m_ref[rf:rf + BATCH, :]             # (B, H), no in-loop broadcast
            mb = m_ref[rb:rb + BATCH, :]
            hf = hf * mf
            cf = cf * mf
            hb = hb * mb
            cb = cb * mb

            h_ref[rf:rf + BATCH, 0:H] = hf           # merged (ROWS, 2H) scratch
            h_ref[rb:rb + BATCH, H:2 * H] = hb

    # layer 0 reads the embedding slab; higher layers read the merged h scratch
    run_layer(pack_refs[0], EMB_DIM, x_ref[...])
    for l in range(1, LSTM_LAYERS):
        run_layer(pack_refs[l], 2 * H, h_ref[...])

    # final Linear: one lane-dense (128-wide) matmul on the merged hidden slab
    out_ref[...] = (jnp.dot(h_ref[...], lin_ref[0:2 * H, :],
                            preferred_element_type=jnp.float32)
                    + lin_ref[2 * H:2 * H + 1, :])


# ------------------------------ wrapper ------------------------------
def _full_spec(arr):
    nd = arr.ndim
    return pl.BlockSpec(arr.shape, lambda g, _nd=nd: (0,) * _nd)


def elmo_lstm_crf_forward(elmo_emb, token_ids, pos_ids, p):
    B, S = token_ids.shape
    # glue (plain JAX): embedding gathers, concat, mask, layout plumbing
    tok = jnp.take(p['embed_token'], token_ids, axis=0)
    pos = jnp.take(p['embed_pos'], pos_ids, axis=0)
    emb = jnp.concatenate([elmo_emb.astype(jnp.float32), tok, pos], axis=-1)   # (B,S,E)
    mask = (token_ids != PAD_TOKEN_ID).astype(jnp.float32)                     # (B,S)

    # time-major slab: row (t, b) -> index t*B + b
    x = jnp.transpose(emb, (1, 0, 2)).reshape(S * B, EMB_DIM)
    m = jnp.broadcast_to(jnp.transpose(mask, (1, 0)).reshape(S * B, 1),
                         (S * B, HIDDEN))            # pre-broadcast to (ROWS, H)

    # per-layer packed weight slab: [wih_f|wih_b ; whh_f|whh_b ; b_f|b_b]
    packs = []
    for l in range(LSTM_LAYERS):
        wf = p['lstm'][l]['f']
        wb = p['lstm'][l]['b']
        pack = jnp.concatenate([
            jnp.concatenate([wf['wih'], wb['wih']], axis=1),
            jnp.concatenate([wf['whh'], wb['whh']], axis=1),
            jnp.concatenate([wf['b'], wb['b']], axis=1),
        ], axis=0)
        packs.append(pack)

    # lane-dense padded classifier weight + bias packed into one slab
    wlin_pad = jnp.zeros((2 * HIDDEN, LABEL_PAD), jnp.float32).at[:, :LABEL_SIZE].set(p['w_lin'])
    blin_pad = jnp.zeros((1, LABEL_PAD), jnp.float32).at[:, :LABEL_SIZE].set(p['b_lin'])
    lin_pack = jnp.concatenate([wlin_pad, blin_pad], axis=0)

    inputs = [x, m] + packs + [lin_pack]

    flops = (2 * S * B * EMB_DIM * H8                               # layer-0 slab
             + (LSTM_LAYERS - 1) * 2 * S * B * (2 * HIDDEN) * H8    # higher-layer slabs
             + LSTM_LAYERS * 2 * S * 2 * B * HIDDEN * H4            # recurrent dots
             + 2 * S * B * (2 * HIDDEN) * LABEL_PAD)                # classifier
    transc = LSTM_LAYERS * 2 * S * (B * H4 + 2 * B * HIDDEN)
    bytes_acc = 4 * (sum(int(np.prod(a.shape)) for a in inputs) + S * B * LABEL_PAD)

    out = pl.pallas_call(
        lstm_kernel,
        out_shape=jax.ShapeDtypeStruct((S * B, LABEL_PAD), jnp.float32),
        grid=(1,),
        in_specs=[_full_spec(a) for a in inputs],
        out_specs=pl.BlockSpec((S * B, LABEL_PAD), lambda g: (0, 0)),
        scratch_shapes=[pltpu.VMEM((S * B, H8), jnp.float32),        # gx slab
                        pltpu.VMEM((S * B, 2 * HIDDEN), jnp.float32)],  # merged h
        compiler_params=pltpu.CompilerParams(dimension_semantics=("arbitrary",)),
        cost_estimate=pl.CostEstimate(flops=int(flops), transcendentals=int(transc),
                                      bytes_accessed=int(bytes_acc)),
    )(*inputs)

    logits = out.reshape(S, B, LABEL_PAD).transpose(1, 0, 2)[:, :, :LABEL_SIZE]
    return logits


# ------------------------------ parameter init ------------------------------
def init_params(key):
    ki = iter(jax.random.split(key, 64))
    p = {}
    p['embed_token'] = (jax.random.normal(next(ki), (VOCAB, TOKEN_EMB), jnp.float32) * 0.1
                        ).at[PAD_TOKEN_ID].set(0.0)
    p['embed_pos'] = (jax.random.normal(next(ki), (POS_VOCAB, POS_EMB), jnp.float32) * 0.1
                      ).at[PAD_POS_ID].set(0.0)

    lstm = []
    s = 1.0 / float(np.sqrt(HIDDEN))
    for l in range(LSTM_LAYERS):
        din = EMB_DIM if l == 0 else 2 * HIDDEN
        layer = {}
        for d in ('f', 'b'):
            layer[d] = {
                # gate order [i, f, g, o] along the 4H axis (matches nn.LSTM)
                'wih': jax.random.normal(next(ki), (din, 4 * HIDDEN), jnp.float32) * s,
                'whh': jax.random.normal(next(ki), (HIDDEN, 4 * HIDDEN), jnp.float32) * s,
                'b':   jax.random.normal(next(ki), (1, 4 * HIDDEN), jnp.float32) * s,  # b_ih+b_hh
            }
        lstm.append(layer)
    p['lstm'] = lstm

    p['w_lin'] = jax.random.normal(next(ki), (2 * HIDDEN, LABEL_SIZE), jnp.float32) \
        * (1.0 / float(np.sqrt(2 * HIDDEN)))
    p['b_lin'] = jax.random.normal(next(ki), (1, LABEL_SIZE), jnp.float32) * 0.01
    return p


# ------------------- reference (numpy float64, packed semantics) -------------------
def reference_forward(elmo_emb, token_ids, pos_ids, p):
    B, S = token_ids.shape
    tok = jnp.take(p['embed_token'], token_ids, axis=0)
    pos = jnp.take(p['embed_pos'], pos_ids, axis=0)
    emb = np.asarray(jnp.concatenate([elmo_emb, tok, pos], axis=-1), dtype=np.float64)
    lengths = np.asarray(jnp.sum((token_ids != PAD_TOKEN_ID).astype(jnp.int32), axis=1))

    def sigmoid(z):
        return 1.0 / (1.0 + np.exp(-z))

    H = HIDDEN
    w_lin = np.asarray(p['w_lin'], np.float64)
    b_lin = np.asarray(p['b_lin'], np.float64)
    outs = []
    for b in range(B):
        L = int(lengths[b])
        inp = emb[b]                                   # (S, E)
        for l in range(LSTM_LAYERS):
            layer_out = np.zeros((S, 2 * H))           # pad_packed zero-fill
            for d_i, d in enumerate(('f', 'b')):
                W = np.asarray(p['lstm'][l][d]['wih'], np.float64)
                U = np.asarray(p['lstm'][l][d]['whh'], np.float64)
                bias = np.asarray(p['lstm'][l][d]['b'], np.float64)[0]
                h = np.zeros(H); c = np.zeros(H)
                t_order = range(L) if d == 'f' else range(L - 1, -1, -1)
                for t in t_order:                      # packed: only t < length
                    g = inp[t] @ W + h @ U + bias
                    i_g = sigmoid(g[0:H]); f_g = sigmoid(g[H:2 * H])
                    c_g = np.tanh(g[2 * H:3 * H]); o_g = sigmoid(g[3 * H:4 * H])
                    c = f_g * c + i_g * c_g
                    h = o_g * np.tanh(c)
                    layer_out[t, d_i * H:(d_i + 1) * H] = h
            inp = layer_out
        outs.append(inp @ w_lin + b_lin)
    return np.stack(outs)                              # (B, S, LABEL_SIZE)


# ------------------------------ main ------------------------------
if __name__ == "__main__":
    key = jax.random.PRNGKey(0)
    k_param, k_tok, k_pos, k_elmo = jax.random.split(key, 4)

    params = init_params(k_param)

    token_ids = jax.random.randint(k_tok, (BATCH, SEQ), 1, VOCAB, dtype=jnp.int32)
    pos_ids = jax.random.randint(k_pos, (BATCH, SEQ), 1, POS_VOCAB, dtype=jnp.int32)
    # varied valid lengths with trailing padding (pack_padded_sequence assumption)
    lengths = np.array([8, 7, 6, 5, 8, 4, 6, 3], dtype=np.int32)[:BATCH]
    valid = jnp.asarray(np.arange(SEQ)[None, :] < lengths[:, None])
    token_ids = jnp.where(valid, token_ids, PAD_TOKEN_ID)
    pos_ids = jnp.where(valid, pos_ids, PAD_POS_ID)

    # ELMo representations: external pretrained model -> synthetic stand-in tensor
    # (intentionally non-zero at padded positions, like the real model output).
    elmo_emb = jax.random.normal(k_elmo, (BATCH, SEQ, ELMO_EMB), jnp.float32) * 0.1

    logits = jax.block_until_ready(elmo_lstm_crf_forward(elmo_emb, token_ids, pos_ids, params))

    assert logits.shape == (BATCH, SEQ, LABEL_SIZE), logits.shape
    assert bool(jnp.all(jnp.isfinite(logits)))

    ref = reference_forward(elmo_emb, token_ids, pos_ids, params)
    np.testing.assert_allclose(np.asarray(logits), ref, rtol=5e-2, atol=5e-2)

    print("KERNEL_OK")
</pallas_src>

<mosaic_0001>
module attributes {stable_mosaic.version = 11 : i64} {
  func.func @lstm_kernel(%arg0: i32, %arg1: memref<64x56xf32, #tpu.memory_space<vmem>>, %arg2: memref<64x32xf32, #tpu.memory_space<vmem>>, %arg3: memref<89x256xf32, #tpu.memory_space<vmem>>, %arg4: memref<97x256xf32, #tpu.memory_space<vmem>>, %arg5: memref<65x128xf32, #tpu.memory_space<vmem>>, %arg6: memref<64x128xf32, #tpu.memory_space<vmem>>, %arg7: memref<64x256xf32, #tpu.memory_space<vmem>>, %arg8: memref<64x64xf32, #tpu.memory_space<vmem>>) attributes {dimension_semantics = [#tpu.dimension_semantics<arbitrary>], iteration_bounds = array<i64: 1>, scalar_prefetch = 0 : i64, scratch_operands = 2 : i64, tpu.core_type = #tpu.core_type<tc>, window_params = [{pipeline_mode = #tpu.pipeline_mode<synchronous>, transform_indices = @transform_0, window_bounds = array<i64: 64, 56>}, {pipeline_mode = #tpu.pipeline_mode<synchronous>, transform_indices = @transform_1, window_bounds = array<i64: 64, 32>}, {pipeline_mode = #tpu.pipeline_mode<synchronous>, transform_indices = @transform_2, window_bounds = array<i64: 89, 256>}, {pipeline_mode = #tpu.pipeline_mode<synchronous>, transform_indices = @transform_3, window_bounds = array<i64: 97, 256>}, {pipeline_mode = #tpu.pipeline_mode<synchronous>, transform_indices = @transform_4, window_bounds = array<i64: 65, 128>}, {pipeline_mode = #tpu.pipeline_mode<synchronous>, transform_indices = @transform_5, window_bounds = array<i64: 64, 128>}]} {
    %c0 = arith.constant 0 : index
    %c0_0 = arith.constant 0 : index
    %0 = vector.load %arg1[%c0, %c0_0] : memref<64x56xf32, #tpu.memory_space<vmem>>, vector<64x56xf32>
    %c0_1 = arith.constant 0 : index
    %c0_2 = arith.constant 0 : index
    %1 = vector.load %arg3[%c0_1, %c0_2] : memref<89x256xf32, #tpu.memory_space<vmem>>, vector<56x256xf32>
    %c56 = arith.constant 56 : index
    %c0_3 = arith.constant 0 : index
    %2 = vector.load %arg3[%c56, %c0_3] : memref<89x256xf32, #tpu.memory_space<vmem>>, vector<32x256xf32>
    %c88 = arith.constant 88 : index
    %c0_4 = arith.constant 0 : index
    %3 = vector.load %arg3[%c88, %c0_4] : memref<89x256xf32, #tpu.memory_space<vmem>>, vector<1x256xf32>
    %cst = arith.constant dense<0.000000e+00> : vector<64x256xf32>
    %4 = tpu.matmul %0, %1, %cst {dimension_numbers = #tpu.dot_dimension_numbers<[1], [0], [0], [1], [0, 0, 1, 1], [], []>} : vector<64x56xf32>, vector<56x256xf32>, vector<64x256xf32> -> vector<64x256xf32>
    %5 = vector.broadcast %3 : vector<1x256xf32> to vector<64x256xf32>
    %6 = arith.addf %4, %5 : vector<64x256xf32>
    %c0_5 = arith.constant 0 : index
    %c0_6 = arith.constant 0 : index
    %7 = vector.load %arg7[%c0_5, %c0_6] : memref<64x256xf32, #tpu.memory_space<vmem>>, vector<64x256xf32>
    tpu.vector_store %arg7[%c0_5, %c0_6], %6 {strides = array<i32>} : memref<64x256xf32, #tpu.memory_space<vmem>>, vector<64x256xf32>,
    %8 = vector.extract_strided_slice %2 {offsets = [0, 0], sizes = [32, 128], strides = [1, 1]} : vector<32x256xf32> to vector<32x128xf32>
    %9 = vector.extract_strided_slice %2 {offsets = [0, 128], sizes = [32, 128], strides = [1, 1]} : vector<32x256xf32> to vector<32x128xf32>
    %cst_7 = arith.constant 0.000000e+00 : f32
    %10 = vector.broadcast %cst_7 : f32 to vector<8x32xf32>
    %cst_8 = arith.constant 0.000000e+00 : f32
    %11 = vector.broadcast %cst_8 : f32 to vector<8x32xf32>
    %cst_9 = arith.constant 0.000000e+00 : f32
    %12 = vector.broadcast %cst_9 : f32 to vector<8x32xf32>
    %cst_10 = arith.constant 0.000000e+00 : f32
    %13 = vector.broadcast %cst_10 : f32 to vector<8x32xf32>
    %c0_11 = arith.constant 0 : index
    %c0_12 = arith.constant 0 : index
    %14 = vector.load %arg7[%c0_11, %c0_12] : memref<64x256xf32, #tpu.memory_space<vmem>>, vector<8x128xf32>
    %cst_13 = arith.constant dense<0.000000e+00> : vector<8x128xf32>
    %15 = tpu.matmul %10, %8, %cst_13 {dimension_numbers = #tpu.dot_dimension_numbers<[1], [0], [0], [1], [0, 0, 1, 1], [], []>} : vector<8x32xf32>, vector<32x128xf32>, vector<8x128xf32> -> vector<8x128xf32>
    %16 = arith.addf %14, %15 : vector<8x128xf32>
    %c56_14 = arith.constant 56 : index
    %c128 = arith.constant 128 : index
    %17 = vector.load %arg7[%c56_14, %c128] : memref<64x256xf32, #tpu.memory_space<vmem>>, vector<8x128xf32>
    %cst_15 = arith.constant dense<0.000000e+00> : vector<8x128xf32>
    %18 = tpu.matmul %12, %9, %cst_15 {dimension_numbers = #tpu.dot_dimension_numbers<[1], [0], [0], [1], [0, 0, 1, 1], [], []>} : vector<8x32xf32>, vector<32x128xf32>, vector<8x128xf32> -> vector<8x128xf32>
    %19 = arith.addf %17, %18 : vector<8x128xf32>
    %20 = arith.negf %16 : vector<8x128xf32>
    %21 = math.exp %20 : vector<8x128xf32>
    %cst_16 = arith.constant 1.000000e+00 : f32
    %22 = vector.broadcast %cst_16 : f32 to vector<8x128xf32>
    %23 = arith.addf %22, %21 : vector<8x128xf32>
    %24 = arith.divf %22, %23 : vector<8x128xf32>
    %25 = arith.negf %19 : vector<8x128xf32>
    %26 = math.exp %25 : vector<8x128xf32>
    %cst_17 = arith.constant 1.000000e+00 : f32
    %27 = vector.broadcast %cst_17 : f32 to vector<8x128xf32>
    %28 = arith.addf %27, %26 : vector<8x128xf32>
    %29 = arith.divf %27, %28 : vector<8x128xf32>
    %30 = vector.extract_strided_slice %24 {offsets = [0, 32], sizes = [8, 32], strides = [1, 1]} : vector<8x128xf32> to vector<8x32xf32>
    %31 = arith.mulf %30, %11 : vector<8x32xf32>
    %32 = vector.extract_strided_slice %24 {offsets = [0, 0], sizes = [8, 32], strides = [1, 1]} : vector<8x128xf32> to vector<8x32xf32>
    %33 = vector.extract_strided_slice %16 {offsets = [0, 64], sizes = [8, 32], strides = [1, 1]} : vector<8x128xf32> to vector<8x32xf32>
    %34 = math.tanh %33 : vector<8x32xf32>
    %35 = arith.mulf %32, %34 : vector<8x32xf32>
    %36 = arith.addf %31, %35 : vector<8x32xf32>
    %37 = vector.extract_strided_slice %29 {offsets = [0, 32], sizes = [8, 32], strides = [1, 1]} : vector<8x128xf32> to vector<8x32xf32>
    %38 = arith.mulf %37, %13 : vector<8x32xf32>
    %39 = vector.extract_strided_slice %29 {offsets = [0, 0], sizes = [8, 32], strides = [1, 1]} : vector<8x128xf32> to vector<8x32xf32>
    %40 = vector.extract_strided_slice %19 {offsets = [0, 64], sizes = [8, 32], strides = [1, 1]} : vector<8x128xf32> to vector<8x32xf32>
    %41 = math.tanh %40 : vector<8x32xf32>
    %42 = arith.mulf %39, %41 : vector<8x32xf32>
    %43 = arith.addf %38, %42 : vector<8x32xf32>
    %44 = vector.extract_strided_slice %24 {offsets = [0, 96], sizes = [8, 32], strides = [1, 1]} : vector<8x128xf32> to vector<8x32xf32>
    %45 = math.tanh %36 : vector<8x32xf32>
    %46 = arith.mulf %44, %45 : vector<8x32xf32>
    %47 = vector.extract_strided_slice %29 {offsets = [0, 96], sizes = [8, 32], strides = [1, 1]} : vector<8x128xf32> to vector<8x32xf32>
    %48 = math.tanh %43 : vector<8x32xf32>
    %49 = arith.mulf %47, %48 : vector<8x32xf32>
    %c0_18 = arith.constant 0 : index
    %c0_19 = arith.constant 0 : index
    %50 = vector.load %arg2[%c0_18, %c0_19] : memref<64x32xf32, #tpu.memory_space<vmem>>, vector<8x32xf32>
    %c56_20 = arith.constant 56 : index
    %c0_21 = arith.constant 0 : index
    %51 = vector.load %arg2[%c56_20, %c0_21] : memref<64x32xf32, #tpu.memory_space<vmem>>, vector<8x32xf32>
    %52 = arith.mulf %46, %50 : vector<8x32xf32>
    %53 = arith.mulf %36, %50 : vector<8x32xf32>
    %54 = arith.mulf %49, %51 : vector<8x32xf32>
    %55 = arith.mulf %43, %51 : vector<8x32xf32>
    %c0_22 = arith.constant 0 : index
    %c0_23 = arith.constant 0 : index
    %56 = vector.load %arg8[%c0_22, %c0_23] : memref<64x64xf32, #tpu.memory_space<vmem>>, vector<8x32xf32>
    tpu.vector_store %arg8[%c0_22, %c0_23], %52 {strides = array<i32>} : memref<64x64xf32, #tpu.memory_space<vmem>>, vector<8x32xf32>,
    %c56_24 = arith.constant 56 : index
    %c32 = arith.constant 32 : index
    %57 = vector.load %arg8[%c56_24, %c32] : memref<64x64xf32, #tpu.memory_space<vmem>>, vector<8x32xf32>
    tpu.vector_store %arg8[%c56_24, %c32], %54 {strides = array<i32>} : memref<64x64xf32, #tpu.memory_space<vmem>>, vector<8x32xf32>,
    %c8 = arith.constant 8 : index
    %c0_25 = arith.constant 0 : index
    %58 = vector.load %arg7[%c8, %c0_25] : memref<64x256xf32, #tpu.memory_space<vmem>>, vector<8x128xf32>
    %cst_26 = arith.constant dense<0.000000e+00> : vector<8x128xf32>
    %59 = tpu.matmul %52, %8, %cst_26 {dimension_numbers = #tpu.dot_dimension_numbers<[1], [0], [0], [1], [0, 0, 1, 1], [], []>} : vector<8x32xf32>, vector<32x128xf32>, vector<8x128xf32> -> vector<8x128xf32>
    %60 = arith.addf %58, %59 : vector<8x128xf32>
    %c48 = arith.constant 48 : index
    %c128_27 = arith.constant 128 : index
    %61 = vector.load %arg7[%c48, %c128_27] : memref<64x256xf32, #tpu.memory_space<vmem>>, vector<8x128xf32>
    %cst_28 = arith.constant dense<0.000000e+00> : vector<8x128xf32>
    %62 = tpu.matmul %54, %9, %cst_28 {dimension_numbers = #tpu.dot_dimension_numbers<[1], [0], [0], [1], [0, 0, 1, 1], [], []>} : vector<8x32xf32>, vector<32x128xf32>, vector<8x128xf32> -> vector<8x128xf32>
    %63 = arith.addf %61, %62 : vector<8x128xf32>
    %64 = arith.negf %60 : vector<8x128xf32>
    %65 = math.exp %64 : vector<8x128xf32>
    %cst_29 = arith.constant 1.000000e+00 : f32
    %66 = vector.broadcast %cst_29 : f32 to vector<8x128xf32>
    %67 = arith.addf %66, %65 : vector<8x128xf32>
    %68 = arith.divf %66, %67 : vector<8x128xf32>
    %69 = arith.negf %63 : vector<8x128xf32>
    %70 = math.exp %69 : vector<8x128xf32>
    %cst_30 = arith.constant 1.000000e+00 : f32
    %71 = vector.broadcast %cst_30 : f32 to vector<8x128xf32>
    %72 = arith.addf %71, %70 : vector<8x128xf32>
    %73 = arith.divf %71, %72 : vector<8x128xf32>
    %74 = vector.extract_strided_slice %68 {offsets = [0, 32], sizes = [8, 32], strides = [1, 1]} : vector<8x128xf32> to vector<8x32xf32>
    %75 = arith.mulf %74, %53 : vector<8x32xf32>
    %76 = vector.extract_strided_slice %68 {offsets = [0, 0], sizes = [8, 32], strides = [1, 1]} : vector<8x128xf32> to vector<8x32xf32>
    %77 = vector.extract_strided_slice %60 {offsets = [0, 64], sizes = [8, 32], strides = [1, 1]} : vector<8x128xf32> to vector<8x32xf32>
    %78 = math.tanh %77 : vector<8x32xf32>
    %79 = arith.mulf %76, %78 : vector<8x32xf32>
    %80 = arith.addf %75, %79 : vector<8x32xf32>
    %81 = vector.extract_strided_slice %73 {offsets = [0, 32], sizes = [8, 32], strides = [1, 1]} : vector<8x128xf32> to vector<8x32xf32>
    %82 = arith.mulf %81, %55 : vector<8x32xf32>
    %83 = vector.extract_strided_slice %73 {offsets = [0, 0], sizes = [8, 32], strides = [1, 1]} : vector<8x128xf32> to vector<8x32xf32>
    %84 = vector.extract_strided_slice %63 {offsets = [0, 64], sizes = [8, 32], strides = [1, 1]} : vector<8x128xf32> to vector<8x32xf32>
    %85 = math.tanh %84 : vector<8x32xf32>
    %86 = arith.mulf %83, %85 : vector<8x32xf32>
    %87 = arith.addf %82, %86 : vector<8x32xf32>
    %88 = vector.extract_strided_slice %68 {offsets = [0, 96], sizes = [8, 32], strides = [1, 1]} : vector<8x128xf32> to vector<8x32xf32>
    %89 = math.tanh %80 : vector<8x32xf32>
    %90 = arith.mulf %88, %89 : vector<8x32xf32>
    %91 = vector.extract_strided_slice %73 {offsets = [0, 96], sizes = [8, 32], strides = [1, 1]} : vector<8x128xf32> to vector<8x32xf32>
    %92 = math.tanh %87 : vector<8x32xf32>
    %93 = arith.mulf %91, %92 : vector<8x32xf32>
    %c8_31 = arith.constant 8 : index
    %c0_32 = arith.constant 0 : index
    %94 = vector.load %arg2[%c8_31, %c0_32] : memref<64x32xf32, #tpu.memory_space<vmem>>, vector<8x32xf32>
    %c48_33 = arith.constant 48 : index
    %c0_34 = arith.constant 0 : index
    %95 = vector.load %arg2[%c48_33, %c0_34] : memref<64x32xf32, #tpu.memory_space<vmem>>, vector<8x32xf32>
    %96 = arith.mulf %90, %94 : vector<8x32xf32>
    %97 = arith.mulf %80, %94 : vector<8x32xf32>
    %98 = arith.mulf %93, %95 : vector<8x32xf32>
    %99 = arith.mulf %87, %95 : vector<8x32xf32>
    %c8_35 = arith.constant 8 : index
    %c0_36 = arith.constant 0 : index
    %100 = vector.load %arg8[%c8_35, %c0_36] : memref<64x64xf32, #tpu.memory_space<vmem>>, vector<8x32xf32>
    tpu.vector_store %arg8[%c8_35, %c0_36], %96 {strides = array<i32>} : memref<64x64xf32, #tpu.memory_space<vmem>>, vector<8x32xf32>,
    %c48_37 = arith.constant 48 : index
    %c32_38 = arith.constant 32 : index
    %101 = vector.load %arg8[%c48_37, %c32_38] : memref<64x64xf32, #tpu.memory_space<vmem>>, vector<8x32xf32>
    tpu.vector_store %arg8[%c48_37, %c32_38], %98 {strides = array<i32>} : memref<64x64xf32, #tpu.memory_space<vmem>>, vector<8x32xf32>,
    %c16 = arith.constant 16 : index
    %c0_39 = arith.constant 0 : index
    %102 = vector.load %arg7[%c16, %c0_39] : memref<64x256xf32, #tpu.memory_space<vmem>>, vector<8x128xf32>
    %cst_40 = arith.constant dense<0.000000e+00> : vector<8x128xf32>
    %103 = tpu.matmul %96, %8, %cst_40 {dimension_numbers = #tpu.dot_dimension_numbers<[1], [0], [0], [1], [0, 0, 1, 1], [], []>} : vector<8x32xf32>, vector<32x128xf32>, vector<8x128xf32> -> vector<8x128xf32>
    %104 = arith.addf %102, %103 : vector<8x128xf32>
    %c40 = arith.constant 40 : index
    %c128_41 = arith.constant 128 : index
    %105 = vector.load %arg7[%c40, %c128_41] : memref<64x256xf32, #tpu.memory_space<vmem>>, vector<8x128xf32>
    %cst_42 = arith.constant dense<0.000000e+00> : vector<8x128xf32>
    %106 = tpu.matmul %98, %9, %cst_42 {dimension_numbers = #tpu.dot_dimension_numbers<[1], [0], [0], [1], [0, 0, 1, 1], [], []>} : vector<8x32xf32>, vector<32x128xf32>, vector<8x128xf32> -> vector<8x128xf32>
    %107 = arith.addf %105, %106 : vector<8x128xf32>
    %108 = arith.negf %104 : vector<8x128xf32>
    %109 = math.exp %108 : vector<8x128xf32>
    %cst_43 = arith.constant 1.000000e+00 : f32
    %110 = vector.broadcast %cst_43 : f32 to vector<8x128xf32>
    %111 = arith.addf %110, %109 : vector<8x128xf32>
    %112 = arith.divf %110, %111 : vector<8x128xf32>
    %113 = arith.negf %107 : vector<8x128xf32>
    %114 = math.exp %113 : vector<8x128xf32>
    %cst_44 = arith.constant 1.000000e+00 : f32
    %115 = vector.broadcast %cst_44 : f32 to vector<8x128xf32>
    %116 = arith.addf %115, %114 : vector<8x128xf32>
    %117 = arith.divf %115, %116 : vector<8x128xf32>
    %118 = vector.extract_strided_slice %112 {offsets = [0, 32], sizes = [8, 32], strides = [1, 1]} : vector<8x128xf32> to vector<8x32xf32>
    %119 = arith.mulf %118, %97 : vector<8x32xf32>
    %120 = vector.extract_strided_slice %112 {offsets = [0, 0], sizes = [8, 32], strides = [1, 1]} : vector<8x128xf32> to vector<8x32xf32>
    %121 = vector.extract_strided_slice %104 {offsets = [0, 64], sizes = [8, 32], strides = [1, 1]} : vector<8x128xf32> to vector<8x32xf32>
    %122 = math.tanh %121 : vector<8x32xf32>
    %123 = arith.mulf %120, %122 : vector<8x32xf32>
    %124 = arith.addf %119, %123 : vector<8x32xf32>
    %125 = vector.extract_strided_slice %117 {offsets = [0, 32], sizes = [8, 32], strides = [1, 1]} : vector<8x128xf32> to vector<8x32xf32>
    %126 = arith.mulf %125, %99 : vector<8x32xf32>
    %127 = vector.extract_strided_slice %117 {offsets = [0, 0], sizes = [8, 32], strides = [1, 1]} : vector<8x128xf32> to vector<8x32xf32>
    %128 = vector.extract_strided_slice %107 {offsets = [0, 64], sizes = [8, 32], strides = [1, 1]} : vector<8x128xf32> to vector<8x32xf32>
    %129 = math.tanh %128 : vector<8x32xf32>
    %130 = arith.mulf %127, %129 : vector<8x32xf32>
    %131 = arith.addf %126, %130 : vector<8x32xf32>
    %132 = vector.extract_strided_slice %112 {offsets = [0, 96], sizes = [8, 32], strides = [1, 1]} : vector<8x128xf32> to vector<8x32xf32>
    %133 = math.tanh %124 : vector<8x32xf32>
    %134 = arith.mulf %132, %133 : vector<8x32xf32>
    %135 = vector.extract_strided_slice %117 {offsets = [0, 96], sizes = [8, 32], strides = [1, 1]} : vector<8x128xf32> to vector<8x32xf32>
    %136 = math.tanh %131 : vector<8x32xf32>
    %137 = arith.mulf %135, %136 : vector<8x32xf32>
    %c16_45 = arith.constant 16 : index
    %c0_46 = arith.constant 0 : index
    %138 = vector.load %arg2[%c16_45, %c0_46] : memref<64x32xf32, #tpu.memory_space<vmem>>, vector<8x32xf32>
    %c40_47 = arith.constant 40 : index
    %c0_48 = arith.constant 0 : index
    %139 = vector.load %arg2[%c40_47, %c0_48] : memref<64x32xf32, #tpu.memory_space<vmem>>, vector<8x32xf32>
    %140 = arith.mulf %134, %138 : vector<8x32xf32>
    %141 = arith.mulf %124, %138 : vector<8x32xf32>
    %142 = arith.mulf %137, %139 : vector<8x32xf32>
    %143 = arith.mulf %131, %139 : vector<8x32xf32>
    %c16_49 = arith.constant 16 : index
    %c0_50 = arith.constant 0 : index
    %144 = vector.load %arg8[%c16_49, %c0_50] : memref<64x64xf32, #tpu.memory_space<vmem>>, vector<8x32xf32>
    tpu.vector_store %arg8[%c16_49, %c0_50], %140 {strides = array<i32>} : memref<64x64xf32, #tpu.memory_space<vmem>>, vector<8x32xf32>,
    %c40_51 = arith.constant 40 : index
    %c32_52 = arith.constant 32 : index
    %145 = vector.load %arg8[%c40_51, %c32_52] : memref<64x64xf32, #tpu.memory_space<vmem>>, vector<8x32xf32>
    tpu.vector_store %arg8[%c40_51, %c32_52], %142 {strides = array<i32>} : memref<64x64xf32, #tpu.memory_space<vmem>>, vector<8x32xf32>,
    %c24 = arith.constant 24 : index
    %c0_53 = arith.constant 0 : index
    %146 = vector.load %arg7[%c24, %c0_53] : memref<64x256xf32, #tpu.memory_space<vmem>>, vector<8x128xf32>
    %cst_54 = arith.constant dense<0.000000e+00> : vector<8x128xf32>
    %147 = tpu.matmul %140, %8, %cst_54 {dimension_numbers = #tpu.dot_dimension_numbers<[1], [0], [0], [1], [0, 0, 1, 1], [], []>} : vector<8x32xf32>, vector<32x128xf32>, vector<8x128xf32> -> vector<8x128xf32>
    %148 = arith.addf %146, %147 : vector<8x128xf32>
    %c32_55 = arith.constant 32 : index
    %c128_56 = arith.constant 128 : index
    %149 = vector.load %arg7[%c32_55, %c128_56] : memref<64x256xf32, #tpu.memory_space<vmem>>, vector<8x128xf32>
    %cst_57 = arith.constant dense<0.000000e+00> : vector<8x128xf32>
    %150 = tpu.matmul %142, %9, %cst_57 {dimension_numbers = #tpu.dot_dimension_numbers<[1], [0], [0], [1], [0, 0, 1, 1], [], []>} : vector<8x32xf32>, vector<32x128xf32>, vector<8x128xf32> -> vector<8x128xf32>
    %151 = arith.addf %149, %150 : vector<8x128xf32>
    %152 = arith.negf %148 : vector<8x128xf32>
    %153 = math.exp %152 : vector<8x128xf32>
    %cst_58 = arith.constant 1.000000e+00 : f32
    %154 = vector.broadcast %cst_58 : f32 to vector<8x128xf32>
    %155 = arith.addf %154, %153 : vector<8x128xf32>
    %156 = arith.divf %154, %155 : vector<8x128xf32>
    %157 = arith.negf %151 : vector<8x128xf32>
    %158 = math.exp %157 : vector<8x128xf32>
    %cst_59 = arith.constant 1.000000e+00 : f32
    %159 = vector.broadcast %cst_59 : f32 to vector<8x128xf32>
    %160 = arith.addf %159, %158 : vector<8x128xf32>
    %161 = arith.divf %159, %160 : vector<8x128xf32>
    %162 = vector.extract_strided_slice %156 {offsets = [0, 32], sizes = [8, 32], strides = [1, 1]} : vector<8x128xf32> to vector<8x32xf32>
    %163 = arith.mulf %162, %141 : vector<8x32xf32>
    %164 = vector.extract_strided_slice %156 {offsets = [0, 0], sizes = [8, 32], strides = [1, 1]} : vector<8x128xf32> to vector<8x32xf32>
    %165 = vector.extract_strided_slice %148 {offsets = [0, 64], sizes = [8, 32], strides = [1, 1]} : vector<8x128xf32> to vector<8x32xf32>
    %166 = math.tanh %165 : vector<8x32xf32>
    %167 = arith.mulf %164, %166 : vector<8x32xf32>
    %168 = arith.addf %163, %167 : vector<8x32xf32>
    %169 = vector.extract_strided_slice %161 {offsets = [0, 32], sizes = [8, 32], strides = [1, 1]} : vector<8x128xf32> to vector<8x32xf32>
    %170 = arith.mulf %169, %143 : vector<8x32xf32>
    %171 = vector.extract_strided_slice %161 {offsets = [0, 0], sizes = [8, 32], strides = [1, 1]} : vector<8x128xf32> to vector<8x32xf32>
    %172 = vector.extract_strided_slice %151 {offsets = [0, 64], sizes = [8, 32], strides = [1, 1]} : vector<8x128xf32> to vector<8x32xf32>
    %173 = math.tanh %172 : vector<8x32xf32>
    %174 = arith.mulf %171, %173 : vector<8x32xf32>
    %175 = arith.addf %170, %174 : vector<8x32xf32>
    %176 = vector.extract_strided_slice %156 {offsets = [0, 96], sizes = [8, 32], strides = [1, 1]} : vector<8x128xf32> to vector<8x32xf32>
    %177 = math.tanh %168 : vector<8x32xf32>
    %178 = arith.mulf %176, %177 : vector<8x32xf32>
    %179 = vector.extract_strided_slice %161 {offsets = [0, 96], sizes = [8, 32], strides = [1, 1]} : vector<8x128xf32> to vector<8x32xf32>
    %180 = math.tanh %175 : vector<8x32xf32>
    %181 = arith.mulf %179, %180 : vector<8x32xf32>
    %c24_60 = arith.constant 24 : index
    %c0_61 = arith.constant 0 : index
    %182 = vector.load %arg2[%c24_60, %c0_61] : memref<64x32xf32, #tpu.memory_space<vmem>>, vector<8x32xf32>
    %c32_62 = arith.constant 32 : index
    %c0_63 = arith.constant 0 : index
    %183 = vector.load %arg2[%c32_62, %c0_63] : memref<64x32xf32, #tpu.memory_space<vmem>>, vector<8x32xf32>
    %184 = arith.mulf %178, %182 : vector<8x32xf32>
    %185 = arith.mulf %168, %182 : vector<8x32xf32>
    %186 = arith.mulf %181, %183 : vector<8x32xf32>
    %187 = arith.mulf %175, %183 : vector<8x32xf32>
    %c24_64 = arith.constant 24 : index
    %c0_65 = arith.constant 0 : index
    %188 = vector.load %arg8[%c24_64, %c0_65] : memref<64x64xf32, #tpu.memory_space<vmem>>, vector<8x32xf32>
    tpu.vector_store %arg8[%c24_64, %c0_65], %184 {strides = array<i32>} : memref<64x64xf32, #tpu.memory_space<vmem>>, vector<8x32xf32>,
    %c32_66 = arith.constant 32 : index
    %c32_67 = arith.constant 32 : index
    %189 = vector.load %arg8[%c32_66, %c32_67] : memref<64x64xf32, #tpu.memory_space<vmem>>, vector<8x32xf32>
    tpu.vector_store %arg8[%c32_66, %c32_67], %186 {strides = array<i32>} : memref<64x64xf32, #tpu.memory_space<vmem>>, vector<8x32xf32>,
    %c32_68 = arith.constant 32 : index
    %c0_69 = arith.constant 0 : index
    %190 = vector.load %arg7[%c32_68, %c0_69] : memref<64x256xf32, #tpu.memory_space<vmem>>, vector<8x128xf32>
    %cst_70 = arith.constant dense<0.000000e+00> : vector<8x128xf32>
    %191 = tpu.matmul %184, %8, %cst_70 {dimension_numbers = #tpu.dot_dimension_numbers<[1], [0], [0], [1], [0, 0, 1, 1], [], []>} : vector<8x32xf32>, vector<32x128xf32>, vector<8x128xf32> -> vector<8x128xf32>
    %192 = arith.addf %190, %191 : vector<8x128xf32>
    %c24_71 = arith.constant 24 : index
    %c128_72 = arith.constant 128 : index
    %193 = vector.load %arg7[%c24_71, %c128_72] : memref<64x256xf32, #tpu.memory_space<vmem>>, vector<8x128xf32>
    %cst_73 = arith.constant dense<0.000000e+00> : vector<8x128xf32>
    %194 = tpu.matmul %186, %9, %cst_73 {dimension_numbers = #tpu.dot_dimension_numbers<[1], [0], [0], [1], [0, 0, 1, 1], [], []>} : vector<8x32xf32>, vector<32x128xf32>, vector<8x128xf32> -> vector<8x128xf32>
    %195 = arith.addf %193, %194 : vector<8x128xf32>
    %196 = arith.negf %192 : vector<8x128xf32>
    %197 = math.exp %196 : vector<8x128xf32>
    %cst_74 = arith.constant 1.000000e+00 : f32
    %198 = vector.broadcast %cst_74 : f32 to vector<8x128xf32>
    %199 = arith.addf %198, %197 : vector<8x128xf32>
    %200 = arith.divf %198, %199 : vector<8x128xf32>
    %201 = arith.negf %195 : vector<8x128xf32>
    %202 = math.exp %201 : vector<8x128xf32>
    %cst_75 = arith.constant 1.000000e+00 : f32
    %203 = vector.broadcast %cst_75 : f32 to vector<8x128xf32>
    %204 = arith.addf %203, %202 : vector<8x128xf32>
    %205 = arith.divf %203, %204 : vector<8x128xf32>
    %206 = vector.extract_strided_slice %200 {offsets = [0, 32], sizes = [8, 32], strides = [1, 1]} : vector<8x128xf32> to vector<8x32xf32>
    %207 = arith.mulf %206, %185 : vector<8x32xf32>
    %208 = vector.extract_strided_slice %200 {offsets = [0, 0], sizes = [8, 32], strides = [1, 1]} : vector<8x128xf32> to vector<8x32xf32>
    %209 = vector.extract_strided_slice %192 {offsets = [0, 64], sizes = [8, 32], strides = [1, 1]} : vector<8x128xf32> to vector<8x32xf32>
    %210 = math.tanh %209 : vector<8x32xf32>
    %211 = arith.mulf %208, %210 : vector<8x32xf32>
    %212 = arith.addf %207, %211 : vector<8x32xf32>
    %213 = vector.extract_strided_slice %205 {offsets = [0, 32], sizes = [8, 32], strides = [1, 1]} : vector<8x128xf32> to vector<8x32xf32>
    %214 = arith.mulf %213, %187 : vector<8x32xf32>
    %215 = vector.extract_strided_slice %205 {offsets = [0, 0], sizes = [8, 32], strides = [1, 1]} : vector<8x128xf32> to vector<8x32xf32>
    %216 = vector.extract_strided_slice %195 {offsets = [0, 64], sizes = [8, 32], strides = [1, 1]} : vector<8x128xf32> to vector<8x32xf32>
    %217 = math.tanh %216 : vector<8x32xf32>
    %218 = arith.mulf %215, %217 : vector<8x32xf32>
    %219 = arith.addf %214, %218 : vector<8x32xf32>
    %220 = vector.extract_strided_slice %200 {offsets = [0, 96], sizes = [8, 32], strides = [1, 1]} : vector<8x128xf32> to vector<8x32xf32>
    %221 = math.tanh %212 : vector<8x32xf32>
    %222 = arith.mulf %220, %221 : vector<8x32xf32>
    %223 = vector.extract_strided_slice %205 {offsets = [0, 96], sizes = [8, 32], strides = [1, 1]} : vector<8x128xf32> to vector<8x32xf32>
    %224 = math.tanh %219 : vector<8x32xf32>
    %225 = arith.mulf %223, %224 : vector<8x32xf32>
    %c32_76 = arith.constant 32 : index
    %c0_77 = arith.constant 0 : index
    %226 = vector.load %arg2[%c32_76, %c0_77] : memref<64x32xf32, #tpu.memory_space<vmem>>, vector<8x32xf32>
    %c24_78 = arith.constant 24 : index
    %c0_79 = arith.constant 0 : index
    %227 = vector.load %arg2[%c24_78, %c0_79] : memref<64x32xf32, #tpu.memory_space<vmem>>, vector<8x32xf32>
    %228 = arith.mulf %222, %226 : vector<8x32xf32>
    %229 = arith.mulf %212, %226 : vector<8x32xf32>
    %230 = arith.mulf %225, %227 : vector<8x32xf32>
    %231 = arith.mulf %219, %227 : vector<8x32xf32>
    %c32_80 = arith.constant 32 : index
    %c0_81 = arith.constant 0 : index
    %232 = vector.load %arg8[%c32_80, %c0_81] : memref<64x64xf32, #tpu.memory_space<vmem>>, vector<8x32xf32>
    tpu.vector_store %arg8[%c32_80, %c0_81], %228 {strides = array<i32>} : memref<64x64xf32, #tpu.memory_space<vmem>>, vector<8x32xf32>,
    %c24_82 = arith.constant 24 : index
    %c32_83 = arith.constant 32 : index
    %233 = vector.load %arg8[%c24_82, %c32_83] : memref<64x64xf32, #tpu.memory_space<vmem>>, vector<8x32xf32>
    tpu.vector_store %arg8[%c24_82, %c32_83], %230 {strides = array<i32>} : memref<64x64xf32, #tpu.memory_space<vmem>>, vector<8x32xf32>,
    %c40_84 = arith.constant 40 : index
    %c0_85 = arith.constant 0 : index
    %234 = vector.load %arg7[%c40_84, %c0_85] : memref<64x256xf32, #tpu.memory_space<vmem>>, vector<8x128xf32>
    %cst_86 = arith.constant dense<0.000000e+00> : vector<8x128xf32>
    %235 = tpu.matmul %228, %8, %cst_86 {dimension_numbers = #tpu.dot_dimension_numbers<[1], [0], [0], [1], [0, 0, 1, 1], [], []>} : vector<8x32xf32>, vector<32x128xf32>, vector<8x128xf32> -> vector<8x128xf32>
    %236 = arith.addf %234, %235 : vector<8x128xf32>
    %c16_87 = arith.constant 16 : index
    %c128_88 = arith.constant 128 : index
    %237 = vector.load %arg7[%c16_87, %c128_88] : memref<64x256xf32, #tpu.memory_space<vmem>>, vector<8x128xf32>
    %cst_89 = arith.constant dense<0.000000e+00> : vector<8x128xf32>
    %238 = tpu.matmul %230, %9, %cst_89 {dimension_numbers = #tpu.dot_dimension_numbers<[1], [0], [0], [1], [0, 0, 1, 1], [], []>} : vector<8x32xf32>, vector<32x128xf32>, vector<8x128xf32> -> vector<8x128xf32>
    %239 = arith.addf %237, %238 : vector<8x128xf32>
    %240 = arith.negf %236 : vector<8x128xf32>
    %241 = math.exp %240 : vector<8x128xf32>
    %cst_90 = arith.constant 1.000000e+00 : f32
    %242 = vector.broadcast %cst_90 : f32 to vector<8x128xf32>
    %243 = arith.addf %242, %241 : vector<8x128xf32>
    %244 = arith.divf %242, %243 : vector<8x128xf32>
    %245 = arith.negf %239 : vector<8x128xf32>
    %246 = math.exp %245 : vector<8x128xf32>
    %cst_91 = arith.constant 1.000000e+00 : f32
    %247 = vector.broadcast %cst_91 : f32 to vector<8x128xf32>
    %248 = arith.addf %247, %246 : vector<8x128xf32>
    %249 = arith.divf %247, %248 : vector<8x128xf32>
    %250 = vector.extract_strided_slice %244 {offsets = [0, 32], sizes = [8, 32], strides = [1, 1]} : vector<8x128xf32> to vector<8x32xf32>
    %251 = arith.mulf %250, %229 : vector<8x32xf32>
    %252 = vector.extract_strided_slice %244 {offsets = [0, 0], sizes = [8, 32], strides = [1, 1]} : vector<8x128xf32> to vector<8x32xf32>
    %253 = vector.extract_strided_slice %236 {offsets = [0, 64], sizes = [8, 32], strides = [1, 1]} : vector<8x128xf32> to vector<8x32xf32>
    %254 = math.tanh %253 : vector<8x32xf32>
    %255 = arith.mulf %252, %254 : vector<8x32xf32>
    %256 = arith.addf %251, %255 : vector<8x32xf32>
    %257 = vector.extract_strided_slice %249 {offsets = [0, 32], sizes = [8, 32], strides = [1, 1]} : vector<8x128xf32> to vector<8x32xf32>
    %258 = arith.mulf %257, %231 : vector<8x32xf32>
    %259 = vector.extract_strided_slice %249 {offsets = [0, 0], sizes = [8, 32], strides = [1, 1]} : vector<8x128xf32> to vector<8x32xf32>
    %260 = vector.extract_strided_slice %239 {offsets = [0, 64], sizes = [8, 32], strides = [1, 1]} : vector<8x128xf32> to vector<8x32xf32>
    %261 = math.tanh %260 : vector<8x32xf32>
    %262 = arith.mulf %259, %261 : vector<8x32xf32>
    %263 = arith.addf %258, %262 : vector<8x32xf32>
    %264 = vector.extract_strided_slice %244 {offsets = [0, 96], sizes = [8, 32], strides = [1, 1]} : vector<8x128xf32> to vector<8x32xf32>
    %265 = math.tanh %256 : vector<8x32xf32>
    %266 = arith.mulf %264, %265 : vector<8x32xf32>
    %267 = vector.extract_strided_slice %249 {offsets = [0, 96], sizes = [8, 32], strides = [1, 1]} : vector<8x128xf32> to vector<8x32xf32>
    %268 = math.tanh %263 : vector<8x32xf32>
    %269 = arith.mulf %267, %268 : vector<8x32xf32>
    %c40_92 = arith.constant 40 : index
    %c0_93 = arith.constant 0 : index
    %270 = vector.load %arg2[%c40_92, %c0_93] : memref<64x32xf32, #tpu.memory_space<vmem>>, vector<8x32xf32>
    %c16_94 = arith.constant 16 : index
    %c0_95 = arith.constant 0 : index
    %271 = vector.load %arg2[%c16_94, %c0_95] : memref<64x32xf32, #tpu.memory_space<vmem>>, vector<8x32xf32>
    %272 = arith.mulf %266, %270 : vector<8x32xf32>
    %273 = arith.mulf %256, %270 : vector<8x32xf32>
    %274 = arith.mulf %269, %271 : vector<8x32xf32>
    %275 = arith.mulf %263, %271 : vector<8x32xf32>
    %c40_96 = arith.constant 40 : index
    %c0_97 = arith.constant 0 : index
    %276 = vector.load %arg8[%c40_96, %c0_97] : memref<64x64xf32, #tpu.memory_space<vmem>>, vector<8x32xf32>
    tpu.vector_store %arg8[%c40_96, %c0_97], %272 {strides = array<i32>} : memref<64x64xf32, #tpu.memory_space<vmem>>, vector<8x32xf32>,
    %c16_98 = arith.constant 16 : index
    %c32_99 = arith.constant 32 : index
    %277 = vector.load %arg8[%c16_98, %c32_99] : memref<64x64xf32, #tpu.memory_space<vmem>>, vector<8x32xf32>
    tpu.vector_store %arg8[%c16_98, %c32_99], %274 {strides = array<i32>} : memref<64x64xf32, #tpu.memory_space<vmem>>, vector<8x32xf32>,
    %c48_100 = arith.constant 48 : index
    %c0_101 = arith.constant 0 : index
    %278 = vector.load %arg7[%c48_100, %c0_101] : memref<64x256xf32, #tpu.memory_space<vmem>>, vector<8x128xf32>
    %cst_102 = arith.constant dense<0.000000e+00> : vector<8x128xf32>
    %279 = tpu.matmul %272, %8, %cst_102 {dimension_numbers = #tpu.dot_dimension_numbers<[1], [0], [0], [1], [0, 0, 1, 1], [], []>} : vector<8x32xf32>, vector<32x128xf32>, vector<8x128xf32> -> vector<8x128xf32>
    %280 = arith.addf %278, %279 : vector<8x128xf32>
    %c8_103 = arith.constant 8 : index
    %c128_104 = arith.constant 128 : index
    %281 = vector.load %arg7[%c8_103, %c128_104] : memref<64x256xf32, #tpu.memory_space<vmem>>, vector<8x128xf32>
    %cst_105 = arith.constant dense<0.000000e+00> : vector<8x128xf32>
    %282 = tpu.matmul %274, %9, %cst_105 {dimension_numbers = #tpu.dot_dimension_numbers<[1], [0], [0], [1], [0, 0, 1, 1], [], []>} : vector<8x32xf32>, vector<32x128xf32>, vector<8x128xf32> -> vector<8x128xf32>
    %283 = arith.addf %281, %282 : vector<8x128xf32>
    %284 = arith.negf %280 : vector<8x128xf32>
    %285 = math.exp %284 : vector<8x128xf32>
    %cst_106 = arith.constant 1.000000e+00 : f32
    %286 = vector.broadcast %cst_106 : f32 to vector<8x128xf32>
    %287 = arith.addf %286, %285 : vector<8x128xf32>
    %288 = arith.divf %286, %287 : vector<8x128xf32>
    %289 = arith.negf %283 : vector<8x128xf32>
    %290 = math.exp %289 : vector<8x128xf32>
    %cst_107 = arith.constant 1.000000e+00 : f32
    %291 = vector.broadcast %cst_107 : f32 to vector<8x128xf32>
    %292 = arith.addf %291, %290 : vector<8x128xf32>
    %293 = arith.divf %291, %292 : vector<8x128xf32>
    %294 = vector.extract_strided_slice %288 {offsets = [0, 32], sizes = [8, 32], strides = [1, 1]} : vector<8x128xf32> to vector<8x32xf32>
    %295 = arith.mulf %294, %273 : vector<8x32xf32>
    %296 = vector.extract_strided_slice %288 {offsets = [0, 0], sizes = [8, 32], strides = [1, 1]} : vector<8x128xf32> to vector<8x32xf32>
    %297 = vector.extract_strided_slice %280 {offsets = [0, 64], sizes = [8, 32], strides = [1, 1]} : vector<8x128xf32> to vector<8x32xf32>
    %298 = math.tanh %297 : vector<8x32xf32>
    %299 = arith.mulf %296, %298 : vector<8x32xf32>
    %300 = arith.addf %295, %299 : vector<8x32xf32>
    %301 = vector.extract_strided_slice %293 {offsets = [0, 32], sizes = [8, 32], strides = [1, 1]} : vector<8x128xf32> to vector<8x32xf32>
    %302 = arith.mulf %301, %275 : vector<8x32xf32>
    %303 = vector.extract_strided_slice %293 {offsets = [0, 0], sizes = [8, 32], strides = [1, 1]} : vector<8x128xf32> to vector<8x32xf32>
    %304 = vector.extract_strided_slice %283 {offsets = [0, 64], sizes = [8, 32], strides = [1, 1]} : vector<8x128xf32> to vector<8x32xf32>
    %305 = math.tanh %304 : vector<8x32xf32>
    %306 = arith.mulf %303, %305 : vector<8x32xf32>
    %307 = arith.addf %302, %306 : vector<8x32xf32>
    %308 = vector.extract_strided_slice %288 {offsets = [0, 96], sizes = [8, 32], strides = [1, 1]} : vector<8x128xf32> to vector<8x32xf32>
    %309 = math.tanh %300 : vector<8x32xf32>
    %310 = arith.mulf %308, %309 : vector<8x32xf32>
    %311 = vector.extract_strided_slice %293 {offsets = [0, 96], sizes = [8, 32], strides = [1, 1]} : vector<8x128xf32> to vector<8x32xf32>
    %312 = math.tanh %307 : vector<8x32xf32>
    %313 = arith.mulf %311, %312 : vector<8x32xf32>
    %c48_108 = arith.constant 48 : index
    %c0_109 = arith.constant 0 : index
    %314 = vector.load %arg2[%c48_108, %c0_109] : memref<64x32xf32, #tpu.memory_space<vmem>>, vector<8x32xf32>
    %c8_110 = arith.constant 8 : index
    %c0_111 = arith.constant 0 : index
    %315 = vector.load %arg2[%c8_110, %c0_111] : memref<64x32xf32, #tpu.memory_space<vmem>>, vector<8x32xf32>
    %316 = arith.mulf %310, %314 : vector<8x32xf32>
    %317 = arith.mulf %300, %314 : vector<8x32xf32>
    %318 = arith.mulf %313, %315 : vector<8x32xf32>
    %319 = arith.mulf %307, %315 : vector<8x32xf32>
    %c48_112 = arith.constant 48 : index
    %c0_113 = arith.constant 0 : index
    %320 = vector.load %arg8[%c48_112, %c0_113] : memref<64x64xf32, #tpu.memory_space<vmem>>, vector<8x32xf32>
    tpu.vector_store %arg8[%c48_112, %c0_113], %316 {strides = array<i32>} : memref<64x64xf32, #tpu.memory_space<vmem>>, vector<8x32xf32>,
    %c8_114 = arith.constant 8 : index
    %c32_115 = arith.constant 32 : index
    %321 = vector.load %arg8[%c8_114, %c32_115] : memref<64x64xf32, #tpu.memory_space<vmem>>, vector<8x32xf32>
    tpu.vector_store %arg8[%c8_114, %c32_115], %318 {strides = array<i32>} : memref<64x64xf32, #tpu.memory_space<vmem>>, vector<8x32xf32>,
    %c56_116 = arith.constant 56 : index
    %c0_117 = arith.constant 0 : index
    %322 = vector.load %arg7[%c56_116, %c0_117] : memref<64x256xf32, #tpu.memory_space<vmem>>, vector<8x128xf32>
    %cst_118 = arith.constant dense<0.000000e+00> : vector<8x128xf32>
    %323 = tpu.matmul %316, %8, %cst_118 {dimension_numbers = #tpu.dot_dimension_numbers<[1], [0], [0], [1], [0, 0, 1, 1], [], []>} : vector<8x32xf32>, vector<32x128xf32>, vector<8x128xf32> -> vector<8x128xf32>
    %324 = arith.addf %322, %323 : vector<8x128xf32>
    %c0_119 = arith.constant 0 : index
    %c128_120 = arith.constant 128 : index
    %325 = vector.load %arg7[%c0_119, %c128_120] : memref<64x256xf32, #tpu.memory_space<vmem>>, vector<8x128xf32>
    %cst_121 = arith.constant dense<0.000000e+00> : vector<8x128xf32>
    %326 = tpu.matmul %318, %9, %cst_121 {dimension_numbers = #tpu.dot_dimension_numbers<[1], [0], [0], [1], [0, 0, 1, 1], [], []>} : vector<8x32xf32>, vector<32x128xf32>, vector<8x128xf32> -> vector<8x128xf32>
    %327 = arith.addf %325, %326 : vector<8x128xf32>
    %328 = arith.negf %324 : vector<8x128xf32>
    %329 = math.exp %328 : vector<8x128xf32>
    %cst_122 = arith.constant 1.000000e+00 : f32
    %330 = vector.broadcast %cst_122 : f32 to vector<8x128xf32>
    %331 = arith.addf %330, %329 : vector<8x128xf32>
    %332 = arith.divf %330, %331 : vector<8x128xf32>
    %333 = arith.negf %327 : vector<8x128xf32>
    %334 = math.exp %333 : vector<8x128xf32>
    %cst_123 = arith.constant 1.000000e+00 : f32
    %335 = vector.broadcast %cst_123 : f32 to vector<8x128xf32>
    %336 = arith.addf %335, %334 : vector<8x128xf32>
    %337 = arith.divf %335, %336 : vector<8x128xf32>
    %338 = vector.extract_strided_slice %332 {offsets = [0, 32], sizes = [8, 32], strides = [1, 1]} : vector<8x128xf32> to vector<8x32xf32>
    %339 = arith.mulf %338, %317 : vector<8x32xf32>
    %340 = vector.extract_strided_slice %332 {offsets = [0, 0], sizes = [8, 32], strides = [1, 1]} : vector<8x128xf32> to vector<8x32xf32>
    %341 = vector.extract_strided_slice %324 {offsets = [0, 64], sizes = [8, 32], strides = [1, 1]} : vector<8x128xf32> to vector<8x32xf32>
    %342 = math.tanh %341 : vector<8x32xf32>
    %343 = arith.mulf %340, %342 : vector<8x32xf32>
    %344 = arith.addf %339, %343 : vector<8x32xf32>
    %345 = vector.extract_strided_slice %337 {offsets = [0, 32], sizes = [8, 32], strides = [1, 1]} : vector<8x128xf32> to vector<8x32xf32>
    %346 = arith.mulf %345, %319 : vector<8x32xf32>
    %347 = vector.extract_strided_slice %337 {offsets = [0, 0], sizes = [8, 32], strides = [1, 1]} : vector<8x128xf32> to vector<8x32xf32>
    %348 = vector.extract_strided_slice %327 {offsets = [0, 64], sizes = [8, 32], strides = [1, 1]} : vector<8x128xf32> to vector<8x32xf32>
    %349 = math.tanh %348 : vector<8x32xf32>
    %350 = arith.mulf %347, %349 : vector<8x32xf32>
    %351 = arith.addf %346, %350 : vector<8x32xf32>
    %352 = vector.extract_strided_slice %332 {offsets = [0, 96], sizes = [8, 32], strides = [1, 1]} : vector<8x128xf32> to vector<8x32xf32>
    %353 = math.tanh %344 : vector<8x32xf32>
    %354 = arith.mulf %352, %353 : vector<8x32xf32>
    %355 = vector.extract_strided_slice %337 {offsets = [0, 96], sizes = [8, 32], strides = [1, 1]} : vector<8x128xf32> to vector<8x32xf32>
    %356 = math.tanh %351 : vector<8x32xf32>
    %357 = arith.mulf %355, %356 : vector<8x32xf32>
    %c56_124 = arith.constant 56 : index
    %c0_125 = arith.constant 0 : index
    %358 = vector.load %arg2[%c56_124, %c0_125] : memref<64x32xf32, #tpu.memory_space<vmem>>, vector<8x32xf32>
    %c0_126 = arith.constant 0 : index
    %c0_127 = arith.constant 0 : index
    %359 = vector.load %arg2[%c0_126, %c0_127] : memref<64x32xf32, #tpu.memory_space<vmem>>, vector<8x32xf32>
    %360 = arith.mulf %354, %358 : vector<8x32xf32>
    %361 = arith.mulf %357, %359 : vector<8x32xf32>
    %c56_128 = arith.constant 56 : index
    %c0_129 = arith.constant 0 : index
    %362 = vector.load %arg8[%c56_128, %c0_129] : memref<64x64xf32, #tpu.memory_space<vmem>>, vector<8x32xf32>
    tpu.vector_store %arg8[%c56_128, %c0_129], %360 {strides = array<i32>} : memref<64x64xf32, #tpu.memory_space<vmem>>, vector<8x32xf32>,
    %c0_130 = arith.constant 0 : index
    %c32_131 = arith.constant 32 : index
    %363 = vector.load %arg8[%c0_130, %c32_131] : memref<64x64xf32, #tpu.memory_space<vmem>>, vector<8x32xf32>
    tpu.vector_store %arg8[%c0_130, %c32_131], %361 {strides = array<i32>} : memref<64x64xf32, #tpu.memory_space<vmem>>, vector<8x32xf32>,
    %c0_132 = arith.constant 0 : index
    %c0_133 = arith.constant 0 : index
    %364 = vector.load %arg8[%c0_132, %c0_133] : memref<64x64xf32, #tpu.memory_space<vmem>>, vector<64x64xf32>
    %c0_134 = arith.constant 0 : index
    %c0_135 = arith.constant 0 : index
    %365 = vector.load %arg4[%c0_134, %c0_135] : memref<97x256xf32, #tpu.memory_space<vmem>>, vector<64x256xf32>
    %c64 = arith.constant 64 : index
    %c0_136 = arith.constant 0 : index
    %366 = vector.load %arg4[%c64, %c0_136] : memref<97x256xf32, #tpu.memory_space<vmem>>, vector<32x256xf32>
    %c96 = arith.constant 96 : index
    %c0_137 = arith.constant 0 : index
    %367 = vector.load %arg4[%c96, %c0_137] : memref<97x256xf32, #tpu.memory_space<vmem>>, vector<1x256xf32>
    %cst_138 = arith.constant dense<0.000000e+00> : vector<64x256xf32>
    %368 = tpu.matmul %364, %365, %cst_138 {dimension_numbers = #tpu.dot_dimension_numbers<[1], [0], [0], [1], [0, 0, 1, 1], [], []>} : vector<64x64xf32>, vector<64x256xf32>, vector<64x256xf32> -> vector<64x256xf32>
    %369 = vector.broadcast %367 : vector<1x256xf32> to vector<64x256xf32>
    %370 = arith.addf %368, %369 : vector<64x256xf32>
    %c0_139 = arith.constant 0 : index
    %c0_140 = arith.constant 0 : index
    %371 = vector.load %arg7[%c0_139, %c0_140] : memref<64x256xf32, #tpu.memory_space<vmem>>, vector<64x256xf32>
    tpu.vector_store %arg7[%c0_139, %c0_140], %370 {strides = array<i32>} : memref<64x256xf32, #tpu.memory_space<vmem>>, vector<64x256xf32>,
    %372 = vector.extract_strided_slice %366 {offsets = [0, 0], sizes = [32, 128], strides = [1, 1]} : vector<32x256xf32> to vector<32x128xf32>
    %373 = vector.extract_strided_slice %366 {offsets = [0, 128], sizes = [32, 128], strides = [1, 1]} : vector<32x256xf32> to vector<32x128xf32>
    %cst_141 = arith.constant 0.000000e+00 : f32
    %374 = vector.broadcast %cst_141 : f32 to vector<8x32xf32>
    %cst_142 = arith.constant 0.000000e+00 : f32
    %375 = vector.broadcast %cst_142 : f32 to vector<8x32xf32>
    %cst_143 = arith.constant 0.000000e+00 : f32
    %376 = vector.broadcast %cst_143 : f32 to vector<8x32xf32>
    %cst_144 = arith.constant 0.000000e+00 : f32
    %377 = vector.broadcast %cst_144 : f32 to vector<8x32xf32>
    %c0_145 = arith.constant 0 : index
    %c0_146 = arith.constant 0 : index
    %378 = vector.load %arg7[%c0_145, %c0_146] : memref<64x256xf32, #tpu.memory_space<vmem>>, vector<8x128xf32>
    %cst_147 = arith.constant dense<0.000000e+00> : vector<8x128xf32>
    %379 = tpu.matmul %374, %372, %cst_147 {dimension_numbers = #tpu.dot_dimension_numbers<[1], [0], [0], [1], [0, 0, 1, 1], [], []>} : vector<8x32xf32>, vector<32x128xf32>, vector<8x128xf32> -> vector<8x128xf32>
    %380 = arith.addf %378, %379 : vector<8x128xf32>
    %c56_148 = arith.constant 56 : index
    %c128_149 = arith.constant 128 : index
    %381 = vector.load %arg7[%c56_148, %c128_149] : memref<64x256xf32, #tpu.memory_space<vmem>>, vector<8x128xf32>
    %cst_150 = arith.constant dense<0.000000e+00> : vector<8x128xf32>
    %382 = tpu.matmul %376, %373, %cst_150 {dimension_numbers = #tpu.dot_dimension_numbers<[1], [0], [0], [1], [0, 0, 1, 1], [], []>} : vector<8x32xf32>, vector<32x128xf32>, vector<8x128xf32> -> vector<8x128xf32>
    %383 = arith.addf %381, %382 : vector<8x128xf32>
    %384 = arith.negf %380 : vector<8x128xf32>
    %385 = math.exp %384 : vector<8x128xf32>
    %cst_151 = arith.constant 1.000000e+00 : f32
    %386 = vector.broadcast %cst_151 : f32 to vector<8x128xf32>
    %387 = arith.addf %386, %385 : vector<8x128xf32>
    %388 = arith.divf %386, %387 : vector<8x128xf32>
    %389 = arith.negf %383 : vector<8x128xf32>
    %390 = math.exp %389 : vector<8x128xf32>
    %cst_152 = arith.constant 1.000000e+00 : f32
    %391 = vector.broadcast %cst_152 : f32 to vector<8x128xf32>
    %392 = arith.addf %391, %390 : vector<8x128xf32>
    %393 = arith.divf %391, %392 : vector<8x128xf32>
    %394 = vector.extract_strided_slice %388 {offsets = [0, 32], sizes = [8, 32], strides = [1, 1]} : vector<8x128xf32> to vector<8x32xf32>
    %395 = arith.mulf %394, %375 : vector<8x32xf32>
    %396 = vector.extract_strided_slice %388 {offsets = [0, 0], sizes = [8, 32], strides = [1, 1]} : vector<8x128xf32> to vector<8x32xf32>
    %397 = vector.extract_strided_slice %380 {offsets = [0, 64], sizes = [8, 32], strides = [1, 1]} : vector<8x128xf32> to vector<8x32xf32>
    %398 = math.tanh %397 : vector<8x32xf32>
    %399 = arith.mulf %396, %398 : vector<8x32xf32>
    %400 = arith.addf %395, %399 : vector<8x32xf32>
    %401 = vector.extract_strided_slice %393 {offsets = [0, 32], sizes = [8, 32], strides = [1, 1]} : vector<8x128xf32> to vector<8x32xf32>
    %402 = arith.mulf %401, %377 : vector<8x32xf32>
    %403 = vector.extract_strided_slice %393 {offsets = [0, 0], sizes = [8, 32], strides = [1, 1]} : vector<8x128xf32> to vector<8x32xf32>
    %404 = vector.extract_strided_slice %383 {offsets = [0, 64], sizes = [8, 32], strides = [1, 1]} : vector<8x128xf32> to vector<8x32xf32>
    %405 = math.tanh %404 : vector<8x32xf32>
    %406 = arith.mulf %403, %405 : vector<8x32xf32>
    %407 = arith.addf %402, %406 : vector<8x32xf32>
    %408 = vector.extract_strided_slice %388 {offsets = [0, 96], sizes = [8, 32], strides = [1, 1]} : vector<8x128xf32> to vector<8x32xf32>
    %409 = math.tanh %400 : vector<8x32xf32>
    %410 = arith.mulf %408, %409 : vector<8x32xf32>
    %411 = vector.extract_strided_slice %393 {offsets = [0, 96], sizes = [8, 32], strides = [1, 1]} : vector<8x128xf32> to vector<8x32xf32>
    %412 = math.tanh %407 : vector<8x32xf32>
    %413 = arith.mulf %411, %412 : vector<8x32xf32>
    %c0_153 = arith.constant 0 : index
    %c0_154 = arith.constant 0 : index
    %414 = vector.load %arg2[%c0_153, %c0_154] : memref<64x32xf32, #tpu.memory_space<vmem>>, vector<8x32xf32>
    %c56_155 = arith.constant 56 : index
    %c0_156 = arith.constant 0 : index
    %415 = vector.load %arg2[%c56_155, %c0_156] : memref<64x32xf32, #tpu.memory_space<vmem>>, vector<8x32xf32>
    %416 = arith.mulf %410, %414 : vector<8x32xf32>
    %417 = arith.mulf %400, %414 : vector<8x32xf32>
    %418 = arith.mulf %413, %415 : vector<8x32xf32>
    %419 = arith.mulf %407, %415 : vector<8x32xf32>
    %c0_157 = arith.constant 0 : index
    %c0_158 = arith.constant 0 : index
    %420 = vector.load %arg8[%c0_157, %c0_158] : memref<64x64xf32, #tpu.memory_space<vmem>>, vector<8x32xf32>
    tpu.vector_store %arg8[%c0_157, %c0_158], %416 {strides = array<i32>} : memref<64x64xf32, #tpu.memory_space<vmem>>, vector<8x32xf32>,
    %c56_159 = arith.constant 56 : index
    %c32_160 = arith.constant 32 : index
    %421 = vector.load %arg8[%c56_159, %c32_160] : memref<64x64xf32, #tpu.memory_space<vmem>>, vector<8x32xf32>
    tpu.vector_store %arg8[%c56_159, %c32_160], %418 {strides = array<i32>} : memref<64x64xf32, #tpu.memory_space<vmem>>, vector<8x32xf32>,
    %c8_161 = arith.constant 8 : index
    %c0_162 = arith.constant 0 : index
    %422 = vector.load %arg7[%c8_161, %c0_162] : memref<64x256xf32, #tpu.memory_space<vmem>>, vector<8x128xf32>
    %cst_163 = arith.constant dense<0.000000e+00> : vector<8x128xf32>
    %423 = tpu.matmul %416, %372, %cst_163 {dimension_numbers = #tpu.dot_dimension_numbers<[1], [0], [0], [1], [0, 0, 1, 1], [], []>} : vector<8x32xf32>, vector<32x128xf32>, vector<8x128xf32> -> vector<8x128xf32>
    %424 = arith.addf %422, %423 : vector<8x128xf32>
    %c48_164 = arith.constant 48 : index
    %c128_165 = arith.constant 128 : index
    %425 = vector.load %arg7[%c48_164, %c128_165] : memref<64x256xf32, #tpu.memory_space<vmem>>, vector<8x128xf32>
    %cst_166 = arith.constant dense<0.000000e+00> : vector<8x128xf32>
    %426 = tpu.matmul %418, %373, %cst_166 {dimension_numbers = #tpu.dot_dimension_numbers<[1], [0], [0], [1], [0, 0, 1, 1], [], []>} : vector<8x32xf32>, vector<32x128xf32>, vector<8x128xf32> -> vector<8x128xf32>
    %427 = arith.addf %425, %426 : vector<8x128xf32>
    %428 = arith.negf %424 : vector<8x128xf32>
    %429 = math.exp %428 : vector<8x128xf32>
    %cst_167 = arith.constant 1.000000e+00 : f32
    %430 = vector.broadcast %cst_167 : f32 to vector<8x128xf32>
    %431 = arith.addf %430, %429 : vector<8x128xf32>
    %432 = arith.divf %430, %431 : vector<8x128xf32>
    %433 = arith.negf %427 : vector<8x128xf32>
    %434 = math.exp %433 : vector<8x128xf32>
    %cst_168 = arith.constant 1.000000e+00 : f32
    %435 = vector.broadcast %cst_168 : f32 to vector<8x128xf32>
    %436 = arith.addf %435, %434 : vector<8x128xf32>
    %437 = arith.divf %435, %436 : vector<8x128xf32>
    %438 = vector.extract_strided_slice %432 {offsets = [0, 32], sizes = [8, 32], strides = [1, 1]} : vector<8x128xf32> to vector<8x32xf32>
    %439 = arith.mulf %438, %417 : vector<8x32xf32>
    %440 = vector.extract_strided_slice %432 {offsets = [0, 0], sizes = [8, 32], strides = [1, 1]} : vector<8x128xf32> to vector<8x32xf32>
    %441 = vector.extract_strided_slice %424 {offsets = [0, 64], sizes = [8, 32], strides = [1, 1]} : vector<8x128xf32> to vector<8x32xf32>
    %442 = math.tanh %441 : vector<8x32xf32>
    %443 = arith.mulf %440, %442 : vector<8x32xf32>
    %444 = arith.addf %439, %443 : vector<8x32xf32>
    %445 = vector.extract_strided_slice %437 {offsets = [0, 32], sizes = [8, 32], strides = [1, 1]} : vector<8x128xf32> to vector<8x32xf32>
    %446 = arith.mulf %445, %419 : vector<8x32xf32>
    %447 = vector.extract_strided_slice %437 {offsets = [0, 0], sizes = [8, 32], strides = [1, 1]} : vector<8x128xf32> to vector<8x32xf32>
    %448 = vector.extract_strided_slice %427 {offsets = [0, 64], sizes = [8, 32], strides = [1, 1]} : vector<8x128xf32> to vector<8x32xf32>
    %449 = math.tanh %448 : vector<8x32xf32>
    %450 = arith.mulf %447, %449 : vector<8x32xf32>
    %451 = arith.addf %446, %450 : vector<8x32xf32>
    %452 = vector.extract_strided_slice %432 {offsets = [0, 96], sizes = [8, 32], strides = [1, 1]} : vector<8x128xf32> to vector<8x32xf32>
    %453 = math.tanh %444 : vector<8x32xf32>
    %454 = arith.mulf %452, %453 : vector<8x32xf32>
    %455 = vector.extract_strided_slice %437 {offsets = [0, 96], sizes = [8, 32], strides = [1, 1]} : vector<8x128xf32> to vector<8x32xf32>
    %456 = math.tanh %451 : vector<8x32xf32>
    %457 = arith.mulf %455, %456 : vector<8x32xf32>
    %c8_169 = arith.constant 8 : index
    %c0_170 = arith.constant 0 : index
    %458 = vector.load %arg2[%c8_169, %c0_170] : memref<64x32xf32, #tpu.memory_space<vmem>>, vector<8x32xf32>
    %c48_171 = arith.constant 48 : index
    %c0_172 = arith.constant 0 : index
    %459 = vector.load %arg2[%c48_171, %c0_172] : memref<64x32xf32, #tpu.memory_space<vmem>>, vector<8x32xf32>
    %460 = arith.mulf %454, %458 : vector<8x32xf32>
    %461 = arith.mulf %444, %458 : vector<8x32xf32>
    %462 = arith.mulf %457, %459 : vector<8x32xf32>
    %463 = arith.mulf %451, %459 : vector<8x32xf32>
    %c8_173 = arith.constant 8 : index
    %c0_174 = arith.constant 0 : index
    %464 = vector.load %arg8[%c8_173, %c0_174] : memref<64x64xf32, #tpu.memory_space<vmem>>, vector<8x32xf32>
    tpu.vector_store %arg8[%c8_173, %c0_174], %460 {strides = array<i32>} : memref<64x64xf32, #tpu.memory_space<vmem>>, vector<8x32xf32>,
    %c48_175 = arith.constant 48 : index
    %c32_176 = arith.constant 32 : index
    %465 = vector.load %arg8[%c48_175, %c32_176] : memref<64x64xf32, #tpu.memory_space<vmem>>, vector<8x32xf32>
    tpu.vector_store %arg8[%c48_175, %c32_176], %462 {strides = array<i32>} : memref<64x64xf32, #tpu.memory_space<vmem>>, vector<8x32xf32>,
    %c16_177 = arith.constant 16 : index
    %c0_178 = arith.constant 0 : index
    %466 = vector.load %arg7[%c16_177, %c0_178] : memref<64x256xf32, #tpu.memory_space<vmem>>, vector<8x128xf32>
    %cst_179 = arith.constant dense<0.000000e+00> : vector<8x128xf32>
    %467 = tpu.matmul %460, %372, %cst_179 {dimension_numbers = #tpu.dot_dimension_numbers<[1], [0], [0], [1], [0, 0, 1, 1], [], []>} : vector<8x32xf32>, vector<32x128xf32>, vector<8x128xf32> -> vector<8x128xf32>
    %468 = arith.addf %466, %467 : vector<8x128xf32>
    %c40_180 = arith.constant 40 : index
    %c128_181 = arith.constant 128 : index
    %469 = vector.load %arg7[%c40_180, %c128_181] : memref<64x256xf32, #tpu.memory_space<vmem>>, vector<8x128xf32>
    %cst_182 = arith.constant dense<0.000000e+00> : vector<8x128xf32>
    %470 = tpu.matmul %462, %373, %cst_182 {dimension_numbers = #tpu.dot_dimension_numbers<[1], [0], [0], [1], [0, 0, 1, 1], [], []>} : vector<8x32xf32>, vector<32x128xf32>, vector<8x128xf32> -> vector<8x128xf32>
    %471 = arith.addf %469, %470 : vector<8x128xf32>
    %472 = arith.negf %468 : vector<8x128xf32>
    %473 = math.exp %472 : vector<8x128xf32>
    %cst_183 = arith.constant 1.000000e+00 : f32
    %474 = vector.broadcast %cst_183 : f32 to vector<8x128xf32>
    %475 = arith.addf %474, %473 : vector<8x128xf32>
    %476 = arith.divf %474, %475 : vector<8x128xf32>
    %477 = arith.negf %471 : vector<8x128xf32>
    %478 = math.exp %477 : vector<8x128xf32>
    %cst_184 = arith.constant 1.000000e+00 : f32
    %479 = vector.broadcast %cst_184 : f32 to vector<8x128xf32>
    %480 = arith.addf %479, %478 : vector<8x128xf32>
    %481 = arith.divf %479, %480 : vector<8x128xf32>
    %482 = vector.extract_strided_slice %476 {offsets = [0, 32], sizes = [8, 32], strides = [1, 1]} : vector<8x128xf32> to vector<8x32xf32>
    %483 = arith.mulf %482, %461 : vector<8x32xf32>
    %484 = vector.extract_strided_slice %476 {offsets = [0, 0], sizes = [8, 32], strides = [1, 1]} : vector<8x128xf32> to vector<8x32xf32>
    %485 = vector.extract_strided_slice %468 {offsets = [0, 64], sizes = [8, 32], strides = [1, 1]} : vector<8x128xf32> to vector<8x32xf32>
    %486 = math.tanh %485 : vector<8x32xf32>
    %487 = arith.mulf %484, %486 : vector<8x32xf32>
    %488 = arith.addf %483, %487 : vector<8x32xf32>
    %489 = vector.extract_strided_slice %481 {offsets = [0, 32], sizes = [8, 32], strides = [1, 1]} : vector<8x128xf32> to vector<8x32xf32>
    %490 = arith.mulf %489, %463 : vector<8x32xf32>
    %491 = vector.extract_strided_slice %481 {offsets = [0, 0], sizes = [8, 32], strides = [1, 1]} : vector<8x128xf32> to vector<8x32xf32>
    %492 = vector.extract_strided_slice %471 {offsets = [0, 64], sizes = [8, 32], strides = [1, 1]} : vector<8x128xf32> to vector<8x32xf32>
    %493 = math.tanh %492 : vector<8x32xf32>
    %494 = arith.mulf %491, %493 : vector<8x32xf32>
    %495 = arith.addf %490, %494 : vector<8x32xf32>
    %496 = vector.extract_strided_slice %476 {offsets = [0, 96], sizes = [8, 32], strides = [1, 1]} : vector<8x128xf32> to vector<8x32xf32>
    %497 = math.tanh %488 : vector<8x32xf32>
    %498 = arith.mulf %496, %497 : vector<8x32xf32>
    %499 = vector.extract_strided_slice %481 {offsets = [0, 96], sizes = [8, 32], strides = [1, 1]} : vector<8x128xf32> to vector<8x32xf32>
    %500 = math.tanh %495 : vector<8x32xf32>
    %501 = arith.mulf %499, %500 : vector<8x32xf32>
    %c16_185 = arith.constant 16 : index
    %c0_186 = arith.constant 0 : index
    %502 = vector.load %arg2[%c16_185, %c0_186] : memref<64x32xf32, #tpu.memory_space<vmem>>, vector<8x32xf32>
    %c40_187 = arith.constant 40 : index
    %c0_188 = arith.constant 0 : index
    %503 = vector.load %arg2[%c40_187, %c0_188] : memref<64x32xf32, #tpu.memory_space<vmem>>, vector<8x32xf32>
    %504 = arith.mulf %498, %502 : vector<8x32xf32>
    %505 = arith.mulf %488, %502 : vector<8x32xf32>
    %506 = arith.mulf %501, %503 : vector<8x32xf32>
    %507 = arith.mulf %495, %503 : vector<8x32xf32>
    %c16_189 = arith.constant 16 : index
    %c0_190 = arith.constant 0 : index
    %508 = vector.load %arg8[%c16_189, %c0_190] : memref<64x64xf32, #tpu.memory_space<vmem>>, vector<8x32xf32>
    tpu.vector_store %arg8[%c16_189, %c0_190], %504 {strides = array<i32>} : memref<64x64xf32, #tpu.memory_space<vmem>>, vector<8x32xf32>,
    %c40_191 = arith.constant 40 : index
    %c32_192 = arith.constant 32 : index
    %509 = vector.load %arg8[%c40_191, %c32_192] : memref<64x64xf32, #tpu.memory_space<vmem>>, vector<8x32xf32>
    tpu.vector_store %arg8[%c40_191, %c32_192], %506 {strides = array<i32>} : memref<64x64xf32, #tpu.memory_space<vmem>>, vector<8x32xf32>,
    %c24_193 = arith.constant 24 : index
    %c0_194 = arith.constant 0 : index
    %510 = vector.load %arg7[%c24_193, %c0_194] : memref<64x256xf32, #tpu.memory_space<vmem>>, vector<8x128xf32>
    %cst_195 = arith.constant dense<0.000000e+00> : vector<8x128xf32>
    %511 = tpu.matmul %504, %372, %cst_195 {dimension_numbers = #tpu.dot_dimension_numbers<[1], [0], [0], [1], [0, 0, 1, 1], [], []>} : vector<8x32xf32>, vector<32x128xf32>, vector<8x128xf32> -> vector<8x128xf32>
    %512 = arith.addf %510, %511 : vector<8x128xf32>
    %c32_196 = arith.constant 32 : index
    %c128_197 = arith.constant 128 : index
    %513 = vector.load %arg7[%c32_196, %c128_197] : memref<64x256xf32, #tpu.memory_space<vmem>>, vector<8x128xf32>
    %cst_198 = arith.constant dense<0.000000e+00> : vector<8x128xf32>
    %514 = tpu.matmul %506, %373, %cst_198 {dimension_numbers = #tpu.dot_dimension_numbers<[1], [0], [0], [1], [0, 0, 1, 1], [], []>} : vector<8x32xf32>, vector<32x128xf32>, vector<8x128xf32> -> vector<8x128xf32>
    %515 = arith.addf %513, %514 : vector<8x128xf32>
    %516 = arith.negf %512 : vector<8x128xf32>
    %517 = math.exp %516 : vector<8x128xf32>
    %cst_199 = arith.constant 1.000000e+00 : f32
    %518 = vector.broadcast %cst_199 : f32 to vector<8x128xf32>
    %519 = arith.addf %518, %517 : vector<8x128xf32>
    %520 = arith.divf %518, %519 : vector<8x128xf32>
    %521 = arith.negf %515 : vector<8x128xf32>
    %522 = math.exp %521 : vector<8x128xf32>
    %cst_200 = arith.constant 1.000000e+00 : f32
    %523 = vector.broadcast %cst_200 : f32 to vector<8x128xf32>
    %524 = arith.addf %523, %522 : vector<8x128xf32>
    %525 = arith.divf %523, %524 : vector<8x128xf32>
    %526 = vector.extract_strided_slice %520 {offsets = [0, 32], sizes = [8, 32], strides = [1, 1]} : vector<8x128xf32> to vector<8x32xf32>
    %527 = arith.mulf %526, %505 : vector<8x32xf32>
    %528 = vector.extract_strided_slice %520 {offsets = [0, 0], sizes = [8, 32], strides = [1, 1]} : vector<8x128xf32> to vector<8x32xf32>
    %529 = vector.extract_strided_slice %512 {offsets = [0, 64], sizes = [8, 32], strides = [1, 1]} : vector<8x128xf32> to vector<8x32xf32>
    %530 = math.tanh %529 : vector<8x32xf32>
    %531 = arith.mulf %528, %530 : vector<8x32xf32>
    %532 = arith.addf %527, %531 : vector<8x32xf32>
    %533 = vector.extract_strided_slice %525 {offsets = [0, 32], sizes = [8, 32], strides = [1, 1]} : vector<8x128xf32> to vector<8x32xf32>
    %534 = arith.mulf %533, %507 : vector<8x32xf32>
    %535 = vector.extract_strided_slice %525 {offsets = [0, 0], sizes = [8, 32], strides = [1, 1]} : vector<8x128xf32> to vector<8x32xf32>
    %536 = vector.extract_strided_slice %515 {offsets = [0, 64], sizes = [8, 32], strides = [1, 1]} : vector<8x128xf32> to vector<8x32xf32>
    %537 = math.tanh %536 : vector<8x32xf32>
    %538 = arith.mulf %535, %537 : vector<8x32xf32>
    %539 = arith.addf %534, %538 : vector<8x32xf32>
    %540 = vector.extract_strided_slice %520 {offsets = [0, 96], sizes = [8, 32], strides = [1, 1]} : vector<8x128xf32> to vector<8x32xf32>
    %541 = math.tanh %532 : vector<8x32xf32>
    %542 = arith.mulf %540, %541 : vector<8x32xf32>
    %543 = vector.extract_strided_slice %525 {offsets = [0, 96], sizes = [8, 32], strides = [1, 1]} : vector<8x128xf32> to vector<8x32xf32>
    %544 = math.tanh %539 : vector<8x32xf32>
    %545 = arith.mulf %543, %544 : vector<8x32xf32>
    %c24_201 = arith.constant 24 : index
    %c0_202 = arith.constant 0 : index
    %546 = vector.load %arg2[%c24_201, %c0_202] : memref<64x32xf32, #tpu.memory_space<vmem>>, vector<8x32xf32>
    %c32_203 = arith.constant 32 : index
    %c0_204 = arith.constant 0 : index
    %547 = vector.load %arg2[%c32_203, %c0_204] : memref<64x32xf32, #tpu.memory_space<vmem>>, vector<8x32xf32>
    %548 = arith.mulf %542, %546 : vector<8x32xf32>
    %549 = arith.mulf %532, %546 : vector<8x32xf32>
    %550 = arith.mulf %545, %547 : vector<8x32xf32>
    %551 = arith.mulf %539, %547 : vector<8x32xf32>
    %c24_205 = arith.constant 24 : index
    %c0_206 = arith.constant 0 : index
    %552 = vector.load %arg8[%c24_205, %c0_206] : memref<64x64xf32, #tpu.memory_space<vmem>>, vector<8x32xf32>
    tpu.vector_store %arg8[%c24_205, %c0_206], %548 {strides = array<i32>} : memref<64x64xf32, #tpu.memory_space<vmem>>, vector<8x32xf32>,
    %c32_207 = arith.constant 32 : index
    %c32_208 = arith.constant 32 : index
    %553 = vector.load %arg8[%c32_207, %c32_208] : memref<64x64xf32, #tpu.memory_space<vmem>>, vector<8x32xf32>
    tpu.vector_store %arg8[%c32_207, %c32_208], %550 {strides = array<i32>} : memref<64x64xf32, #tpu.memory_space<vmem>>, vector<8x32xf32>,
    %c32_209 = arith.constant 32 : index
    %c0_210 = arith.constant 0 : index
    %554 = vector.load %arg7[%c32_209, %c0_210] : memref<64x256xf32, #tpu.memory_space<vmem>>, vector<8x128xf32>
    %cst_211 = arith.constant dense<0.000000e+00> : vector<8x128xf32>
    %555 = tpu.matmul %548, %372, %cst_211 {dimension_numbers = #tpu.dot_dimension_numbers<[1], [0], [0], [1], [0, 0, 1, 1], [], []>} : vector<8x32xf32>, vector<32x128xf32>, vector<8x128xf32> -> vector<8x128xf32>
    %556 = arith.addf %554, %555 : vector<8x128xf32>
    %c24_212 = arith.constant 24 : index
    %c128_213 = arith.constant 128 : index
    %557 = vector.load %arg7[%c24_212, %c128_213] : memref<64x256xf32, #tpu.memory_space<vmem>>, vector<8x128xf32>
    %cst_214 = arith.constant dense<0.000000e+00> : vector<8x128xf32>
    %558 = tpu.matmul %550, %373, %cst_214 {dimension_numbers = #tpu.dot_dimension_numbers<[1], [0], [0], [1], [0, 0, 1, 1], [], []>} : vector<8x32xf32>, vector<32x128xf32>, vector<8x128xf32> -> vector<8x128xf32>
    %559 = arith.addf %557, %558 : vector<8x128xf32>
    %560 = arith.negf %556 : vector<8x128xf32>
    %561 = math.exp %560 : vector<8x128xf32>
    %cst_215 = arith.constant 1.000000e+00 : f32
    %562 = vector.broadcast %cst_215 : f32 to vector<8x128xf32>
    %563 = arith.addf %562, %561 : vector<8x128xf32>
    %564 = arith.divf %562, %563 : vector<8x128xf32>
    %565 = arith.negf %559 : vector<8x128xf32>
    %566 = math.exp %565 : vector<8x128xf32>
    %cst_216 = arith.constant 1.000000e+00 : f32
    %567 = vector.broadcast %cst_216 : f32 to vector<8x128xf32>
    %568 = arith.addf %567, %566 : vector<8x128xf32>
    %569 = arith.divf %567, %568 : vector<8x128xf32>
    %570 = vector.extract_strided_slice %564 {offsets = [0, 32], sizes = [8, 32], strides = [1, 1]} : vector<8x128xf32> to vector<8x32xf32>
    %571 = arith.mulf %570, %549 : vector<8x32xf32>
    %572 = vector.extract_strided_slice %564 {offsets = [0, 0], sizes = [8, 32], strides = [1, 1]} : vector<8x128xf32> to vector<8x32xf32>
    %573 = vector.extract_strided_slice %556 {offsets = [0, 64], sizes = [8, 32], strides = [1, 1]} : vector<8x128xf32> to vector<8x32xf32>
    %574 = math.tanh %573 : vector<8x32xf32>
    %575 = arith.mulf %572, %574 : vector<8x32xf32>
    %576 = arith.addf %571, %575 : vector<8x32xf32>
    %577 = vector.extract_strided_slice %569 {offsets = [0, 32], sizes = [8, 32], strides = [1, 1]} : vector<8x128xf32> to vector<8x32xf32>
    %578 = arith.mulf %577, %551 : vector<8x32xf32>
    %579 = vector.extract_strided_slice %569 {offsets = [0, 0], sizes = [8, 32], strides = [1, 1]} : vector<8x128xf32> to vector<8x32xf32>
    %580 = vector.extract_strided_slice %559 {offsets = [0, 64], sizes = [8, 32], strides = [1, 1]} : vector<8x128xf32> to vector<8x32xf32>
    %581 = math.tanh %580 : vector<8x32xf32>
    %582 = arith.mulf %579, %581 : vector<8x32xf32>
    %583 = arith.addf %578, %582 : vector<8x32xf32>
    %584 = vector.extract_strided_slice %564 {offsets = [0, 96], sizes = [8, 32], strides = [1, 1]} : vector<8x128xf32> to vector<8x32xf32>
    %585 = math.tanh %576 : vector<8x32xf32>
    %586 = arith.mulf %584, %585 : vector<8x32xf32>
    %587 = vector.extract_strided_slice %569 {offsets = [0, 96], sizes = [8, 32], strides = [1, 1]} : vector<8x128xf32> to vector<8x32xf32>
    %588 = math.tanh %583 : vector<8x32xf32>
    %589 = arith.mulf %587, %588 : vector<8x32xf32>
    %c32_217 = arith.constant 32 : index
    %c0_218 = arith.constant 0 : index
    %590 = vector.load %arg2[%c32_217, %c0_218] : memref<64x32xf32, #tpu.memory_space<vmem>>, vector<8x32xf32>
    %c24_219 = arith.constant 24 : index
    %c0_220 = arith.constant 0 : index
    %591 = vector.load %arg2[%c24_219, %c0_220] : memref<64x32xf32, #tpu.memory_space<vmem>>, vector<8x32xf32>
    %592 = arith.mulf %586, %590 : vector<8x32xf32>
    %593 = arith.mulf %576, %590 : vector<8x32xf32>
    %594 = arith.mulf %589, %591 : vector<8x32xf32>
    %595 = arith.mulf %583, %591 : vector<8x32xf32>
    %c32_221 = arith.constant 32 : index
    %c0_222 = arith.constant 0 : index
    %596 = vector.load %arg8[%c32_221, %c0_222] : memref<64x64xf32, #tpu.memory_space<vmem>>, vector<8x32xf32>
    tpu.vector_store %arg8[%c32_221, %c0_222], %592 {strides = array<i32>} : memref<64x64xf32, #tpu.memory_space<vmem>>, vector<8x32xf32>,
    %c24_223 = arith.constant 24 : index
    %c32_224 = arith.constant 32 : index
    %597 = vector.load %arg8[%c24_223, %c32_224] : memref<64x64xf32, #tpu.memory_space<vmem>>, vector<8x32xf32>
    tpu.vector_store %arg8[%c24_223, %c32_224], %594 {strides = array<i32>} : memref<64x64xf32, #tpu.memory_space<vmem>>, vector<8x32xf32>,
    %c40_225 = arith.constant 40 : index
    %c0_226 = arith.constant 0 : index
    %598 = vector.load %arg7[%c40_225, %c0_226] : memref<64x256xf32, #tpu.memory_space<vmem>>, vector<8x128xf32>
    %cst_227 = arith.constant dense<0.000000e+00> : vector<8x128xf32>
    %599 = tpu.matmul %592, %372, %cst_227 {dimension_numbers = #tpu.dot_dimension_numbers<[1], [0], [0], [1], [0, 0, 1, 1], [], []>} : vector<8x32xf32>, vector<32x128xf32>, vector<8x128xf32> -> vector<8x128xf32>
    %600 = arith.addf %598, %599 : vector<8x128xf32>
    %c16_228 = arith.constant 16 : index
    %c128_229 = arith.constant 128 : index
    %601 = vector.load %arg7[%c16_228, %c128_229] : memref<64x256xf32, #tpu.memory_space<vmem>>, vector<8x128xf32>
    %cst_230 = arith.constant dense<0.000000e+00> : vector<8x128xf32>
    %602 = tpu.matmul %594, %373, %cst_230 {dimension_numbers = #tpu.dot_dimension_numbers<[1], [0], [0], [1], [0, 0, 1, 1], [], []>} : vector<8x32xf32>, vector<32x128xf32>, vector<8x128xf32> -> vector<8x128xf32>
    %603 = arith.addf %601, %602 : vector<8x128xf32>
    %604 = arith.negf %600 : vector<8x128xf32>
    %605 = math.exp %604 : vector<8x128xf32>
    %cst_231 = arith.constant 1.000000e+00 : f32
    %606 = vector.broadcast %cst_231 : f32 to vector<8x128xf32>
    %607 = arith.addf %606, %605 : vector<8x128xf32>
    %608 = arith.divf %606, %607 : vector<8x128xf32>
    %609 = arith.negf %603 : vector<8x128xf32>
    %610 = math.exp %609 : vector<8x128xf32>
    %cst_232 = arith.constant 1.000000e+00 : f32
    %611 = vector.broadcast %cst_232 : f32 to vector<8x128xf32>
    %612 = arith.addf %611, %610 : vector<8x128xf32>
    %613 = arith.divf %611, %612 : vector<8x128xf32>
    %614 = vector.extract_strided_slice %608 {offsets = [0, 32], sizes = [8, 32], strides = [1, 1]} : vector<8x128xf32> to vector<8x32xf32>
    %615 = arith.mulf %614, %593 : vector<8x32xf32>
    %616 = vector.extract_strided_slice %608 {offsets = [0, 0], sizes = [8, 32], strides = [1, 1]} : vector<8x128xf32> to vector<8x32xf32>
    %617 = vector.extract_strided_slice %600 {offsets = [0, 64], sizes = [8, 32], strides = [1, 1]} : vector<8x128xf32> to vector<8x32xf32>
    %618 = math.tanh %617 : vector<8x32xf32>
    %619 = arith.mulf %616, %618 : vector<8x32xf32>
    %620 = arith.addf %615, %619 : vector<8x32xf32>
    %621 = vector.extract_strided_slice %613 {offsets = [0, 32], sizes = [8, 32], strides = [1, 1]} : vector<8x128xf32> to vector<8x32xf32>
    %622 = arith.mulf %621, %595 : vector<8x32xf32>
    %623 = vector.extract_strided_slice %613 {offsets = [0, 0], sizes = [8, 32], strides = [1, 1]} : vector<8x128xf32> to vector<8x32xf32>
    %624 = vector.extract_strided_slice %603 {offsets = [0, 64], sizes = [8, 32], strides = [1, 1]} : vector<8x128xf32> to vector<8x32xf32>
    %625 = math.tanh %624 : vector<8x32xf32>
    %626 = arith.mulf %623, %625 : vector<8x32xf32>
    %627 = arith.addf %622, %626 : vector<8x32xf32>
    %628 = vector.extract_strided_slice %608 {offsets = [0, 96], sizes = [8, 32], strides = [1, 1]} : vector<8x128xf32> to vector<8x32xf32>
    %629 = math.tanh %620 : vector<8x32xf32>
    %630 = arith.mulf %628, %629 : vector<8x32xf32>
    %631 = vector.extract_strided_slice %613 {offsets = [0, 96], sizes = [8, 32], strides = [1, 1]} : vector<8x128xf32> to vector<8x32xf32>
    %632 = math.tanh %627 : vector<8x32xf32>
    %633 = arith.mulf %631, %632 : vector<8x32xf32>
    %c40_233 = arith.constant 40 : index
    %c0_234 = arith.constant 0 : index
    %634 = vector.load %arg2[%c40_233, %c0_234] : memref<64x32xf32, #tpu.memory_space<vmem>>, vector<8x32xf32>
    %c16_235 = arith.constant 16 : index
    %c0_236 = arith.constant 0 : index
    %635 = vector.load %arg2[%c16_235, %c0_236] : memref<64x32xf32, #tpu.memory_space<vmem>>, vector<8x32xf32>
    %636 = arith.mulf %630, %634 : vector<8x32xf32>
    %637 = arith.mulf %620, %634 : vector<8x32xf32>
    %638 = arith.mulf %633, %635 : vector<8x32xf32>
    %639 = arith.mulf %627, %635 : vector<8x32xf32>
    %c40_237 = arith.constant 40 : index
    %c0_238 = arith.constant 0 : index
    %640 = vector.load %arg8[%c40_237, %c0_238] : memref<64x64xf32, #tpu.memory_space<vmem>>, vector<8x32xf32>
    tpu.vector_store %arg8[%c40_237, %c0_238], %636 {strides = array<i32>} : memref<64x64xf32, #tpu.memory_space<vmem>>, vector<8x32xf32>,
    %c16_239 = arith.constant 16 : index
    %c32_240 = arith.constant 32 : index
    %641 = vector.load %arg8[%c16_239, %c32_240] : memref<64x64xf32, #tpu.memory_space<vmem>>, vector<8x32xf32>
    tpu.vector_store %arg8[%c16_239, %c32_240], %638 {strides = array<i32>} : memref<64x64xf32, #tpu.memory_space<vmem>>, vector<8x32xf32>,
    %c48_241 = arith.constant 48 : index
    %c0_242 = arith.constant 0 : index
    %642 = vector.load %arg7[%c48_241, %c0_242] : memref<64x256xf32, #tpu.memory_space<vmem>>, vector<8x128xf32>
    %cst_243 = arith.constant dense<0.000000e+00> : vector<8x128xf32>
    %643 = tpu.matmul %636, %372, %cst_243 {dimension_numbers = #tpu.dot_dimension_numbers<[1], [0], [0], [1], [0, 0, 1, 1], [], []>} : vector<8x32xf32>, vector<32x128xf32>, vector<8x128xf32> -> vector<8x128xf32>
    %644 = arith.addf %642, %643 : vector<8x128xf32>
    %c8_244 = arith.constant 8 : index
    %c128_245 = arith.constant 128 : index
    %645 = vector.load %arg7[%c8_244, %c128_245] : memref<64x256xf32, #tpu.memory_space<vmem>>, vector<8x128xf32>
    %cst_246 = arith.constant dense<0.000000e+00> : vector<8x128xf32>
    %646 = tpu.matmul %638, %373, %cst_246 {dimension_numbers = #tpu.dot_dimension_numbers<[1], [0], [0], [1], [0, 0, 1, 1], [], []>} : vector<8x32xf32>, vector<32x128xf32>, vector<8x128xf32> -> vector<8x128xf32>
    %647 = arith.addf %645, %646 : vector<8x128xf32>
    %648 = arith.negf %644 : vector<8x128xf32>
    %649 = math.exp %648 : vector<8x128xf32>
    %cst_247 = arith.constant 1.000000e+00 : f32
    %650 = vector.broadcast %cst_247 : f32 to vector<8x128xf32>
    %651 = arith.addf %650, %649 : vector<8x128xf32>
    %652 = arith.divf %650, %651 : vector<8x128xf32>
    %653 = arith.negf %647 : vector<8x128xf32>
    %654 = math.exp %653 : vector<8x128xf32>
    %cst_248 = arith.constant 1.000000e+00 : f32
    %655 = vector.broadcast %cst_248 : f32 to vector<8x128xf32>
    %656 = arith.addf %655, %654 : vector<8x128xf32>
    %657 = arith.divf %655, %656 : vector<8x128xf32>
    %658 = vector.extract_strided_slice %652 {offsets = [0, 32], sizes = [8, 32], strides = [1, 1]} : vector<8x128xf32> to vector<8x32xf32>
    %659 = arith.mulf %658, %637 : vector<8x32xf32>
    %660 = vector.extract_strided_slice %652 {offsets = [0, 0], sizes = [8, 32], strides = [1, 1]} : vector<8x128xf32> to vector<8x32xf32>
    %661 = vector.extract_strided_slice %644 {offsets = [0, 64], sizes = [8, 32], strides = [1, 1]} : vector<8x128xf32> to vector<8x32xf32>
    %662 = math.tanh %661 : vector<8x32xf32>
    %663 = arith.mulf %660, %662 : vector<8x32xf32>
    %664 = arith.addf %659, %663 : vector<8x32xf32>
    %665 = vector.extract_strided_slice %657 {offsets = [0, 32], sizes = [8, 32], strides = [1, 1]} : vector<8x128xf32> to vector<8x32xf32>
    %666 = arith.mulf %665, %639 : vector<8x32xf32>
    %667 = vector.extract_strided_slice %657 {offsets = [0, 0], sizes = [8, 32], strides = [1, 1]} : vector<8x128xf32> to vector<8x32xf32>
    %668 = vector.extract_strided_slice %647 {offsets = [0, 64], sizes = [8, 32], strides = [1, 1]} : vector<8x128xf32> to vector<8x32xf32>
    %669 = math.tanh %668 : vector<8x32xf32>
    %670 = arith.mulf %667, %669 : vector<8x32xf32>
    %671 = arith.addf %666, %670 : vector<8x32xf32>
    %672 = vector.extract_strided_slice %652 {offsets = [0, 96], sizes = [8, 32], strides = [1, 1]} : vector<8x128xf32> to vector<8x32xf32>
    %673 = math.tanh %664 : vector<8x32xf32>
    %674 = arith.mulf %672, %673 : vector<8x32xf32>
    %675 = vector.extract_strided_slice %657 {offsets = [0, 96], sizes = [8, 32], strides = [1, 1]} : vector<8x128xf32> to vector<8x32xf32>
    %676 = math.tanh %671 : vector<8x32xf32>
    %677 = arith.mulf %675, %676 : vector<8x32xf32>
    %c48_249 = arith.constant 48 : index
    %c0_250 = arith.constant 0 : index
    %678 = vector.load %arg2[%c48_249, %c0_250] : memref<64x32xf32, #tpu.memory_space<vmem>>, vector<8x32xf32>
    %c8_251 = arith.constant 8 : index
    %c0_252 = arith.constant 0 : index
    %679 = vector.load %arg2[%c8_251, %c0_252] : memref<64x32xf32, #tpu.memory_space<vmem>>, vector<8x32xf32>
    %680 = arith.mulf %674, %678 : vector<8x32xf32>
    %681 = arith.mulf %664, %678 : vector<8x32xf32>
    %682 = arith.mulf %677, %679 : vector<8x32xf32>
    %683 = arith.mulf %671, %679 : vector<8x32xf32>
    %c48_253 = arith.constant 48 : index
    %c0_254 = arith.constant 0 : index
    %684 = vector.load %arg8[%c48_253, %c0_254] : memref<64x64xf32, #tpu.memory_space<vmem>>, vector<8x32xf32>
    tpu.vector_store %arg8[%c48_253, %c0_254], %680 {strides = array<i32>} : memref<64x64xf32, #tpu.memory_space<vmem>>, vector<8x32xf32>,
    %c8_255 = arith.constant 8 : index
    %c32_256 = arith.constant 32 : index
    %685 = vector.load %arg8[%c8_255, %c32_256] : memref<64x64xf32, #tpu.memory_space<vmem>>, vector<8x32xf32>
    tpu.vector_store %arg8[%c8_255, %c32_256], %682 {strides = array<i32>} : memref<64x64xf32, #tpu.memory_space<vmem>>, vector<8x32xf32>,
    %c56_257 = arith.constant 56 : index
    %c0_258 = arith.constant 0 : index
    %686 = vector.load %arg7[%c56_257, %c0_258] : memref<64x256xf32, #tpu.memory_space<vmem>>, vector<8x128xf32>
    %cst_259 = arith.constant dense<0.000000e+00> : vector<8x128xf32>
    %687 = tpu.matmul %680, %372, %cst_259 {dimension_numbers = #tpu.dot_dimension_numbers<[1], [0], [0], [1], [0, 0, 1, 1], [], []>} : vector<8x32xf32>, vector<32x128xf32>, vector<8x128xf32> -> vector<8x128xf32>
    %688 = arith.addf %686, %687 : vector<8x128xf32>
    %c0_260 = arith.constant 0 : index
    %c128_261 = arith.constant 128 : index
    %689 = vector.load %arg7[%c0_260, %c128_261] : memref<64x256xf32, #tpu.memory_space<vmem>>, vector<8x128xf32>
    %cst_262 = arith.constant dense<0.000000e+00> : vector<8x128xf32>
    %690 = tpu.matmul %682, %373, %cst_262 {dimension_numbers = #tpu.dot_dimension_numbers<[1], [0], [0], [1], [0, 0, 1, 1], [], []>} : vector<8x32xf32>, vector<32x128xf32>, vector<8x128xf32> -> vector<8x128xf32>
    %691 = arith.addf %689, %690 : vector<8x128xf32>
    %692 = arith.negf %688 : vector<8x128xf32>
    %693 = math.exp %692 : vector<8x128xf32>
    %cst_263 = arith.constant 1.000000e+00 : f32
    %694 = vector.broadcast %cst_263 : f32 to vector<8x128xf32>
    %695 = arith.addf %694, %693 : vector<8x128xf32>
    %696 = arith.divf %694, %695 : vector<8x128xf32>
    %697 = arith.negf %691 : vector<8x128xf32>
    %698 = math.exp %697 : vector<8x128xf32>
    %cst_264 = arith.constant 1.000000e+00 : f32
    %699 = vector.broadcast %cst_264 : f32 to vector<8x128xf32>
    %700 = arith.addf %699, %698 : vector<8x128xf32>
    %701 = arith.divf %699, %700 : vector<8x128xf32>
    %702 = vector.extract_strided_slice %696 {offsets = [0, 32], sizes = [8, 32], strides = [1, 1]} : vector<8x128xf32> to vector<8x32xf32>
    %703 = arith.mulf %702, %681 : vector<8x32xf32>
    %704 = vector.extract_strided_slice %696 {offsets = [0, 0], sizes = [8, 32], strides = [1, 1]} : vector<8x128xf32> to vector<8x32xf32>
    %705 = vector.extract_strided_slice %688 {offsets = [0, 64], sizes = [8, 32], strides = [1, 1]} : vector<8x128xf32> to vector<8x32xf32>
    %706 = math.tanh %705 : vector<8x32xf32>
    %707 = arith.mulf %704, %706 : vector<8x32xf32>
    %708 = arith.addf %703, %707 : vector<8x32xf32>
    %709 = vector.extract_strided_slice %701 {offsets = [0, 32], sizes = [8, 32], strides = [1, 1]} : vector<8x128xf32> to vector<8x32xf32>
    %710 = arith.mulf %709, %683 : vector<8x32xf32>
    %711 = vector.extract_strided_slice %701 {offsets = [0, 0], sizes = [8, 32], strides = [1, 1]} : vector<8x128xf32> to vector<8x32xf32>
    %712 = vector.extract_strided_slice %691 {offsets = [0, 64], sizes = [8, 32], strides = [1, 1]} : vector<8x128xf32> to vector<8x32xf32>
    %713 = math.tanh %712 : vector<8x32xf32>
    %714 = arith.mulf %711, %713 : vector<8x32xf32>
    %715 = arith.addf %710, %714 : vector<8x32xf32>
    %716 = vector.extract_strided_slice %696 {offsets = [0, 96], sizes = [8, 32], strides = [1, 1]} : vector<8x128xf32> to vector<8x32xf32>
    %717 = math.tanh %708 : vector<8x32xf32>
    %718 = arith.mulf %716, %717 : vector<8x32xf32>
    %719 = vector.extract_strided_slice %701 {offsets = [0, 96], sizes = [8, 32], strides = [1, 1]} : vector<8x128xf32> to vector<8x32xf32>
    %720 = math.tanh %715 : vector<8x32xf32>
    %721 = arith.mulf %719, %720 : vector<8x32xf32>
    %c56_265 = arith.constant 56 : index
    %c0_266 = arith.constant 0 : index
    %722 = vector.load %arg2[%c56_265, %c0_266] : memref<64x32xf32, #tpu.memory_space<vmem>>, vector<8x32xf32>
    %c0_267 = arith.constant 0 : index
    %c0_268 = arith.constant 0 : index
    %723 = vector.load %arg2[%c0_267, %c0_268] : memref<64x32xf32, #tpu.memory_space<vmem>>, vector<8x32xf32>
    %724 = arith.mulf %718, %722 : vector<8x32xf32>
    %725 = arith.mulf %721, %723 : vector<8x32xf32>
    %c56_269 = arith.constant 56 : index
    %c0_270 = arith.constant 0 : index
    %726 = vector.load %arg8[%c56_269, %c0_270] : memref<64x64xf32, #tpu.memory_space<vmem>>, vector<8x32xf32>
    tpu.vector_store %arg8[%c56_269, %c0_270], %724 {strides = array<i32>} : memref<64x64xf32, #tpu.memory_space<vmem>>, vector<8x32xf32>,
    %c0_271 = arith.constant 0 : index
    %c32_272 = arith.constant 32 : index
    %727 = vector.load %arg8[%c0_271, %c32_272] : memref<64x64xf32, #tpu.memory_space<vmem>>, vector<8x32xf32>
    tpu.vector_store %arg8[%c0_271, %c32_272], %725 {strides = array<i32>} : memref<64x64xf32, #tpu.memory_space<vmem>>, vector<8x32xf32>,
    %c0_273 = arith.constant 0 : index
    %c0_274 = arith.constant 0 : index
    %728 = vector.load %arg8[%c0_273, %c0_274] : memref<64x64xf32, #tpu.memory_space<vmem>>, vector<64x64xf32>
    %c0_275 = arith.constant 0 : index
    %c0_276 = arith.constant 0 : index
    %729 = vector.load %arg5[%c0_275, %c0_276] : memref<65x128xf32, #tpu.memory_space<vmem>>, vector<64x128xf32>
    %cst_277 = arith.constant dense<0.000000e+00> : vector<64x128xf32>
    %730 = tpu.matmul %728, %729, %cst_277 {dimension_numbers = #tpu.dot_dimension_numbers<[1], [0], [0], [1], [0, 0, 1, 1], [], []>} : vector<64x64xf32>, vector<64x128xf32>, vector<64x128xf32> -> vector<64x128xf32>
    %c64_278 = arith.constant 64 : index
    %c0_279 = arith.constant 0 : index
    %731 = vector.load %arg5[%c64_278, %c0_279] : memref<65x128xf32, #tpu.memory_space<vmem>>, vector<1x128xf32>
    %732 = vector.broadcast %731 : vector<1x128xf32> to vector<64x128xf32>
    %733 = arith.addf %730, %732 : vector<64x128xf32>
    %c0_280 = arith.constant 0 : index
    %c0_281 = arith.constant 0 : index
    %734 = vector.load %arg6[%c0_280, %c0_281] : memref<64x128xf32, #tpu.memory_space<vmem>>, vector<64x128xf32>
    tpu.vector_store %arg6[%c0_280, %c0_281], %733 {strides = array<i32>} : memref<64x128xf32, #tpu.memory_space<vmem>>, vector<64x128xf32>,
    return
  }
  func.func @transform_0(%arg0: i32) -> (i32, i32) {
    %c0_i32 = arith.constant 0 : i32
    %c0_i32_0 = arith.constant 0 : i32
    %c0_i32_1 = arith.constant 0 : i32
    return %c0_i32, %c0_i32_0 : i32, i32
  }
  func.func @transform_1(%arg0: i32) -> (i32, i32) {
    %c0_i32 = arith.constant 0 : i32
    %c0_i32_0 = arith.constant 0 : i32
    %c0_i32_1 = arith.constant 0 : i32
    return %c0_i32, %c0_i32_0 : i32, i32
  }
  func.func @transform_2(%arg0: i32) -> (i32, i32) {
    %c0_i32 = arith.constant 0 : i32
    %c0_i32_0 = arith.constant 0 : i32
    %c0_i32_1 = arith.constant 0 : i32
    return %c0_i32, %c0_i32_0 : i32, i32
  }
  func.func @transform_3(%arg0: i32) -> (i32, i32) {
    %c0_i32 = arith.constant 0 : i32
    %c0_i32_0 = arith.constant 0 : i32
    %c0_i32_1 = arith.constant 0 : i32
    return %c0_i32, %c0_i32_0 : i32, i32
  }
  func.func @transform_4(%arg0: i32) -> (i32, i32) {
    %c0_i32 = arith.constant 0 : i32
    %c0_i32_0 = arith.constant 0 : i32
    %c0_i32_1 = arith.constant 0 : i32
    return %c0_i32, %c0_i32_0 : i32, i32
  }
  func.func @transform_5(%arg0: i32) -> (i32, i32) {
    %c0_i32 = arith.constant 0 : i32
    %c0_i32_0 = arith.constant 0 : i32
    %c0_i32_1 = arith.constant 0 : i32
    return %c0_i32, %c0_i32_0 : i32, i32
  }
}

</mosaic_0001>

<bundles_post_ra>
// kernel: tpu_custom_call.1
= control target key start
LH: loop header
LB: loop body
LE: loop exit
PB: predicated region body
PF: predicated region fallthrough
CT: control target
= control target key end

     0   :  { %10 = vsyncpa [#allocation5], 0  ;;  %s6621_s0 = inlined_call_operand.vmem [shape: f32[64,56], index: 0, kind: input, shape index: {}]   ;;  %s6622_s1 = inlined_call_operand.vmem [shape: f32[64,32], index: 1, kind: input, shape index: {}]   ;;  %s6623_s2 = inlined_call_operand.hbm [shape: f32[89,256], index: 2, kind: input, shape index: {}]   ;;  %s6624_s3 = inlined_call_operand.vmem [shape: f32[97,256], index: 3, kind: input, shape index: {}]   ;;  %s6625_s4 = inlined_call_operand.hbm [shape: f32[65,128], index: 4, kind: input, shape index: {}]   ;;  %s6626_s5 = inlined_call_operand.hbm [shape: f32[64,128], index: 5, kind: output, shape index: {}]  }
   0x1   :  { %11 = vsyncpa [#allocation8], 0 }
   0x2   :  { %12 = vsyncpa [#allocation6], 0  ;;  %s5477_s18 = smov [#allocation4]   ;;  %s5405_s22 = scalar_lea.hbm %s6623_s2, 3072 }
   0x3   :  { %s22_s19 = sshll.u32 %s5477_s18, 4  ;;  %p5406_p0 = scmp.ne.s32.totalorder %s6623_s2, %s5405_s22  ;;  %s23_s19 = int_to_ptr.vmem [resolvable:$true] %s22_s19 }
   0x4   :  { %p5409_p1 = scmp.lt.u32.totalorder %s5405_s22, %s6623_s2 }
   0x6   :  { %p5411_p2 = pnand %p5409_p1, %p5406_p0 }
   0x8   :  { %5414 = shalt.err (!%p5411_p2)
}
   0x9   :  { %s5415_s27 = scalar_lea.vmem %s23_s19, 3072  ;;  %p5420_p4 = scmp.lt.s32.totalorder %s23_s19, %s23_s19 }
   0xa   :  { %p5416_p3 = scmp.ne.s32.totalorder %s23_s19, %s5415_s27  ;;  %p5421_p5 = scmp.lt.s32.totalorder %s5415_s27, %s5415_s27 }
   0xc   :  { %p5422_p6 = por %p5421_p5, %p5420_p4 }
   0xe   :  { %p5423_p7 = pnand %p5422_p6, %p5416_p3 }
  0x10   :  { %5426 = shalt.err (!%p5423_p7)
}
  0x11   :  { %s5478_s28 = smov 256   ;;  %s5479_s29 = smov 16  }
  0x12   :  { %28 = dma.hbm_to_vmem [thread:$0]  %s6623_s2, 3072, %s23_s19, [#allocation5], %s5478_s28, %s5478_s28, %s5479_s29  }
  0x13   :  { %s5480_s7 = smov [#allocation7]   ;;  %s5427_s11 = scalar_lea.hbm %s6625_s4, 1152 }
  0x14   :  { %s36_s8 = sshll.u32 %s5480_s7, 4  ;;  %p5428_p8 = scmp.ne.s32.totalorder %s6625_s4, %s5427_s11  ;;  %s37_s8 = int_to_ptr.vmem [resolvable:$true] %s36_s8 }
  0x15   :  { %p5431_p9 = scmp.lt.u32.totalorder %s5427_s11, %s6625_s4 }
  0x17   :  { %p5433_p10 = pnand %p5431_p9, %p5428_p8 }
  0x19   :  { %5436 = shalt.err (!%p5433_p10)
}
  0x1a   :  { %s5437_s16 = scalar_lea.vmem %s37_s8, 1152  ;;  %p5442_p12 = scmp.lt.s32.totalorder %s37_s8, %s37_s8 }
  0x1b   :  { %p5438_p11 = scmp.ne.s32.totalorder %s37_s8, %s5437_s16  ;;  %p5443_p13 = scmp.lt.s32.totalorder %s5437_s16, %s5437_s16 }
  0x1d   :  { %p5444_p0 = por %p5443_p13, %p5442_p12 }
  0x1f   :  { %p5445_p1 = pnand %p5444_p0, %p5438_p11 }
  0x21   :  { %5448 = shalt.err (!%p5445_p1)
}
  0x22   :  { %s5481_s2 = smov 128   ;;  %s5482_s17 = smov 8  }
  0x23   :  { %42 = dma.hbm_to_vmem [thread:$0]  %s6625_s4, 1152, %s37_s8, [#allocation8], %s5481_s2, %s5481_s2, %s5482_s17  }
  0x24   :  { %5471 = dma.done.wait [#allocation5], 3072  }
  0x25   :  { %5472 = vsyncadd [#allocation5], 4294964224 }
  0x26   :  { %5473 = dma.done.wait [#allocation8], 1152  }
  0x27   :  { %5474 = vsyncadd [#allocation8], 4294966144  ;;  %v5483_v0 = vmov 0.0   ;;  %v58_v1 = vld [vmem:[#allocation4 + $0x8] sm:$0xff]  ;;  %v60_v2 = vld [vmem:[#allocation4 + $0x18] sm:$0xff]  ;;  %vm92_vm0 = vcmask 457728   ;;  %v82_v37 = vlaneseq }
  0x28   :  { %217 = vmatprep.mubr.f32.mxu1 %v5483_v0  ;;  %181 = vmatprep.mubr.f32.mxu0 %v5483_v0  ;;  %v57_v3 = vld [vmem:[#allocation4] sm:$0xff]  ;;  %v4888_v4 = vpack.c.bf16 %v60_v2, %v58_v1  ;;  %v59_v5 = vld [vmem:[#allocation4 + $0x10] sm:$0xff]  ;;  %v62_v6 = vld [vmem:[#allocation4 + $0x28] sm:$0xff]  ;;  %v5484_v30 = vmov 0.0|0.0   ;;  %vm5485_vm1 = vmmov 0   ;;  %s5486_s25 = smov 64  }
  0x29   :  { %v64_v7 = vld [vmem:[#allocation4 + $0x38] sm:$0xff]  ;;  %v4890_v8 = vpack.c.bf16 %v59_v5, %v57_v3  ;;  %v61_v10 = vld [vmem:[#allocation4 + $0x20] sm:$0xff]  ;;  %v63_v11 = vld [vmem:[#allocation4 + $0x30] sm:$0xff]  ;;  %v5597_v38 = vshrl.u32 %v82_v37, 7  ;;  %s5487_s26 = smov 32   ;;  %s5488_s29 = smov 96  }
  0x2a   :  { %v4892_v9 = vpack.c.bf16 %v64_v7, %v62_v6  ;;  %v66_v12 = vld [vmem:[#allocation4 + $0x48] sm:$0xff]  ;;  %5124 = vmatprep.subr.bf16.mxu1 %v4888_v4  ;;  %4889 = vmatprep.subr.bf16.mxu0 %v4888_v4  ;;  %v68_v13 = vld [vmem:[#allocation4 + $0x58] sm:$0xff]  ;;  %v4894_v14 = vpack.c.bf16 %v63_v11, %v61_v10  ;;  %v65_v16 = vld [vmem:[#allocation4 + $0x40] sm:$0xff]  ;;  %vm247_vm2 = vcmask 261120   ;;  %vm471_vm3 = vcmask 523520  }
  0x2b   :  { %5128 = vmatpush1.bf16.msra.mxu1 %v4890_v8  ;;  %4891 = vmatpush1.bf16.msra.mxu0 %v4890_v8  ;;  %v4896_v15 = vpack.c.bf16 %v68_v13, %v66_v12  ;;  %v67_v17 = vld [vmem:[#allocation4 + $0x50] sm:$0xff]  ;;  %v70_v19 = vld [vmem:[#allocation4 + $0x68] sm:$0xff]  ;;  %v73_v21 = vld [vmem:[#allocation4 + $0x80] sm:$0xff]  ;;  %v84_v39 = vsub.s32 0, %v5597_v38  ;;  %v88_v50 = vsub.s32 1, %v5597_v38  ;;  %vm2106_vm4 = vcmask 523264  }
  0x2c   :  { %5125 = vmatprep.subr.bf16.mxu1 %v4892_v9  ;;  %4893 = vmatprep.subr.bf16.mxu0 %v4892_v9  ;;  %v4898_v18 = vpack.c.bf16 %v67_v17, %v65_v16  ;;  %v71_v20 = vld [vmem:[#allocation4 + $0x70] sm:$0xff]  ;;  %v69_v22 = vld [vmem:[#allocation4 + $0x60] sm:$0xff]  ;;  %v72_v28 = vld [vmem:[#allocation4 + $0x78] sm:$0xff] }
  0x2d   :  { %v55_v23 = vld [vmem:[%s6621_s0 + $0x30] sm:$0xff]  ;;  %v5552_v24 = vpack.c.bf16 %v73_v21, %v71_v20  ;;  %v75_v25 = vld [vmem:[#allocation4 + $0x90] sm:$0xff]  ;;  %v74_v29 = vld [vmem:[#allocation4 + $0x88] sm:$0xff] }
  0x2e   :  { %v77_v26 = vld [vmem:[#allocation4 + $0xa0] sm:$0xff]  ;;  %v49_v27 = vld [vmem:[%s6621_s0] sm:$0xff]  ;;  %v56_v31 = vld [vmem:[%s6621_s0 + $0x38] sm:$0xff]  ;;  %v5568_v33 = vpack.c.bf16 %v74_v29, %v72_v28 }
  0x2f   :  { %5129 = vmatpush1.bf16.msra.mxu1 %v4894_v14  ;;  %4895 = vmatpush1.bf16.msra.mxu0 %v4894_v14  ;;  %v5564_v32 = vpack.c.bf16 %v77_v26, %v75_v25  ;;  %v76_v34 = vld [vmem:[#allocation4 + $0x98] sm:$0xff]  ;;  %v78_v35 = vld [vmem:[#allocation4 + $0xa8] sm:$0xff]  ;;  %v442_v9 = vld [vmem:[%s6622_s1] sm:$0xff] }
  0x30   :  { %5126 = vmatprep.subr.bf16.mxu1 %v4896_v15  ;;  %4897 = vmatprep.subr.bf16.mxu0 %v4896_v15  ;;  %v5578_v36 = vpack.c.bf16 %v78_v35, %v76_v34  ;;  %v80_v40 = vld [vmem:[#allocation4 + $0xb0] ss:$8 sm:$0x3]  ;;  %v443_v10 = vld [vmem:[%s6622_s1 + $0x38] sm:$0xff] }
  0x31   :  { %v5606_v44 = vrot.slane %v80_v40, %v84_v39  ;;  %v5616_v53 = vrot.slane %v80_v40, %v88_v50 }
  0x33   :  { %5130 = vmatpush1.bf16.msra.mxu1 %v4898_v18  ;;  %4899 = vmatpush1.bf16.msra.mxu0 %v4898_v18  ;;  %v50_v18 = vld [vmem:[%s6621_s0 + $0x8] sm:$0xff] }
  0x34   :  { %5127 = vmatprep.subr.mxu1 %v70_v19  ;;  %129 = vmatprep.subr.mxu0 %v70_v19 }
  0x37   :  { %5131 = vmatpush1.msra.mxu1 %v69_v22  ;;  %130 = vmatpush1.msra.mxu0 %v69_v22 }
  0x38   :  { %4252 = vmatmul.mubr.msk.f32.vlgmr.msra.gmra.mrb[0].mxu1 %vm92_vm0, %v55_v23  ;;  %4900 = vmatprep.subr.bf16.mxu1 %v5484_v30 }
  0x39   :  { %4902 = vmatpush3.bf16.msra.mxu1 %v5552_v24  ;;  %223 = vmatprep.mubr.f32.mxu1 %v5483_v0 }
  0x3a   :  { %4903 = vmatprep.subr.bf16.mxu1 %v5484_v30  ;;  %4246 = vmatmul.mubr.msk.f32.vlgmr.msra.gmra.mrb[0].mxu0 %vm92_vm0, %v49_v27 }
  0x3b   :  { %187 = vmatprep.mubr.f32.mxu0 %v5483_v0  ;;  %4930 = vmatprep.subr.bf16.mxu0 %v5484_v30 }
  0x3c   :  { %4253 = vmatmul.mubr.msk.f32.gmra.mrb[2].mxu1 %vm92_vm0, %v56_v31  ;;  %4932 = vmatpush3.bf16.msra.mxu0 %v5568_v33 }
  0x3d   :  { %4905 = vmatpush3.bf16.msra.mxu1 %v5564_v32  ;;  %4516 = vmatprep.mubr.msk.f32.mxu1 %vm5485_vm1, %v5483_v0 }
  0x3e   :  { %4906 = vmatprep.subr.bf16.mxu1 %v5484_v30  ;;  %4933 = vmatprep.subr.bf16.mxu0 %v5484_v30 }
  0x3f   :  { %4247 = vmatmul.mubr.msk.f32.gmra.mrb[2].mxu0 %vm92_vm0, %v50_v18  ;;  %v51_v18 = vld [vmem:[%s6621_s0 + $0x10] sm:$0xff] }
  0x40   :  { %4517 = vmatmul.mubr.f32.vlgmr.msra.gmra.mrb[4].mxu1 %v5483_v0  ;;  %4935 = vmatpush3.bf16.msra.mxu0 %v5578_v36 }
  0x41   :  { %4908 = vmatpush3.bf16.msra.mxu1 %v5568_v33  ;;  %4527 = vmatprep.mubr.msk.f32.mxu1 %vm5485_vm1, %v5483_v0 }
  0x42   :  { %4909 = vmatprep.subr.bf16.mxu1 %v5484_v30  ;;  %4942 = vmatprep.subr.bf16.mxu0 %v5484_v30 }
  0x43   :  { %193 = vmatprep.mubr.f32.mxu0 %v5483_v0 }
  0x44   :  { %4248 = vmatmul.mubr.msk.f32.gmra.mrb[4].mxu0 %vm92_vm0, %v51_v18 }
  0x45   :  { %4911 = vmatpush3.bf16.msra.mxu1 %v5578_v36  ;;  %199 = vmatprep.mubr.f32.mxu0 %v5483_v0 }
  0x46   :  { %4912 = vmatprep.subr.bf16.mxu1 %v5484_v30 }
  0x48   :  { %4528 = vmatmul.mubr.f32.vlgmr.msra.gmra.mrb[6].mxu1 %v5483_v0 }
  0x49   :  { %4914 = vmatpush3.bf16.msra.mxu1 %v5552_v24  ;;  %4538 = vmatprep.mubr.msk.f32.mxu1 %vm5485_vm1, %v5483_v0 }
  0x4a   :  { %4915 = vmatprep.subr.bf16.mxu1 %v5484_v30 }
  0x4d   :  { %4917 = vmatpush3.bf16.msra.mxu1 %v5564_v32 }
  0x4e   :  { %4918 = vmatprep.subr.bf16.mxu1 %v5484_v30 }
 0x10b   :  { %v5600_v41 = vpop.f32.mrb[0].mxu1 }
 0x10c   :  { %v5602_v42 = vpop.f32.mrb[1].mxu1 }
 0x10d   :  { %v183_v43 = vpop.f32.mrb[0].mxu0 }
 0x10e   :  { %v5608_v45 = vpop.f32.mrb[1].mxu0  ;;  %v184_v48 = vadd.f32 %v183_v43, %v5606_v44 }
 0x10f   :  { %v5610_v46 = vpop.f32.mrb[2].mxu1 }
 0x110   :  { %v227_v47 = vpop.f32.mrb[3].mxu1 }
 0x111   :  { %v228_v54 = vadd.f32 %v227_v47, %v5616_v53 }
 0x112   :  { %v189_v29 = vpop.f32.mrb[2].mxu0 }
 0x113   :  { %v317_v49 = vpop.f32.mrb[4].mxu1  ;;  %v5664_v35 = vpop.f32.mrb[3].mxu0  ;;  %v190_v37 = vadd.f32 %v189_v29, %v5606_v44 }
 0x114   :  { %v321_v51 = vadd.f32 %v317_v49, %v184_v48  ;;  %v4518_v52 = vpop.f32.mrb[5].mxu1  ;;  %v222_v48 = vadd.f32 %v5602_v42, %v5616_v53 }
 0x116   :  { %5145 = vtanh.f32 %v321_v51  ;;  %v4254_v60 = vmul.f32 -1.442695, %v321_v51 }
 0x11b   :  { %v389_v55 = vpop.f32.mrb[6].mxu1 }
 0x11c   :  { %v393_v56 = vadd.f32 %v389_v55, %v228_v54  ;;  %v4529_v57 = vpop.f32.mrb[7].mxu1 }
 0x11e   :  { %5147 = vtanh.f32 %v393_v56  ;;  %v4255_v61 = vmul.f32 -1.442695, %v393_v56 }
 0x11f   :  { %5149 = vpow2.f32 %v4254_v60 }
 0x120   :  { %v5146_v58 = vpop.eup %5145  ;;  %5151 = vpow2.f32 %v4255_v61 }
 0x121   :  { %409 = vrot.lane.b32.xlu0 %v5146_v58, %s5486_s25 }
 0x128   :  { %v5148_v59 = vpop.eup %5147 }
 0x129   :  { %421 = vrot.lane.b32.xlu0 %v5148_v59, %s5486_s25  ;;  %v5150_v62 = vpop.eup %5149 }
 0x12a   :  { %v397_v63 = vadd.f32 1.0, %v5150_v62  ;;  %v5152_v1 = vpop.eup %5151 }
 0x12b   :  { %v403_v2 = vadd.f32 1.0, %v5152_v1 }
 0x12c   :  { %5153 = vrcp.f32 %v397_v63 }
 0x12d   :  { %5155 = vrcp.f32 %v403_v2 }
 0x136   :  { %v5154_v3 = vpop.eup %5153 }
 0x137   :  { %v5156_v6 = vpop.eup %5155  ;;  %v406_v11 = vmul.f32 0.0, %v5154_v3 }
 0x138   :  { %v418_v14 = vmul.f32 0.0, %v5156_v6 }
 0x193   :  { %v410_v4 = vpop.permute.xlu0 %409 }
 0x194   :  { %v412_v5 = vmul.f32 %v5154_v3, %v410_v4  ;;  %v5678_v4 = vld [vmem:[%s6622_s1 + $0x30] sm:$0xff] }
 0x196   :  { %414 = vrot.lane.b32.xlu1 %v412_v5, %s5487_s26  ;;  %v5685_v5 = vld [vmem:[%s6622_s1 + $0x8] sm:$0xff] }
 0x19b   :  { %v422_v7 = vpop.permute.xlu0 %421 }
 0x19c   :  { %v424_v8 = vmul.f32 %v5156_v6, %v422_v7 }
 0x19e   :  { %426 = vrot.lane.b32.xlu1 %v424_v8, %s5487_s26 }
 0x1a2   :  { %445 = vrot.lane.b32.xlu1 %v442_v9, %s5488_s29 }
 0x1a6   :  { %454 = vrot.lane.b32.xlu1 %v443_v10, %s5488_s29 }
 0x208   :  { %v415_v12 = vpop.permute.xlu1 %414 }
 0x209   :  { %v5631_v13 = vadd.f32 %v415_v12, %v406_v11 }
 0x20b   :  { %5157 = vtanh.f32 %v5631_v13 }
 0x210   :  { %v427_v15 = vpop.permute.xlu1 %426 }
 0x211   :  { %v5634_v16 = vadd.f32 %v427_v15, %v418_v14 }
 0x213   :  { %5159 = vtanh.f32 %v5634_v16 }
 0x214   :  { %v446_v21 = vpop.permute.xlu1 %445 }
 0x215   :  { %v5158_v17 = vpop.eup %5157 }
 0x216   :  { %432 = vrot.lane.b32.xlu0 %v5158_v17, %s5486_s25 }
 0x218   :  { %v455_v26 = vpop.permute.xlu1 %454 }
 0x21d   :  { %v5160_v19 = vpop.eup %5159 }
 0x21e   :  { %438 = vrot.lane.b32.xlu0 %v5160_v19, %s5486_s25  ;;  %v53_v19 = vld [vmem:[%s6621_s0 + $0x20] sm:$0xff] }
 0x288   :  { %v433_v20 = vpop.permute.xlu0 %432 }
 0x289   :  { %v435_v22 = vmul.f32 %v5154_v3, %v433_v20 }
 0x28b   :  { %v448_v23 = vmul.f32 %v446_v21, %v435_v22  ;;  %v54_v21 = vld [vmem:[%s6621_s0 + $0x28] sm:$0xff] }
 0x28d   :  { %463 = vrot.lane.b32.xlu0 %v448_v23, %s5487_s26 }
 0x290   :  { %v439_v25 = vpop.permute.xlu0 %438 }
 0x291   :  { %v441_v27 = vmul.f32 %v5156_v6, %v439_v25 }
 0x293   :  { %v5645_v28 = vmul.f32 %v455_v26, %v441_v27 }
 0x295   :  { %548 = vrot.lane.b32.xlu1 %v5645_v28, %s5487_s26 }
 0x2ff   :  { %v464_v31 = vpop.permute.xlu0 %463 }
 0x300   :  { %466 = vst.msk [vmem:[#allocation3] sm:$0xff] %vm247_vm2, %v464_v31  ;;  %4539 = vmatmul.mubr.msk.f32.vlgmr.msra.gmra.mrb[8].mxu1 %vm247_vm2, %v464_v31 }
 0x301   :  { %4920 = vmatpush3.bf16.msra.mxu1 %v5568_v33  ;;  %4549 = vmatprep.mubr.msk.f32.mxu1 %vm5485_vm1, %v5483_v0 }
 0x302   :  { %4921 = vmatprep.subr.bf16.mxu1 %v5484_v30 }
 0x305   :  { %4923 = vmatpush3.bf16.msra.mxu1 %v5578_v36 }
 0x306   :  { %4924 = vmatprep.subr.bf16.mxu1 %v5484_v30 }
 0x307   :  { %v549_v34 = vpop.permute.xlu1 %548 }
 0x308   :  { %4550 = vmatmul.mubr.msk.f32.vlgmr.msra.gmra.mrb[10].mxu1 %vm247_vm2, %v549_v34 }
 0x309   :  { %4926 = vmatpush3.bf16.msra.mxu1 %v5552_v24  ;;  %4560 = vmatprep.mubr.msk.f32.mxu1 %vm5485_vm1, %v5483_v0 }
 0x30a   :  { %4927 = vmatprep.subr.bf16.mxu1 %v5484_v30 }
 0x30d   :  { %4929 = vmatpush3.bf16.msra.mxu1 %v5564_v32 }
 0x30e   :  { %4936 = vmatprep.subr.bf16.mxu1 %v5484_v30 }
 0x3d3   :  { %v542_v40 = vpop.f32.mrb[8].mxu1 }
 0x3d4   :  { %v546_v43 = vadd.f32 %v542_v40, %v190_v37  ;;  %v4540_v47 = vpop.f32.mrb[9].mxu1  ;;  %v195_v37 = vpop.f32.mrb[4].mxu0 }
 0x3d5   :  { %v5725_v40 = vpop.f32.mrb[5].mxu0 }
 0x3d6   :  { %5161 = vtanh.f32 %v546_v43  ;;  %v4258_v57 = vmul.f32 -1.442695, %v546_v43 }
 0x3db   :  { %v618_v49 = vpop.f32.mrb[10].mxu1 }
 0x3dc   :  { %v622_v51 = vadd.f32 %v618_v49, %v222_v48  ;;  %v4551_v52 = vpop.f32.mrb[11].mxu1 }
 0x3de   :  { %5163 = vtanh.f32 %v622_v51  ;;  %v4259_v56 = vmul.f32 -1.442695, %v622_v51 }
 0x3e0   :  { %v5162_v54 = vpop.eup %5161  ;;  %5165 = vpow2.f32 %v4259_v56 }
 0x3e1   :  { %638 = vrot.lane.b32.xlu1 %v5162_v54, %s5486_s25  ;;  %5167 = vpow2.f32 %v4258_v57 }
 0x3e8   :  { %v5164_v55 = vpop.eup %5163 }
 0x3e9   :  { %650 = vrot.lane.b32.xlu0 %v5164_v55, %s5486_s25 }
 0x3ea   :  { %v5166_v58 = vpop.eup %5165 }
 0x3eb   :  { %v632_v42 = vadd.f32 1.0, %v5166_v58  ;;  %v5168_v59 = vpop.eup %5167 }
 0x3ec   :  { %v626_v60 = vadd.f32 1.0, %v5168_v59  ;;  %v196_v59 = vadd.f32 %v195_v37, %v5606_v44 }
 0x3ed   :  { %458 = vrot.lane.b32.xlu0 %v443_v10, %s5487_s26  ;;  %5169 = vrcp.f32 %v632_v42 }
 0x3ee   :  { %5171 = vrcp.f32 %v626_v60 }
 0x3f1   :  { %449 = vrot.lane.b32.xlu0 %v442_v9, %s5487_s26 }
 0x3f7   :  { %v5170_v61 = vpop.eup %5169 }
 0x3f8   :  { %v5172_v2 = vpop.eup %5171 }
 0x453   :  { %v639_v1 = vpop.permute.xlu1 %638 }
 0x454   :  { %v641_v3 = vmul.f32 %v5172_v2, %v639_v1 }
 0x45b   :  { %v651_v62 = vpop.permute.xlu0 %650 }
 0x45c   :  { %v653_v63 = vmul.f32 %v5170_v61, %v651_v62 }
 0x45e   :  { %655 = vrot.lane.b32.xlu1 %v653_v63, %s5487_s26 }
 0x45f   :  { %v459_v6 = vpop.permute.xlu0 %458 }
 0x460   :  { %v461_v7 = vmul.f32 %v459_v6, %v5634_v16 }
 0x462   :  { %643 = vrot.lane.b32.xlu1 %v641_v3, %s5487_s26  ;;  %v647_v10 = vmul.f32 %v5170_v61, %v461_v7 }
 0x463   :  { %v450_v8 = vpop.permute.xlu0 %449 }
 0x464   :  { %v452_v9 = vmul.f32 %v450_v8, %v5631_v13  ;;  %v52_v13 = vld [vmem:[%s6621_s0 + $0x18] sm:$0xff] }
 0x465   :  { %4249 = vmatmul.mubr.msk.f32.gmra.mrb[6].mxu0 %vm92_vm0, %v52_v13 }
 0x466   :  { %683 = vrot.lane.b32.xlu1 %v5678_v4, %s5488_s29  ;;  %v635_v14 = vmul.f32 %v5172_v2, %v452_v9  ;;  %205 = vmatprep.mubr.f32.mxu0 %v5483_v0 }
 0x469   :  { %4250 = vmatmul.mubr.msk.f32.gmra.mrb[8].mxu0 %vm92_vm0, %v53_v19  ;;  %v5772_v19 = vld [vmem:[%s6622_s1 + $0x10] sm:$0xff] }
 0x46a   :  { %674 = vrot.lane.b32.xlu1 %v5685_v5, %s5488_s29  ;;  %211 = vmatprep.mubr.f32.mxu0 %v5483_v0 }
 0x46d   :  { %4251 = vmatmul.mubr.msk.f32.gmra.mrb[10].mxu0 %vm92_vm0, %v54_v21 }
 0x46e   :  { %4571 = vmatprep.mubr.msk.f32.mxu0 %vm5485_vm1, %v5483_v0 }
 0x4d0   :  { %v656_v11 = vpop.permute.xlu1 %655 }
 0x4d1   :  { %v5691_v12 = vadd.f32 %v656_v11, %v647_v10 }
 0x4d3   :  { %5173 = vtanh.f32 %v5691_v12 }
 0x4d4   :  { %v644_v15 = vpop.permute.xlu1 %643 }
 0x4d5   :  { %v5694_v17 = vadd.f32 %v644_v15, %v635_v14 }
 0x4d7   :  { %5175 = vtanh.f32 %v5694_v17 }
 0x4d8   :  { %v684_v22 = vpop.permute.xlu1 %683 }
 0x4dc   :  { %v675_v29 = vpop.permute.xlu1 %674 }
 0x4dd   :  { %v5174_v16 = vpop.eup %5173 }
 0x4de   :  { %667 = vrot.lane.b32.xlu0 %v5174_v16, %s5486_s25  ;;  %v5765_v16 = vld [vmem:[%s6622_s1 + $0x28] sm:$0xff] }
 0x4e1   :  { %v5176_v20 = vpop.eup %5175 }
 0x4e2   :  { %661 = vrot.lane.b32.xlu0 %v5176_v20, %s5486_s25 }
 0x538   :  { %v5727_v43 = vpop.f32.mrb[6].mxu0 }
 0x539   :  { %v5729_v47 = vpop.f32.mrb[7].mxu0 }
 0x53c   :  { %v5731_v48 = vpop.f32.mrb[8].mxu0 }
 0x53d   :  { %v5733_v49 = vpop.f32.mrb[9].mxu0 }
 0x540   :  { %v5735_v51 = vpop.f32.mrb[10].mxu0 }
 0x541   :  { %v215_v52 = vpop.f32.mrb[11].mxu0 }
 0x542   :  { %v216_v56 = vadd.f32 %v215_v52, %v5616_v53 }
 0x550   :  { %v668_v23 = vpop.permute.xlu0 %667 }
 0x551   :  { %v670_v25 = vmul.f32 %v5170_v61, %v668_v23 }
 0x553   :  { %v5720_v26 = vmul.f32 %v684_v22, %v670_v25 }
 0x554   :  { %v662_v27 = vpop.permute.xlu0 %661 }
 0x555   :  { %v664_v31 = vmul.f32 %v5172_v2, %v662_v27  ;;  %776 = vrot.lane.b32.xlu0 %v5720_v26, %s5487_s26 }
 0x557   :  { %v677_v34 = vmul.f32 %v675_v29, %v664_v31 }
 0x559   :  { %692 = vrot.lane.b32.xlu1 %v677_v34, %s5487_s26 }
 0x5c7   :  { %v777_v54 = vpop.permute.xlu0 %776 }
 0x5c8   :  { %4572 = vmatmul.mubr.msk.f32.vlgmr.msra.gmra.mrb[12].mxu0 %vm247_vm2, %v777_v54 }
 0x5c9   :  { %4944 = vmatpush3.bf16.msra.mxu0 %v5568_v33  ;;  %4593 = vmatprep.mubr.msk.f32.mxu0 %vm5485_vm1, %v5483_v0 }
 0x5ca   :  { %4945 = vmatprep.subr.bf16.mxu0 %v5484_v30 }
 0x5cb   :  { %v693_v55 = vpop.permute.xlu1 %692 }
 0x5cc   :  { %695 = vst.msk [vmem:[#allocation3 + $0x8] sm:$0xff] %vm247_vm2, %v693_v55  ;;  %4561 = vmatmul.mubr.msk.f32.vlgmr.msra.gmra.mrb[12].mxu1 %vm247_vm2, %v693_v55 }
 0x5cd   :  { %4938 = vmatpush3.bf16.msra.mxu1 %v5552_v24  ;;  %4947 = vmatpush3.bf16.msra.mxu0 %v5578_v36 }
 0x5ce   :  { %4939 = vmatprep.subr.bf16.mxu1 %v5484_v30  ;;  %4582 = vmatprep.mubr.msk.f32.mxu1 %vm5485_vm1, %v5483_v0 }
 0x5cf   :  { %4954 = vmatprep.subr.bf16.mxu0 %v5484_v30 }
 0x5d1   :  { %4941 = vmatpush3.bf16.msra.mxu1 %v5564_v32 }
 0x5d2   :  { %4948 = vmatprep.subr.bf16.mxu1 %v5484_v30 }
 0x69b   :  { %v846_v57 = vpop.f32.mrb[12].mxu0 }
 0x69c   :  { %v850_v58 = vadd.f32 %v846_v57, %v216_v56  ;;  %v4573_v42 = vpop.f32.mrb[13].mxu0 }
 0x69e   :  { %5177 = vtanh.f32 %v850_v58  ;;  %v4263_v2 = vmul.f32 -1.442695, %v850_v58 }
 0x69f   :  { %v770_v60 = vpop.f32.mrb[12].mxu1 }
 0x6a0   :  { %v774_v61 = vadd.f32 %v770_v60, %v196_v59  ;;  %v4562_v62 = vpop.f32.mrb[13].mxu1 }
 0x6a1   :  { %v210_v62 = vadd.f32 %v5733_v49, %v5616_v53 }
 0x6a2   :  { %5179 = vtanh.f32 %v774_v61  ;;  %v4262_v3 = vmul.f32 -1.442695, %v774_v61 }
 0x6a3   :  { %5181 = vpow2.f32 %v4263_v2 }
 0x6a4   :  { %5183 = vpow2.f32 %v4262_v3  ;;  %v202_v3 = vadd.f32 %v5727_v43, %v5606_v44 }
 0x6a8   :  { %v5178_v63 = vpop.eup %5177 }
 0x6a9   :  { %878 = vrot.lane.b32.xlu0 %v5178_v63, %s5486_s25 }
 0x6ac   :  { %v5180_v1 = vpop.eup %5179 }
 0x6ad   :  { %687 = vrot.lane.b32.xlu0 %v5678_v4, %s5487_s26  ;;  %866 = vrot.lane.b32.xlu1 %v5180_v1, %s5486_s25  ;;  %v5182_v6 = vpop.eup %5181 }
 0x6ae   :  { %v860_v7 = vadd.f32 1.0, %v5182_v6  ;;  %v5184_v8 = vpop.eup %5183 }
 0x6af   :  { %v854_v9 = vadd.f32 1.0, %v5184_v8 }
 0x6b0   :  { %5185 = vrcp.f32 %v860_v7 }
 0x6b1   :  { %678 = vrot.lane.b32.xlu0 %v5685_v5, %s5487_s26  ;;  %5187 = vrcp.f32 %v854_v9 }
 0x6ba   :  { %v5186_v10 = vpop.eup %5185 }
 0x6bb   :  { %v5188_v15 = vpop.eup %5187 }
 0x71b   :  { %v879_v11 = vpop.permute.xlu0 %878 }
 0x71c   :  { %v881_v14 = vmul.f32 %v5186_v10, %v879_v11 }
 0x71e   :  { %883 = vrot.lane.b32.xlu1 %v881_v14, %s5487_s26 }
 0x71f   :  { %v867_v18 = vpop.permute.xlu1 %866  ;;  %v688_v20 = vpop.permute.xlu0 %687 }
 0x720   :  { %v869_v13 = vmul.f32 %v5188_v15, %v867_v18  ;;  %v690_v21 = vmul.f32 %v688_v20, %v5691_v12 }
 0x722   :  { %871 = vrot.lane.b32.xlu1 %v869_v13, %s5487_s26  ;;  %v875_v25 = vmul.f32 %v5186_v10, %v690_v21 }
 0x723   :  { %v679_v22 = vpop.permute.xlu0 %678 }
 0x724   :  { %v681_v23 = vmul.f32 %v679_v22, %v5694_v17 }
 0x726   :  { %911 = vrot.lane.b32.xlu1 %v5765_v16, %s5488_s29  ;;  %v863_v31 = vmul.f32 %v5188_v15, %v681_v23 }
 0x72a   :  { %902 = vrot.lane.b32.xlu1 %v5772_v19, %s5488_s29 }
 0x790   :  { %v884_v27 = vpop.permute.xlu1 %883 }
 0x791   :  { %v5778_v29 = vadd.f32 %v884_v27, %v875_v25  ;;  %v5821_v27 = vld [vmem:[%s6622_s1 + $0x20] sm:$0xff] }
 0x793   :  { %5189 = vtanh.f32 %v5778_v29 }
 0x794   :  { %v872_v34 = vpop.permute.xlu1 %871 }
 0x795   :  { %v5781_v37 = vadd.f32 %v872_v34, %v863_v31  ;;  %v5828_v31 = vld [vmem:[%s6622_s1 + $0x18] sm:$0xff] }
 0x797   :  { %5191 = vtanh.f32 %v5781_v37 }
 0x798   :  { %v912_v12 = vpop.permute.xlu1 %911 }
 0x79c   :  { %v903_v58 = vpop.permute.xlu1 %902 }
 0x79d   :  { %v5190_v52 = vpop.eup %5189 }
 0x79e   :  { %895 = vrot.lane.b32.xlu0 %v5190_v52, %s5486_s25 }
 0x7a1   :  { %v5192_v54 = vpop.eup %5191 }
 0x7a2   :  { %889 = vrot.lane.b32.xlu0 %v5192_v54, %s5486_s25 }
 0x810   :  { %v896_v17 = vpop.permute.xlu0 %895 }
 0x811   :  { %v898_v55 = vmul.f32 %v5186_v10, %v896_v17 }
 0x813   :  { %v5786_v56 = vmul.f32 %v912_v12, %v898_v55 }
 0x814   :  { %v890_v57 = vpop.permute.xlu0 %889 }
 0x815   :  { %v892_v42 = vmul.f32 %v5188_v15, %v890_v57  ;;  %1004 = vrot.lane.b32.xlu0 %v5786_v56, %s5487_s26 }
 0x817   :  { %v905_v59 = vmul.f32 %v903_v58, %v892_v42 }
 0x819   :  { %920 = vrot.lane.b32.xlu1 %v905_v59, %s5487_s26 }
 0x887   :  { %v1005_v60 = vpop.permute.xlu0 %1004 }
 0x888   :  { %4594 = vmatmul.mubr.msk.f32.vlgmr.msra.gmra.mrb[14].mxu0 %vm247_vm2, %v1005_v60 }
 0x889   :  { %4956 = vmatpush3.bf16.msra.mxu0 %v5568_v33  ;;  %4615 = vmatprep.mubr.msk.f32.mxu0 %vm5485_vm1, %v5483_v0 }
 0x88a   :  { %4957 = vmatprep.subr.bf16.mxu0 %v5484_v30 }
 0x88b   :  { %v921_v61 = vpop.permute.xlu1 %920 }
 0x88c   :  { %923 = vst.msk [vmem:[#allocation3 + $0x10] sm:$0xff] %vm247_vm2, %v921_v61  ;;  %4583 = vmatmul.mubr.msk.f32.vlgmr.msra.gmra.mrb[14].mxu1 %vm247_vm2, %v921_v61 }
 0x88d   :  { %4950 = vmatpush3.bf16.msra.mxu1 %v5552_v24  ;;  %4959 = vmatpush3.bf16.msra.mxu0 %v5578_v36 }
 0x88e   :  { %4951 = vmatprep.subr.bf16.mxu1 %v5484_v30  ;;  %4604 = vmatprep.mubr.msk.f32.mxu1 %vm5485_vm1, %v5483_v0 }
 0x88f   :  { %4966 = vmatprep.subr.bf16.mxu0 %v5484_v30 }
 0x891   :  { %4953 = vmatpush3.bf16.msra.mxu1 %v5564_v32 }
 0x892   :  { %4960 = vmatprep.subr.bf16.mxu1 %v5484_v30 }
 0x95b   :  { %v1074_v63 = vpop.f32.mrb[14].mxu0 }
 0x95c   :  { %v1078_v1 = vadd.f32 %v1074_v63, %v210_v62  ;;  %v4595_v2 = vpop.f32.mrb[15].mxu0 }
 0x95e   :  { %5193 = vtanh.f32 %v1078_v1  ;;  %v4267_v49 = vmul.f32 -1.442695, %v1078_v1 }
 0x95f   :  { %v998_v6 = vpop.f32.mrb[14].mxu1 }
 0x960   :  { %v1002_v7 = vadd.f32 %v998_v6, %v202_v3  ;;  %v4584_v8 = vpop.f32.mrb[15].mxu1 }
 0x962   :  { %5195 = vtanh.f32 %v1002_v7  ;;  %v4266_v43 = vmul.f32 -1.442695, %v1002_v7 }
 0x963   :  { %5197 = vpow2.f32 %v4267_v49 }
 0x964   :  { %5199 = vpow2.f32 %v4266_v43 }
 0x968   :  { %v5194_v9 = vpop.eup %5193 }
 0x969   :  { %1106 = vrot.lane.b32.xlu0 %v5194_v9, %s5486_s25  ;;  %v204_v9 = vadd.f32 %v5729_v47, %v5616_v53 }
 0x96c   :  { %v5196_v10 = vpop.eup %5195 }
 0x96d   :  { %915 = vrot.lane.b32.xlu0 %v5765_v16, %s5487_s26  ;;  %1094 = vrot.lane.b32.xlu1 %v5196_v10, %s5486_s25  ;;  %v5198_v11 = vpop.eup %5197 }
 0x96e   :  { %v1088_v14 = vadd.f32 1.0, %v5198_v11  ;;  %v5200_v15 = vpop.eup %5199  ;;  %v208_v11 = vadd.f32 %v5731_v48, %v5606_v44 }
 0x96f   :  { %v1082_v18 = vadd.f32 1.0, %v5200_v15 }
 0x970   :  { %5201 = vrcp.f32 %v1088_v14 }
 0x971   :  { %906 = vrot.lane.b32.xlu0 %v5772_v19, %s5487_s26  ;;  %5203 = vrcp.f32 %v1082_v18 }
 0x97a   :  { %v5202_v13 = vpop.eup %5201 }
 0x97b   :  { %v5204_v22 = vpop.eup %5203 }
 0x9db   :  { %v1107_v20 = vpop.permute.xlu0 %1106 }
 0x9dc   :  { %v1109_v21 = vmul.f32 %v5202_v13, %v1107_v20 }
 0x9de   :  { %1111 = vrot.lane.b32.xlu1 %v1109_v21, %s5487_s26 }
 0x9df   :  { %v1095_v23 = vpop.permute.xlu1 %1094  ;;  %v916_v34 = vpop.permute.xlu0 %915 }
 0x9e0   :  { %v1097_v25 = vmul.f32 %v5204_v22, %v1095_v23  ;;  %v918_v52 = vmul.f32 %v916_v34, %v5778_v29 }
 0x9e2   :  { %1099 = vrot.lane.b32.xlu1 %v1097_v25, %s5487_s26  ;;  %v1103_v17 = vmul.f32 %v5202_v13, %v918_v52 }
 0x9e3   :  { %v907_v54 = vpop.permute.xlu0 %906 }
 0x9e4   :  { %v909_v12 = vmul.f32 %v907_v54, %v5781_v37 }
 0x9e6   :  { %1139 = vrot.lane.b32.xlu1 %v5821_v27, %s5488_s29  ;;  %v1091_v58 = vmul.f32 %v5204_v22, %v909_v12 }
 0x9ea   :  { %1130 = vrot.lane.b32.xlu1 %v5828_v31, %s5488_s29 }
 0xa50   :  { %v1112_v55 = vpop.permute.xlu1 %1111 }
 0xa51   :  { %v5834_v57 = vadd.f32 %v1112_v55, %v1103_v17 }
 0xa53   :  { %5205 = vtanh.f32 %v5834_v57 }
 0xa54   :  { %v1100_v42 = vpop.permute.xlu1 %1099 }
 0xa55   :  { %v5837_v59 = vadd.f32 %v1100_v42, %v1091_v58 }
 0xa57   :  { %5207 = vtanh.f32 %v5837_v59 }
 0xa58   :  { %v1140_v29 = vpop.permute.xlu1 %1139 }
 0xa5c   :  { %v1131_v2 = vpop.permute.xlu1 %1130 }
 0xa5d   :  { %v5206_v60 = vpop.eup %5205 }
 0xa5e   :  { %1123 = vrot.lane.b32.xlu0 %v5206_v60, %s5486_s25 }
 0xa61   :  { %v5208_v61 = vpop.eup %5207 }
 0xa62   :  { %1117 = vrot.lane.b32.xlu0 %v5208_v61, %s5486_s25 }
 0xad0   :  { %v1124_v37 = vpop.permute.xlu0 %1123 }
 0xad1   :  { %v1126_v62 = vmul.f32 %v5202_v13, %v1124_v37 }
 0xad3   :  { %v5842_v63 = vmul.f32 %v1140_v29, %v1126_v62 }
 0xad4   :  { %v1118_v1 = vpop.permute.xlu0 %1117 }
 0xad5   :  { %v1120_v3 = vmul.f32 %v5204_v22, %v1118_v1  ;;  %1232 = vrot.lane.b32.xlu0 %v5842_v63, %s5487_s26 }
 0xad7   :  { %v1133_v6 = vmul.f32 %v1131_v2, %v1120_v3 }
 0xad9   :  { %1148 = vrot.lane.b32.xlu1 %v1133_v6, %s5487_s26 }
 0xb47   :  { %v1233_v7 = vpop.permute.xlu0 %1232 }
 0xb48   :  { %4616 = vmatmul.mubr.msk.f32.vlgmr.msra.gmra.mrb[16].mxu0 %vm247_vm2, %v1233_v7 }
 0xb49   :  { %4968 = vmatpush3.bf16.msra.mxu0 %v5568_v33  ;;  %4637 = vmatprep.mubr.msk.f32.mxu0 %vm5485_vm1, %v5483_v0 }
 0xb4a   :  { %4969 = vmatprep.subr.bf16.mxu0 %v5484_v30 }
 0xb4b   :  { %v1149_v8 = vpop.permute.xlu1 %1148 }
 0xb4c   :  { %1151 = vst.msk [vmem:[#allocation3 + $0x18] sm:$0xff] %vm247_vm2, %v1149_v8  ;;  %4605 = vmatmul.mubr.msk.f32.vlgmr.msra.gmra.mrb[16].mxu1 %vm247_vm2, %v1149_v8 }
 0xb4d   :  { %4962 = vmatpush3.bf16.msra.mxu1 %v5552_v24  ;;  %4971 = vmatpush3.bf16.msra.mxu0 %v5578_v36 }
 0xb4e   :  { %4963 = vmatprep.subr.bf16.mxu1 %v5484_v30  ;;  %4626 = vmatprep.mubr.msk.f32.mxu1 %vm5485_vm1, %v5483_v0 }
 0xb4f   :  { %4978 = vmatprep.subr.bf16.mxu0 %v5484_v30 }
 0xb51   :  { %4965 = vmatpush3.bf16.msra.mxu1 %v5564_v32 }
 0xb52   :  { %4972 = vmatprep.subr.bf16.mxu1 %v5484_v30 }
 0xc1b   :  { %v1302_v10 = vpop.f32.mrb[16].mxu0 }
 0xc1c   :  { %v1306_v49 = vadd.f32 %v1302_v10, %v204_v9  ;;  %v4617_v43 = vpop.f32.mrb[17].mxu0 }
 0xc1e   :  { %5209 = vtanh.f32 %v1306_v49  ;;  %v4271_v47 = vmul.f32 -1.442695, %v1306_v49 }
 0xc1f   :  { %v1226_v14 = vpop.f32.mrb[16].mxu1 }
 0xc20   :  { %v1230_v15 = vadd.f32 %v1226_v14, %v208_v11  ;;  %v4606_v18 = vpop.f32.mrb[17].mxu1 }
 0xc21   :  { %v198_v18 = vadd.f32 %v5725_v40, %v5616_v53 }
 0xc22   :  { %5211 = vtanh.f32 %v1230_v15  ;;  %v4270_v48 = vmul.f32 -1.442695, %v1230_v15 }
 0xc23   :  { %5213 = vpow2.f32 %v4271_v47 }
 0xc24   :  { %5215 = vpow2.f32 %v4270_v48  ;;  %v214_v48 = vadd.f32 %v5735_v51, %v5606_v44 }
 0xc28   :  { %v5210_v13 = vpop.eup %5209 }
 0xc29   :  { %1334 = vrot.lane.b32.xlu0 %v5210_v13, %s5486_s25 }
 0xc2c   :  { %v5212_v20 = vpop.eup %5211 }
 0xc2d   :  { %1143 = vrot.lane.b32.xlu0 %v5821_v27, %s5487_s26  ;;  %1322 = vrot.lane.b32.xlu1 %v5212_v20, %s5486_s25  ;;  %v5214_v21 = vpop.eup %5213 }
 0xc2e   :  { %v1316_v22 = vadd.f32 1.0, %v5214_v21  ;;  %v5216_v23 = vpop.eup %5215 }
 0xc2f   :  { %v1310_v25 = vadd.f32 1.0, %v5216_v23 }
 0xc30   :  { %5217 = vrcp.f32 %v1316_v22 }
 0xc31   :  { %1134 = vrot.lane.b32.xlu0 %v5828_v31, %s5487_s26  ;;  %5219 = vrcp.f32 %v1310_v25 }
 0xc3a   :  { %v5218_v34 = vpop.eup %5217 }
 0xc3b   :  { %v5220_v12 = vpop.eup %5219 }
 0xc9b   :  { %v1335_v52 = vpop.permute.xlu0 %1334 }
 0xc9c   :  { %v1337_v54 = vmul.f32 %v5218_v34, %v1335_v52 }
 0xc9e   :  { %1339 = vrot.lane.b32.xlu1 %v1337_v54, %s5487_s26 }
 0xc9f   :  { %v1323_v17 = vpop.permute.xlu1 %1322  ;;  %v1144_v58 = vpop.permute.xlu0 %1143 }
 0xca0   :  { %v1325_v55 = vmul.f32 %v5220_v12, %v1323_v17  ;;  %v1146_v42 = vmul.f32 %v1144_v58, %v5834_v57 }
 0xca2   :  { %1327 = vrot.lane.b32.xlu1 %v1325_v55, %s5487_s26  ;;  %v1331_v29 = vmul.f32 %v5218_v34, %v1146_v42 }
 0xca3   :  { %v1135_v60 = vpop.permute.xlu0 %1134 }
 0xca4   :  { %v1137_v61 = vmul.f32 %v1135_v60, %v5837_v59 }
 0xca6   :  { %1367 = vrot.lane.b32.xlu1 %v5828_v31, %s5488_s29  ;;  %v1319_v1 = vmul.f32 %v5220_v12, %v1137_v61 }
 0xcaa   :  { %1358 = vrot.lane.b32.xlu1 %v5821_v27, %s5488_s29 }
 0xd10   :  { %v1340_v37 = vpop.permute.xlu1 %1339 }
 0xd11   :  { %v5880_v62 = vadd.f32 %v1340_v37, %v1331_v29 }
 0xd13   :  { %5221 = vtanh.f32 %v5880_v62 }
 0xd14   :  { %v1328_v2 = vpop.permute.xlu1 %1327 }
 0xd15   :  { %v5883_v3 = vadd.f32 %v1328_v2, %v1319_v1 }
 0xd17   :  { %5223 = vtanh.f32 %v5883_v3 }
 0xd18   :  { %v1368_v57 = vpop.permute.xlu1 %1367 }
 0xd1c   :  { %v1359_v49 = vpop.permute.xlu1 %1358 }
 0xd1d   :  { %v5222_v6 = vpop.eup %5221 }
 0xd1e   :  { %1351 = vrot.lane.b32.xlu0 %v5222_v6, %s5486_s25 }
 0xd21   :  { %v5224_v7 = vpop.eup %5223 }
 0xd22   :  { %1345 = vrot.lane.b32.xlu0 %v5224_v7, %s5486_s25 }
 0xd90   :  { %v1352_v59 = vpop.permute.xlu0 %1351 }
 0xd91   :  { %v1354_v8 = vmul.f32 %v5218_v34, %v1352_v59 }
 0xd93   :  { %v5888_v9 = vmul.f32 %v1368_v57, %v1354_v8 }
 0xd94   :  { %v1346_v10 = vpop.permute.xlu0 %1345 }
 0xd95   :  { %v1348_v43 = vmul.f32 %v5220_v12, %v1346_v10  ;;  %1460 = vrot.lane.b32.xlu0 %v5888_v9, %s5487_s26 }
 0xd97   :  { %v1361_v11 = vmul.f32 %v1359_v49, %v1348_v43 }
 0xd99   :  { %1376 = vrot.lane.b32.xlu1 %v1361_v11, %s5487_s26 }
 0xe07   :  { %v1461_v14 = vpop.permute.xlu0 %1460 }
 0xe08   :  { %4638 = vmatmul.mubr.msk.f32.vlgmr.msra.gmra.mrb[18].mxu0 %vm247_vm2, %v1461_v14 }
 0xe09   :  { %4980 = vmatpush3.bf16.msra.mxu0 %v5568_v33  ;;  %4659 = vmatprep.mubr.msk.f32.mxu0 %vm5485_vm1, %v5483_v0 }
 0xe0a   :  { %4981 = vmatprep.subr.bf16.mxu0 %v5484_v30 }
 0xe0b   :  { %v5898_v15 = vpop.permute.xlu1 %1376 }
 0xe0c   :  { %4627 = vmatmul.mubr.msk.f32.vlgmr.msra.gmra.mrb[18].mxu1 %vm247_vm2, %v5898_v15 }
 0xe0d   :  { %4974 = vmatpush3.bf16.msra.mxu1 %v5552_v24  ;;  %4983 = vmatpush3.bf16.msra.mxu0 %v5578_v36 }
 0xe0e   :  { %4975 = vmatprep.subr.bf16.mxu1 %v5484_v30  ;;  %4648 = vmatprep.mubr.msk.f32.mxu1 %vm5485_vm1, %v5483_v0 }
 0xe0f   :  { %4990 = vmatprep.subr.bf16.mxu0 %v5484_v30 }
 0xe11   :  { %4977 = vmatpush3.bf16.msra.mxu1 %v5564_v32 }
 0xe12   :  { %4984 = vmatprep.subr.bf16.mxu1 %v5484_v30 }
 0xedb   :  { %v1530_v13 = vpop.f32.mrb[18].mxu0 }
 0xedc   :  { %v1534_v20 = vadd.f32 %v1530_v13, %v198_v18  ;;  %v4639_v47 = vpop.f32.mrb[19].mxu0 }
 0xede   :  { %5225 = vtanh.f32 %v1534_v20  ;;  %v4275_v40 = vmul.f32 -1.442695, %v1534_v20 }
 0xedf   :  { %v1454_v21 = vpop.f32.mrb[18].mxu1 }
 0xee0   :  { %v1458_v22 = vadd.f32 %v1454_v21, %v214_v48  ;;  %v4628_v23 = vpop.f32.mrb[19].mxu1 }
 0xee2   :  { %5227 = vtanh.f32 %v1458_v22  ;;  %v4274_v51 = vmul.f32 -1.442695, %v1458_v22 }
 0xee3   :  { %5229 = vpow2.f32 %v4275_v40 }
 0xee4   :  { %5231 = vpow2.f32 %v4274_v51 }
 0xee8   :  { %v5226_v25 = vpop.eup %5225 }
 0xee9   :  { %1562 = vrot.lane.b32.xlu0 %v5226_v25, %s5486_s25 }
 0xeec   :  { %v5228_v34 = vpop.eup %5227 }
 0xeed   :  { %1371 = vrot.lane.b32.xlu0 %v5828_v31, %s5487_s26  ;;  %1550 = vrot.lane.b32.xlu1 %v5228_v34, %s5486_s25  ;;  %v5230_v52 = vpop.eup %5229 }
 0xeee   :  { %v1544_v54 = vadd.f32 1.0, %v5230_v52  ;;  %v5232_v12 = vpop.eup %5231 }
 0xeef   :  { %v1538_v17 = vadd.f32 1.0, %v5232_v12 }
 0xef0   :  { %5233 = vrcp.f32 %v1544_v54 }
 0xef1   :  { %1362 = vrot.lane.b32.xlu0 %v5821_v27, %s5487_s26  ;;  %5235 = vrcp.f32 %v1538_v17 }
 0xefa   :  { %v5234_v55 = vpop.eup %5233 }
 0xefb   :  { %v5236_v31 = vpop.eup %5235 }
 0xf5b   :  { %v1563_v58 = vpop.permute.xlu0 %1562 }
 0xf5c   :  { %v1565_v42 = vmul.f32 %v5234_v55, %v1563_v58 }
 0xf5e   :  { %1567 = vrot.lane.b32.xlu1 %v1565_v42, %s5487_s26 }
 0xf5f   :  { %v1551_v60 = vpop.permute.xlu1 %1550  ;;  %v1372_v27 = vpop.permute.xlu0 %1371 }
 0xf60   :  { %v1553_v61 = vmul.f32 %v5236_v31, %v1551_v60  ;;  %v1374_v29 = vmul.f32 %v1372_v27, %v5880_v62 }
 0xf62   :  { %1555 = vrot.lane.b32.xlu1 %v1553_v61, %s5487_s26  ;;  %v1559_v2 = vmul.f32 %v5234_v55, %v1374_v29 }
 0xf63   :  { %v1363_v37 = vpop.permute.xlu0 %1362 }
 0xf64   :  { %v1365_v1 = vmul.f32 %v1363_v37, %v5883_v3 }
 0xf66   :  { %1595 = vrot.lane.b32.xlu1 %v5772_v19, %s5488_s29  ;;  %v1547_v57 = vmul.f32 %v5236_v31, %v1365_v1 }
 0xf6a   :  { %1586 = vrot.lane.b32.xlu1 %v5765_v16, %s5488_s29 }
 0xfd0   :  { %v1568_v6 = vpop.permute.xlu1 %1567 }
 0xfd1   :  { %v5928_v7 = vadd.f32 %v1568_v6, %v1559_v2 }
 0xfd3   :  { %5237 = vtanh.f32 %v5928_v7 }
 0xfd4   :  { %v1556_v59 = vpop.permute.xlu1 %1555 }
 0xfd5   :  { %v5931_v8 = vadd.f32 %v1556_v59, %v1547_v57 }
 0xfd7   :  { %5239 = vtanh.f32 %v5931_v8 }
 0xfd8   :  { %v1596_v62 = vpop.permute.xlu1 %1595 }
 0xfdc   :  { %v1587_v18 = vpop.permute.xlu1 %1586 }
 0xfdd   :  { %v5238_v10 = vpop.eup %5237 }
 0xfde   :  { %1579 = vrot.lane.b32.xlu0 %v5238_v10, %s5486_s25 }
 0xfe1   :  { %v5240_v49 = vpop.eup %5239 }
 0xfe2   :  { %1573 = vrot.lane.b32.xlu0 %v5240_v49, %s5486_s25 }
0x1050   :  { %v1580_v3 = vpop.permute.xlu0 %1579 }
0x1051   :  { %v1582_v43 = vmul.f32 %v5234_v55, %v1580_v3 }
0x1053   :  { %v5936_v11 = vmul.f32 %v1596_v62, %v1582_v43 }
0x1054   :  { %v1574_v14 = vpop.permute.xlu0 %1573 }
0x1055   :  { %v1576_v13 = vmul.f32 %v5236_v31, %v1574_v14  ;;  %1688 = vrot.lane.b32.xlu0 %v5936_v11, %s5487_s26 }
0x1057   :  { %v1589_v20 = vmul.f32 %v1587_v18, %v1576_v13 }
0x1059   :  { %1604 = vrot.lane.b32.xlu1 %v1589_v20, %s5487_s26 }
0x10c7   :  { %v1689_v47 = vpop.permute.xlu0 %1688 }
0x10c8   :  { %4660 = vmatmul.mubr.msk.f32.vlgmr.msra.gmra.mrb[20].mxu0 %vm247_vm2, %v1689_v47  ;;  %v186_v47 = vadd.f32 %v5608_v45, %v5616_v53 }
0x10c9   :  { %4992 = vmatpush3.bf16.msra.mxu0 %v5568_v33  ;;  %4681 = vmatprep.mubr.msk.f32.mxu0 %vm5485_vm1, %v5483_v0  ;;  %v192_v33 = vadd.f32 %v5664_v35, %v5616_v53 }
0x10ca   :  { %4993 = vmatprep.subr.bf16.mxu0 %v5484_v30 }
0x10cb   :  { %v5946_v48 = vpop.permute.xlu1 %1604 }
0x10cc   :  { %4649 = vmatmul.mubr.msk.f32.vlgmr.msra.gmra.mrb[20].mxu1 %vm247_vm2, %v5946_v48 }
0x10cd   :  { %4986 = vmatpush3.bf16.msra.mxu1 %v5552_v24  ;;  %4995 = vmatpush3.bf16.msra.mxu0 %v5578_v36  ;;  %v220_v24 = vadd.f32 %v5600_v41, %v5606_v44 }
0x10ce   :  { %4987 = vmatprep.subr.bf16.mxu1 %v5484_v30  ;;  %4670 = vmatprep.mubr.msk.f32.mxu1 %vm5485_vm1, %v5483_v0 }
0x10cf   :  { %5012 = vmatprep.subr.bf16.mxu0 %v5484_v30 }
0x10d1   :  { %4989 = vmatpush3.bf16.msra.mxu1 %v5564_v32 }
0x119b   :  { %v1758_v21 = vpop.f32.mrb[20].mxu0 }
0x119c   :  { %v1762_v22 = vadd.f32 %v1758_v21, %v192_v33  ;;  %v4661_v23 = vpop.f32.mrb[21].mxu0 }
0x119d   :  { %v226_v23 = vadd.f32 %v5610_v46, %v5606_v44 }
0x119e   :  { %5241 = vtanh.f32 %v1762_v22  ;;  %v4279_v32 = vmul.f32 -1.442695, %v1762_v22 }
0x119f   :  { %v1682_v36 = vpop.f32.mrb[20].mxu1 }
0x11a0   :  { %v1686_v25 = vadd.f32 %v1682_v36, %v220_v24  ;;  %v4650_v34 = vpop.f32.mrb[21].mxu1 }
0x11a2   :  { %5243 = vtanh.f32 %v1686_v25  ;;  %v4278_v41 = vmul.f32 -1.442695, %v1686_v25 }
0x11a3   :  { %5245 = vpow2.f32 %v4279_v32 }
0x11a4   :  { %5247 = vpow2.f32 %v4278_v41 }
0x11a8   :  { %v5242_v40 = vpop.eup %5241 }
0x11a9   :  { %1790 = vrot.lane.b32.xlu0 %v5242_v40, %s5486_s25 }
0x11ac   :  { %v5244_v51 = vpop.eup %5243 }
0x11ad   :  { %1599 = vrot.lane.b32.xlu0 %v5772_v19, %s5487_s26  ;;  %1778 = vrot.lane.b32.xlu1 %v5244_v51, %s5486_s25  ;;  %v5246_v35 = vpop.eup %5245 }
0x11ae   :  { %v1772_v52 = vadd.f32 1.0, %v5246_v35  ;;  %v5248_v54 = vpop.eup %5247 }
0x11af   :  { %v1766_v12 = vadd.f32 1.0, %v5248_v54 }
0x11b0   :  { %5249 = vrcp.f32 %v1772_v52 }
0x11b1   :  { %1590 = vrot.lane.b32.xlu0 %v5765_v16, %s5487_s26  ;;  %5251 = vrcp.f32 %v1766_v12  ;;  %v5401_v12 = vld [vmem:[%s6622_s1] sm:$0xff] }
0x11ba   :  { %v5250_v17 = vpop.eup %5249 }
0x11bb   :  { %v5252_v19 = vpop.eup %5251 }
0x121b   :  { %v1791_v55 = vpop.permute.xlu0 %1790 }
0x121c   :  { %v1793_v58 = vmul.f32 %v5250_v17, %v1791_v55 }
0x121e   :  { %1795 = vrot.lane.b32.xlu1 %v1793_v58, %s5487_s26 }
0x121f   :  { %v1779_v42 = vpop.permute.xlu1 %1778  ;;  %v1600_v16 = vpop.permute.xlu0 %1599 }
0x1220   :  { %v1781_v31 = vmul.f32 %v5252_v19, %v1779_v42  ;;  %v1602_v60 = vmul.f32 %v1600_v16, %v5928_v7 }
0x1222   :  { %1783 = vrot.lane.b32.xlu1 %v1781_v31, %s5487_s26  ;;  %v1787_v29 = vmul.f32 %v5250_v17, %v1602_v60 }
0x1223   :  { %v1591_v61 = vpop.permute.xlu0 %1590 }
0x1224   :  { %v1593_v27 = vmul.f32 %v1591_v61, %v5931_v8 }
0x1226   :  { %1823 = vrot.lane.b32.xlu1 %v5685_v5, %s5488_s29  ;;  %v1775_v2 = vmul.f32 %v5252_v19, %v1593_v27 }
0x122a   :  { %1814 = vrot.lane.b32.xlu1 %v5678_v4, %s5488_s29 }
0x1290   :  { %v1796_v37 = vpop.permute.xlu1 %1795 }
0x1291   :  { %v5975_v1 = vadd.f32 %v1796_v37, %v1787_v29 }
0x1293   :  { %5253 = vtanh.f32 %v5975_v1 }
0x1294   :  { %v1784_v6 = vpop.permute.xlu1 %1783 }
0x1295   :  { %v5978_v57 = vadd.f32 %v1784_v6, %v1775_v2  ;;  %v2070_v6 = vld [vmem:[%s6624_s3 + $0x8] sm:$0xff] }
0x1297   :  { %5255 = vtanh.f32 %v5978_v57 }
0x1298   :  { %v1824_v7 = vpop.permute.xlu1 %1823 }
0x129c   :  { %v1815_v43 = vpop.permute.xlu1 %1814 }
0x129d   :  { %v5254_v59 = vpop.eup %5253 }
0x129e   :  { %1807 = vrot.lane.b32.xlu0 %v5254_v59, %s5486_s25  ;;  %v2069_v59 = vld [vmem:[%s6624_s3] sm:$0xff] }
0x12a1   :  { %v5256_v10 = vpop.eup %5255 }
0x12a2   :  { %1801 = vrot.lane.b32.xlu0 %v5256_v10, %s5486_s25 }
0x1310   :  { %v1808_v8 = vpop.permute.xlu0 %1807 }
0x1311   :  { %v1810_v49 = vmul.f32 %v5250_v17, %v1808_v8  ;;  %v5402_v17 = vld [vmem:[%s6622_s1 + $0x38] sm:$0xff]  ;;  %v2074_v8 = vld [vmem:[%s6624_s3 + $0x28] sm:$0xff] }
0x1313   :  { %v1826_v62 = vmul.f32 %v1824_v7, %v1810_v49  ;;  %v2071_v7 = vld [vmem:[%s6624_s3 + $0x10] sm:$0xff]  ;;  %v2076_v49 = vld [vmem:[%s6624_s3 + $0x38] sm:$0xff] }
0x1314   :  { %v1802_v3 = vpop.permute.xlu0 %1801 }
0x1315   :  { %v1804_v14 = vmul.f32 %v5252_v19, %v1802_v3  ;;  %1916 = vrot.lane.b32.xlu0 %v1826_v62, %s5487_s26  ;;  %v5000_v3 = vpack.c.bf16 %v2076_v49, %v2074_v8 }
0x1317   :  { %v1817_v18 = vmul.f32 %v1815_v43, %v1804_v14  ;;  %v2073_v43 = vld [vmem:[%s6624_s3 + $0x20] sm:$0xff]  ;;  %v2075_v14 = vld [vmem:[%s6624_s3 + $0x30] sm:$0xff] }
0x1319   :  { %1832 = vrot.lane.b32.xlu1 %v1817_v18, %s5487_s26 }
0x1387   :  { %v1917_v13 = vpop.permute.xlu0 %1916 }
0x1388   :  { %4682 = vmatmul.mubr.msk.f32.vlgmr.msra.gmra.mrb[22].mxu0 %vm247_vm2, %v1917_v13  ;;  %v5002_v13 = vpack.c.bf16 %v2075_v14, %v2073_v43 }
0x1389   :  { %4692 = vmatprep.mubr.msk.f32.mxu0 %vm5485_vm1, %v5483_v0 }
0x138b   :  { %v5988_v20 = vpop.permute.xlu1 %1832 }
0x138c   :  { %4671 = vmatmul.mubr.msk.f32.vlgmr.msra.gmra.mrb[22].mxu1 %vm247_vm2, %v5988_v20 }
0x138d   :  { %2195 = vmatprep.mubr.f32.mxu1 %v5483_v0 }
0x145b   :  { %v1986_v33 = vpop.f32.mrb[22].mxu0 }
0x145c   :  { %v1990_v21 = vadd.f32 %v1986_v33, %v186_v47  ;;  %v4683_v22 = vpop.f32.mrb[23].mxu0  ;;  %v2078_v33 = vld [vmem:[%s6624_s3 + $0x48] sm:$0xff] }
0x145e   :  { %5257 = vtanh.f32 %v1990_v21  ;;  %v4283_v45 = vmul.f32 -1.442695, %v1990_v21  ;;  %v2080_v21 = vld [vmem:[%s6624_s3 + $0x58] sm:$0xff] }
0x145f   :  { %v1910_v24 = vpop.f32.mrb[22].mxu1  ;;  %v5004_v22 = vpack.c.bf16 %v2080_v21, %v2078_v33 }
0x1460   :  { %v1914_v36 = vadd.f32 %v1910_v24, %v226_v23  ;;  %v4672_v25 = vpop.f32.mrb[23].mxu1  ;;  %v2077_v23 = vld [vmem:[%s6624_s3 + $0x40] sm:$0xff] }
0x1461   :  { %v2087_v25 = vld [vmem:[%s6624_s3 + $0x90] sm:$0xff] }
0x1462   :  { %5259 = vtanh.f32 %v1914_v36  ;;  %v4282_v44 = vmul.f32 -1.442695, %v1914_v36  ;;  %v2085_v36 = vld [vmem:[%s6624_s3 + $0x80] sm:$0xff] }
0x1463   :  { %5261 = vpow2.f32 %v4283_v45  ;;  %v2084_v45 = vld [vmem:[%s6624_s3 + $0x78] sm:$0xff] }
0x1464   :  { %5263 = vpow2.f32 %v4282_v44 }
0x1468   :  { %v5258_v34 = vpop.eup %5257 }
0x1469   :  { %2018 = vrot.lane.b32.xlu0 %v5258_v34, %s5486_s25  ;;  %v6082_v34 = vpack.c.bf16 %v2087_v25, %v2085_v36 }
0x146b   :  { %5014 = vmatpush3.bf16.msra.mxu0 %v6082_v34 }
0x146c   :  { %v5260_v40 = vpop.eup %5259  ;;  %5015 = vmatprep.subr.bf16.mxu0 %v5484_v30 }
0x146d   :  { %1827 = vrot.lane.b32.xlu0 %v5685_v5, %s5487_s26  ;;  %2006 = vrot.lane.b32.xlu1 %v5260_v40, %s5486_s25  ;;  %v5262_v46 = vpop.eup %5261  ;;  %v2082_v40 = vld [vmem:[%s6624_s3 + $0x68] sm:$0xff] }
0x146e   :  { %v2000_v53 = vadd.f32 1.0, %v5262_v46  ;;  %v5264_v51 = vpop.eup %5263  ;;  %v5008_v44 = vpack.c.bf16 %v2084_v45, %v2082_v40  ;;  %v2081_v46 = vld [vmem:[%s6624_s3 + $0x60] sm:$0xff] }
0x146f   :  { %v1994_v32 = vadd.f32 1.0, %v5264_v51 }
0x1470   :  { %5265 = vrcp.f32 %v2000_v53  ;;  %v2083_v53 = vld [vmem:[%s6624_s3 + $0x70] sm:$0xff] }
0x1471   :  { %1818 = vrot.lane.b32.xlu0 %v5678_v4, %s5487_s26  ;;  %5267 = vrcp.f32 %v1994_v32  ;;  %v5010_v51 = vpack.c.bf16 %v2083_v53, %v2081_v46  ;;  %v2089_v32 = vld [vmem:[%s6624_s3 + $0xa0] sm:$0xff] }
0x147a   :  { %v6003_v41 = vpop.eup %5265 }
0x147b   :  { %v6007_v52 = vpop.eup %5267 }
0x14db   :  { %v2019_v35 = vpop.permute.xlu0 %2018 }
0x14dc   :  { %v2021_v5 = vmul.f32 %v6003_v41, %v2019_v35  ;;  %v2091_v35 = vld [vmem:[%s6624_s3 + $0xb0] sm:$0xff] }
0x14de   :  { %2023 = vrot.lane.b32.xlu1 %v2021_v5, %s5487_s26  ;;  %v6104_v5 = vpack.c.bf16 %v2091_v35, %v2089_v32 }
0x14df   :  { %v2007_v4 = vpop.permute.xlu1 %2006  ;;  %v1828_v55 = vpop.permute.xlu0 %1827 }
0x14e0   :  { %v2009_v54 = vmul.f32 %v6007_v52, %v2007_v4  ;;  %v1830_v58 = vmul.f32 %v1828_v55, %v5975_v1  ;;  %5017 = vmatpush3.bf16.msra.mxu0 %v6104_v5 }
0x14e1   :  { %5018 = vmatprep.subr.bf16.mxu0 %v5484_v30 }
0x14e2   :  { %2011 = vrot.lane.b32.xlu1 %v2009_v54, %s5487_s26  ;;  %v2015_v31 = vmul.f32 %v6003_v41, %v1830_v58  ;;  %v2086_v58 = vld [vmem:[%s6624_s3 + $0x88] sm:$0xff] }
0x14e3   :  { %v1819_v19 = vpop.permute.xlu0 %1818  ;;  %4693 = vmatmul.mubr.f32.vlgmr.msra.gmra.mrb[24].mxu0 %v5483_v0 }
0x14e4   :  { %v1821_v42 = vmul.f32 %v1819_v19, %v5978_v57  ;;  %v2072_v57 = vld [vmem:[%s6624_s3 + $0x18] sm:$0xff]  ;;  %4703 = vmatprep.mubr.msk.f32.mxu0 %vm5485_vm1, %v5483_v0 }
0x14e5   :  { %v4996_v10 = vpack.c.bf16 %v2072_v57, %v2070_v6  ;;  %v2088_v19 = vld [vmem:[%s6624_s3 + $0x98] sm:$0xff] }
0x14e6   :  { %2047 = vrot.lane.b32.xlu1 %v5401_v12, %s5488_s29  ;;  %v2003_v61 = vmul.f32 %v6007_v52, %v1821_v42 }
0x14e7   :  { %4997 = vmatprep.subr.bf16.mxu1 %v4996_v10 }
0x14ea   :  { %2042 = vrot.lane.b32.xlu1 %v5402_v17, %s5488_s29 }
0x14ee   :  { %1837 = vrot.lane.b32.xlu1 %v1826_v62, %s5486_s25  ;;  %v4998_v62 = vpack.c.bf16 %v2071_v7, %v2069_v59  ;;  %v4284_v59 = vld [vmem:[%s6624_s3 + $0xc0] ss:$8 sm:$0x3] }
0x14ef   :  { %v2099_v10 = vrot.slane %v4284_v59, %v84_v39  ;;  %v2103_v7 = vrot.slane %v4284_v59, %v88_v50 }
0x14f0   :  { %4999 = vmatpush1.bf16.msra.mxu1 %v4998_v62 }
0x14f1   :  { %5001 = vmatprep.subr.bf16.mxu1 %v5000_v3 }
0x14f2   :  { %1381 = vrot.lane.b32.xlu1 %v5888_v9, %s5486_s25 }
0x14f4   :  { %5003 = vmatpush1.bf16.msra.mxu1 %v5002_v13 }
0x14f5   :  { %5005 = vmatprep.subr.bf16.mxu1 %v5004_v22 }
0x14f6   :  { %925 = vrot.lane.b32.xlu1 %v5786_v56, %s5486_s25 }
0x14fa   :  { %468 = vrot.lane.b32.xlu1 %v5645_v28, %s5486_s25 }
0x1550   :  { %v2024_v16 = vpop.permute.xlu1 %2023 }
0x1551   :  { %v2026_v60 = vadd.f32 %v2024_v16, %v2015_v31 }
0x1553   :  { %5269 = vtanh.f32 %v2026_v60 }
0x1554   :  { %v2012_v9 = vpop.permute.xlu1 %2011 }
0x1555   :  { %v2014_v27 = vadd.f32 %v2012_v9, %v2003_v61 }
0x1557   :  { %5271 = vtanh.f32 %v2014_v27 }
0x1558   :  { %v2048_v56 = vpop.permute.xlu1 %2047 }
0x155c   :  { %v6030_v29 = vpop.permute.xlu1 %2042 }
0x155d   :  { %v5270_v28 = vpop.eup %5269 }
0x155e   :  { %2035 = vrot.lane.b32.xlu0 %v5270_v28, %s5486_s25 }
0x1560   :  { %v1838_v37 = vpop.permute.xlu1 %1837 }
0x1561   :  { %v5272_v1 = vpop.eup %5271  ;;  %1840 = vst.msk [vmem:[#allocation3 + $0x8] sm:$0xff] %vm471_vm3, %v1838_v37 }
0x1562   :  { %2029 = vrot.lane.b32.xlu0 %v5272_v1, %s5486_s25 }
0x1564   :  { %v1382_v2 = vpop.permute.xlu1 %1381 }
0x1565   :  { %1384 = vst.msk [vmem:[#allocation3 + $0x18] sm:$0xff] %vm471_vm3, %v1382_v2 }
0x1568   :  { %v926_v18 = vpop.permute.xlu1 %925  ;;  %v2062_v9 = vld [vmem:[#allocation3 + $0x8] sm:$0xff] }
0x1569   :  { %928 = vst.msk [vmem:[#allocation3 + $0x28] sm:$0xff] %vm471_vm3, %v926_v18 }
0x156a   :  { %1607 = vst.msk [vmem:[#allocation3 + $0x28] sm:$0xff] %vm247_vm2, %v5946_v48  ;;  %v2079_v48 = vld [vmem:[%s6624_s3 + $0x50] sm:$0xff] }
0x156b   :  { %v5006_v24 = vpack.c.bf16 %v2079_v48, %v2077_v23 }
0x156c   :  { %v469_v47 = vpop.permute.xlu1 %468 }
0x156d   :  { %472 = vst.msk [vmem:[#allocation3 + $0x38] sm:$0xff] %vm471_vm3, %v469_v47  ;;  %5007 = vmatpush1.bf16.msra.mxu1 %v5006_v24 }
0x156e   :  { %5009 = vmatprep.subr.bf16.mxu1 %v5008_v44 }
0x1571   :  { %5011 = vmatpush1.bf16.msra.mxu1 %v5010_v51 }
0x1572   :  { %5042 = vmatprep.subr.bf16.mxu1 %v5484_v30 }
0x15b6   :  { %v2327_v1 = vpop.f32.mrb[24].mxu0 }
0x15b7   :  { %v4694_v2 = vpop.f32.mrb[25].mxu0 }
0x15d0   :  { %v2036_v4 = vpop.permute.xlu0 %2035 }
0x15d1   :  { %v2038_v54 = vmul.f32 %v6003_v41, %v2036_v4 }
0x15d3   :  { %v2050_v12 = vmul.f32 %v2048_v56, %v2038_v54  ;;  %v2064_v56 = vld [vmem:[#allocation3 + $0x18] sm:$0xff] }
0x15d4   :  { %v2030_v17 = vpop.permute.xlu0 %2029 }
0x15d5   :  { %2057 = vrot.lane.b32.xlu0 %v2050_v12, %s5486_s25  ;;  %v2032_v55 = vmul.f32 %v6007_v52, %v2030_v17 }
0x15d7   :  { %v2045_v41 = vmul.f32 %v6030_v29, %v2032_v55  ;;  %v2066_v29 = vld [vmem:[#allocation3 + $0x28] sm:$0xff] }
0x15d9   :  { %1609 = vrot.lane.b32.xlu0 %v5936_v11, %s5486_s25  ;;  %v6129_v11 = vpack.c.bf16 %v2088_v19, %v2086_v58 }
0x15db   :  { %5020 = vmatpush3.bf16.msra.mxu0 %v6129_v11 }
0x15dc   :  { %5021 = vmatprep.subr.bf16.mxu0 %v5484_v30 }
0x15dd   :  { %1153 = vrot.lane.b32.xlu0 %v5842_v63, %s5486_s25  ;;  %v2092_v63 = vld [vmem:[%s6624_s3 + $0xb8] sm:$0xff] }
0x15e1   :  { %697 = vrot.lane.b32.xlu0 %v5720_v26, %s5486_s25  ;;  %v2090_v26 = vld [vmem:[%s6624_s3 + $0xa8] sm:$0xff] }
0x15e2   :  { %v6139_v52 = vpack.c.bf16 %v2092_v63, %v2090_v26 }
0x15e4   :  { %5023 = vmatpush3.bf16.msra.mxu0 %v6139_v52 }
0x15e5   :  { %2052 = vrot.lane.b32.xlu0 %v2045_v41, %s5487_s26  ;;  %5024 = vmatprep.subr.bf16.mxu0 %v5484_v30 }
0x15e7   :  { %4704 = vmatmul.mubr.f32.vlgmr.msra.gmra.mrb[26].mxu0 %v5483_v0 }
0x15e8   :  { %5026 = vmatpush3.bf16.msra.mxu0 %v6082_v34  ;;  %4714 = vmatprep.mubr.msk.f32.mxu0 %vm5485_vm1, %v5483_v0 }
0x15e9   :  { %5027 = vmatprep.subr.bf16.mxu0 %v5484_v30 }
0x15ec   :  { %5029 = vmatpush3.bf16.msra.mxu0 %v6104_v5 }
0x15ed   :  { %5030 = vmatprep.subr.bf16.mxu0 %v5484_v30 }
0x1647   :  { %v2058_v42 = vpop.permute.xlu0 %2057 }
0x1648   :  { %2060 = vst.msk [vmem:[#allocation3] sm:$0xff] %vm471_vm3, %v2058_v42 }
0x164b   :  { %v1610_v31 = vpop.permute.xlu0 %1609 }
0x164c   :  { %1612 = vst.msk [vmem:[#allocation3 + $0x10] sm:$0xff] %vm471_vm3, %v1610_v31 }
0x164f   :  { %v1154_v16 = vpop.permute.xlu0 %1153  ;;  %v2061_v60 = vld [vmem:[#allocation3] sm:$0xff] }
0x1650   :  { %1156 = vst.msk [vmem:[#allocation3 + $0x20] sm:$0xff] %vm471_vm3, %v1154_v16  ;;  %4285 = vmatmul.mubr.msk.f32.vlgmr.msra.gmra.mrb[24].mxu1 %vm2106_vm4, %v2061_v60 }
0x1651   :  { %1379 = vst.msk [vmem:[#allocation3 + $0x20] sm:$0xff] %vm247_vm2, %v5898_v15  ;;  %2201 = vmatprep.mubr.f32.mxu1 %v5483_v0  ;;  %5044 = vmatpush3.bf16.msra.mxu1 %v6129_v11 }
0x1652   :  { %5045 = vmatprep.subr.bf16.mxu1 %v5484_v30 }
0x1653   :  { %v698_v61 = vpop.permute.xlu0 %697  ;;  %v2063_v27 = vld [vmem:[#allocation3 + $0x10] sm:$0xff] }
0x1654   :  { %700 = vst.msk [vmem:[#allocation3 + $0x30] sm:$0xff] %vm471_vm3, %v698_v61  ;;  %4286 = vmatmul.mubr.msk.f32.gmra.mrb[26].mxu1 %vm2106_vm4, %v2062_v9 }
0x1655   :  { %1835 = vst.msk [vmem:[#allocation3 + $0x30] sm:$0xff] %vm247_vm2, %v5988_v20  ;;  %2207 = vmatprep.mubr.f32.mxu1 %v5483_v0  ;;  %5047 = vmatpush3.bf16.msra.mxu1 %v6139_v52 }
0x1656   :  { %5054 = vmatprep.subr.bf16.mxu1 %v5484_v30 }
0x1657   :  { %v2053_v15 = vpop.permute.xlu0 %2052 }
0x1658   :  { %2055 = vst.msk [vmem:[#allocation3 + $0x38] sm:$0xff] %vm247_vm2, %v2053_v15  ;;  %4287 = vmatmul.mubr.msk.f32.gmra.mrb[28].mxu1 %vm2106_vm4, %v2063_v27  ;;  %v2065_v20 = vld [vmem:[#allocation3 + $0x20] sm:$0xff] }
0x1659   :  { %2213 = vmatprep.mubr.f32.mxu1 %v5483_v0 }
0x165c   :  { %4288 = vmatmul.mubr.msk.f32.gmra.mrb[30].mxu1 %vm2106_vm4, %v2064_v56  ;;  %v2067_v28 = vld [vmem:[#allocation3 + $0x30] sm:$0xff] }
0x165d   :  { %2219 = vmatprep.mubr.f32.mxu1 %v5483_v0 }
0x165f   :  { %v2068_v37 = vld [vmem:[#allocation3 + $0x38] sm:$0xff] }
0x1660   :  { %4289 = vmatmul.mubr.msk.f32.gmra.mrb[32].mxu1 %vm2106_vm4, %v2065_v20 }
0x1661   :  { %2225 = vmatprep.mubr.f32.mxu1 %v5483_v0 }
0x1664   :  { %4290 = vmatmul.mubr.msk.f32.gmra.mrb[34].mxu1 %vm2106_vm4, %v2066_v29  ;;  %v2452_v29 = vld [vmem:[%s6622_s1] sm:$0xff] }
0x1665   :  { %2231 = vmatprep.mubr.f32.mxu1 %v5483_v0 }
0x1668   :  { %4291 = vmatmul.mubr.msk.f32.gmra.mrb[36].mxu1 %vm2106_vm4, %v2067_v28  ;;  %v2453_v28 = vld [vmem:[%s6622_s1 + $0x38] sm:$0xff] }
0x1669   :  { %2237 = vmatprep.mubr.f32.mxu1 %v5483_v0 }
0x166c   :  { %4292 = vmatmul.mubr.msk.f32.gmra.mrb[38].mxu1 %vm2106_vm4, %v2068_v37 }
0x166d   :  { %4747 = vmatprep.mubr.msk.f32.mxu1 %vm5485_vm1, %v5483_v0 }
0x16ba   :  { %v2399_v6 = vpop.f32.mrb[26].mxu0 }
0x16bb   :  { %v4705_v57 = vpop.f32.mrb[27].mxu0 }
0x1723   :  { %v2197_v8 = vpop.f32.mrb[24].mxu1 }
0x1724   :  { %v2198_v49 = vadd.f32 %v2197_v8, %v2099_v10  ;;  %v2199_v62 = vpop.f32.mrb[25].mxu1 }
0x1725   :  { %v6187_v3 = vadd.f32 %v2199_v62, %v2103_v7 }
0x1726   :  { %v2331_v43 = vadd.f32 %v2327_v1, %v2198_v49 }
0x1727   :  { %v2203_v14 = vpop.f32.mrb[26].mxu1 }
0x1728   :  { %5273 = vtanh.f32 %v2331_v43  ;;  %v6189_v18 = vadd.f32 %v2203_v14, %v2099_v10  ;;  %v2205_v13 = vpop.f32.mrb[27].mxu1  ;;  %v4293_v26 = vmul.f32 -1.442695, %v2331_v43 }
0x1729   :  { %v6191_v47 = vadd.f32 %v2205_v13, %v2103_v7 }
0x172b   :  { %v2209_v33 = vpop.f32.mrb[28].mxu1 }
0x172c   :  { %v6193_v21 = vadd.f32 %v2209_v33, %v2099_v10  ;;  %v2211_v39 = vpop.f32.mrb[29].mxu1 }
0x172d   :  { %v6195_v22 = vadd.f32 %v2211_v39, %v2103_v7 }
0x172f   :  { %v2215_v38 = vpop.f32.mrb[30].mxu1 }
0x1730   :  { %v6197_v50 = vadd.f32 %v2215_v38, %v2099_v10  ;;  %v2217_v23 = vpop.f32.mrb[31].mxu1 }
0x1731   :  { %v6199_v48 = vadd.f32 %v2217_v23, %v2103_v7 }
0x1732   :  { %v5274_v24 = vpop.eup %5273 }
0x1733   :  { %v2221_v36 = vpop.f32.mrb[32].mxu1  ;;  %2419 = vrot.lane.b32.xlu1 %v5274_v24, %s5486_s25 }
0x1734   :  { %v6202_v25 = vadd.f32 %v2221_v36, %v2099_v10  ;;  %v2223_v40 = vpop.f32.mrb[33].mxu1 }
0x1735   :  { %v6204_v45 = vadd.f32 %v2223_v40, %v2103_v7 }
0x1737   :  { %v2227_v44 = vpop.f32.mrb[34].mxu1 }
0x1738   :  { %v6206_v46 = vadd.f32 %v2227_v44, %v2099_v10  ;;  %v2229_v53 = vpop.f32.mrb[35].mxu1 }
0x1739   :  { %v6208_v51 = vadd.f32 %v2229_v53, %v2103_v7 }
0x173b   :  { %v2233_v32 = vpop.f32.mrb[36].mxu1 }
0x173c   :  { %v6210_v35 = vadd.f32 %v2233_v32, %v2099_v10  ;;  %v2235_v4 = vpop.f32.mrb[37].mxu1 }
0x173d   :  { %v6212_v54 = vadd.f32 %v2235_v4, %v2103_v7 }
0x173f   :  { %v2239_v12 = vpop.f32.mrb[38].mxu1 }
0x1740   :  { %v6214_v17 = vadd.f32 %v2239_v12, %v2099_v10  ;;  %v2241_v55 = vpop.f32.mrb[39].mxu1 }
0x1741   :  { %v2242_v41 = vadd.f32 %v2241_v55, %v2103_v7 }
0x1743   :  { %v2403_v58 = vadd.f32 %v2399_v6, %v2242_v41 }
0x1745   :  { %5275 = vtanh.f32 %v2403_v58  ;;  %v4294_v31 = vmul.f32 -1.442695, %v2403_v58 }
0x1746   :  { %5277 = vpow2.f32 %v4293_v26 }
0x174f   :  { %v5276_v19 = vpop.eup %5275 }
0x1750   :  { %2431 = vrot.lane.b32.xlu0 %v5276_v19, %s5486_s25  ;;  %v5278_v63 = vpop.eup %5277 }
0x1751   :  { %v2407_v42 = vadd.f32 1.0, %v5278_v63 }
0x1753   :  { %5279 = vrcp.f32 %v2407_v42 }
0x1754   :  { %5281 = vpow2.f32 %v4294_v31 }
0x175d   :  { %v5280_v16 = vpop.eup %5279 }
0x175e   :  { %v5282_v9 = vpop.eup %5281  ;;  %v2416_v37 = vmul.f32 0.0, %v5280_v16 }
0x175f   :  { %v2413_v15 = vadd.f32 1.0, %v5282_v9  ;;  %v6273_v9 = vld [vmem:[%s6622_s1 + $0x8] sm:$0xff] }
0x1761   :  { %5283 = vrcp.f32 %v2413_v15 }
0x176b   :  { %v5284_v27 = vpop.eup %5283 }
0x176c   :  { %v2428_v57 = vmul.f32 0.0, %v5284_v27 }
0x17a5   :  { %v2420_v60 = vpop.permute.xlu1 %2419 }
0x17a6   :  { %v2422_v61 = vmul.f32 %v5280_v16, %v2420_v60 }
0x17a8   :  { %2424 = vrot.lane.b32.xlu1 %v2422_v61, %s5487_s26  ;;  %v6266_v61 = vld [vmem:[%s6622_s1 + $0x30] sm:$0xff] }
0x17c2   :  { %v2432_v56 = vpop.permute.xlu0 %2431 }
0x17c3   :  { %v2434_v20 = vmul.f32 %v5284_v27, %v2432_v56 }
0x17c5   :  { %2436 = vrot.lane.b32.xlu0 %v2434_v20, %s5487_s26 }
0x17c9   :  { %2455 = vrot.lane.b32.xlu0 %v2452_v29, %s5488_s29 }
0x17cd   :  { %2464 = vrot.lane.b32.xlu0 %v2453_v28, %s5488_s29 }
0x181a   :  { %v2425_v1 = vpop.permute.xlu1 %2424 }
0x181b   :  { %v6227_v2 = vadd.f32 %v2425_v1, %v2416_v37 }
0x181d   :  { %5285 = vtanh.f32 %v6227_v2 }
0x1827   :  { %v5286_v6 = vpop.eup %5285 }
0x1828   :  { %2442 = vrot.lane.b32.xlu1 %v5286_v6, %s5486_s25 }
0x1837   :  { %v2437_v59 = vpop.permute.xlu0 %2436 }
0x1838   :  { %v6231_v10 = vadd.f32 %v2437_v59, %v2428_v57 }
0x183a   :  { %5287 = vtanh.f32 %v6231_v10 }
0x183b   :  { %v2456_v49 = vpop.permute.xlu0 %2455 }
0x183f   :  { %v2465_v13 = vpop.permute.xlu0 %2464 }
0x1844   :  { %v5288_v7 = vpop.eup %5287 }
0x1845   :  { %2448 = vrot.lane.b32.xlu1 %v5288_v7, %s5486_s25 }
0x189a   :  { %v2443_v8 = vpop.permute.xlu1 %2442 }
0x189b   :  { %v2445_v62 = vmul.f32 %v5280_v16, %v2443_v8 }
0x189d   :  { %v2458_v43 = vmul.f32 %v2456_v49, %v2445_v62 }
0x189f   :  { %2473 = vrot.lane.b32.xlu1 %v2458_v43, %s5487_s26 }
0x18b7   :  { %v2449_v14 = vpop.permute.xlu1 %2448 }
0x18b8   :  { %v2451_v33 = vmul.f32 %v5284_v27, %v2449_v14 }
0x18ba   :  { %v6236_v39 = vmul.f32 %v2465_v13, %v2451_v33 }
0x18bc   :  { %2557 = vrot.lane.b32.xlu0 %v6236_v39, %s5487_s26 }
0x1911   :  { %v2474_v38 = vpop.permute.xlu1 %2473 }
0x1912   :  { %2476 = vst.msk [vmem:[#allocation3] sm:$0xff] %vm247_vm2, %v2474_v38  ;;  %4715 = vmatmul.mubr.msk.f32.vlgmr.msra.gmra.mrb[28].mxu0 %vm247_vm2, %v2474_v38 }
0x1913   :  { %5032 = vmatpush3.bf16.msra.mxu0 %v6129_v11  ;;  %4725 = vmatprep.mubr.msk.f32.mxu0 %vm5485_vm1, %v5483_v0 }
0x1914   :  { %5033 = vmatprep.subr.bf16.mxu0 %v5484_v30 }
0x1917   :  { %5035 = vmatpush3.bf16.msra.mxu0 %v6139_v52 }
0x1918   :  { %5036 = vmatprep.subr.bf16.mxu0 %v5484_v30 }
0x192e   :  { %v2558_v23 = vpop.permute.xlu0 %2557 }
0x192f   :  { %4726 = vmatmul.mubr.msk.f32.vlgmr.msra.gmra.mrb[30].mxu0 %vm247_vm2, %v2558_v23 }
0x1930   :  { %5038 = vmatpush3.bf16.msra.mxu0 %v6082_v34  ;;  %4736 = vmatprep.mubr.msk.f32.mxu0 %vm5485_vm1, %v5483_v0 }
0x1931   :  { %5039 = vmatprep.subr.bf16.mxu0 %v5484_v30 }
0x1934   :  { %5041 = vmatpush3.bf16.msra.mxu0 %v6104_v5 }
0x1935   :  { %5048 = vmatprep.subr.bf16.mxu0 %v5484_v30 }
0x19e5   :  { %v2551_v24 = vpop.f32.mrb[28].mxu0 }
0x19e6   :  { %v2555_v36 = vadd.f32 %v2551_v24, %v6189_v18  ;;  %v4716_v40 = vpop.f32.mrb[29].mxu0 }
0x19e8   :  { %5289 = vtanh.f32 %v2555_v36  ;;  %v4297_v41 = vmul.f32 -1.442695, %v2555_v36 }
0x19f2   :  { %v5290_v44 = vpop.eup %5289 }
0x19f3   :  { %2647 = vrot.lane.b32.xlu0 %v5290_v44, %s5486_s25 }
0x1a02   :  { %v2627_v53 = vpop.f32.mrb[30].mxu0 }
0x1a03   :  { %v2631_v32 = vadd.f32 %v2627_v53, %v6212_v54  ;;  %v4727_v4 = vpop.f32.mrb[31].mxu0 }
0x1a05   :  { %5291 = vtanh.f32 %v2631_v32  ;;  %v4298_v55 = vmul.f32 -1.442695, %v2631_v32 }
0x1a07   :  { %5293 = vpow2.f32 %v4298_v55 }
0x1a08   :  { %5295 = vpow2.f32 %v4297_v41 }
0x1a0f   :  { %v5292_v12 = vpop.eup %5291 }
0x1a10   :  { %2659 = vrot.lane.b32.xlu1 %v5292_v12, %s5486_s25 }
0x1a11   :  { %v5294_v18 = vpop.eup %5293 }
0x1a12   :  { %v2641_v58 = vadd.f32 1.0, %v5294_v18  ;;  %v5296_v19 = vpop.eup %5295 }
0x1a13   :  { %v2635_v26 = vadd.f32 1.0, %v5296_v19 }
0x1a14   :  { %2468 = vrot.lane.b32.xlu1 %v2453_v28, %s5487_s26  ;;  %5297 = vrcp.f32 %v2641_v58 }
0x1a15   :  { %5299 = vrcp.f32 %v2635_v26 }
0x1a18   :  { %2459 = vrot.lane.b32.xlu1 %v2452_v29, %s5487_s26 }
0x1a1e   :  { %v5298_v54 = vpop.eup %5297 }
0x1a1f   :  { %v5300_v16 = vpop.eup %5299 }
0x1a65   :  { %v2648_v31 = vpop.permute.xlu0 %2647 }
0x1a66   :  { %v2650_v60 = vmul.f32 %v5300_v16, %v2648_v31  ;;  %v6320_v31 = vld [vmem:[%s6622_s1 + $0x28] sm:$0xff] }
0x1a82   :  { %v2660_v63 = vpop.permute.xlu1 %2659 }
0x1a83   :  { %v2662_v42 = vmul.f32 %v5298_v54, %v2660_v63 }
0x1a85   :  { %2664 = vrot.lane.b32.xlu0 %v2662_v42, %s5487_s26 }
0x1a86   :  { %v2469_v15 = vpop.permute.xlu1 %2468 }
0x1a87   :  { %v2471_v27 = vmul.f32 %v2469_v15, %v6231_v10 }
0x1a89   :  { %2652 = vrot.lane.b32.xlu0 %v2650_v60, %s5487_s26  ;;  %v2656_v29 = vmul.f32 %v5298_v54, %v2471_v27 }
0x1a8a   :  { %v2460_v56 = vpop.permute.xlu1 %2459 }
0x1a8b   :  { %v2462_v20 = vmul.f32 %v2460_v56, %v6227_v2 }
0x1a8d   :  { %2692 = vrot.lane.b32.xlu0 %v6266_v61, %s5488_s29  ;;  %v2644_v1 = vmul.f32 %v5300_v16, %v2462_v20 }
0x1a91   :  { %2683 = vrot.lane.b32.xlu0 %v6273_v9, %s5488_s29 }
0x1af7   :  { %v2665_v28 = vpop.permute.xlu0 %2664 }
0x1af8   :  { %v6279_v37 = vadd.f32 %v2665_v28, %v2656_v29 }
0x1afa   :  { %5301 = vtanh.f32 %v6279_v37 }
0x1afb   :  { %v2653_v6 = vpop.permute.xlu0 %2652 }
0x1afc   :  { %v6282_v57 = vadd.f32 %v2653_v6, %v2644_v1 }
0x1afe   :  { %5303 = vtanh.f32 %v6282_v57 }
0x1aff   :  { %v2693_v10 = vpop.permute.xlu0 %2692 }
0x1b03   :  { %v2684_v43 = vpop.permute.xlu0 %2683 }
0x1b04   :  { %v5302_v59 = vpop.eup %5301 }
0x1b05   :  { %2676 = vrot.lane.b32.xlu1 %v5302_v59, %s5486_s25 }
0x1b08   :  { %v5304_v7 = vpop.eup %5303 }
0x1b09   :  { %2670 = vrot.lane.b32.xlu1 %v5304_v7, %s5486_s25 }
0x1b77   :  { %v2677_v2 = vpop.permute.xlu1 %2676 }
0x1b78   :  { %v2679_v8 = vmul.f32 %v5298_v54, %v2677_v2 }
0x1b7a   :  { %v6287_v49 = vmul.f32 %v2693_v10, %v2679_v8 }
0x1b7b   :  { %v2671_v62 = vpop.permute.xlu1 %2670 }
0x1b7c   :  { %v2673_v14 = vmul.f32 %v5300_v16, %v2671_v62  ;;  %2785 = vrot.lane.b32.xlu1 %v6287_v49, %s5487_s26  ;;  %v6327_v16 = vld [vmem:[%s6622_s1 + $0x10] sm:$0xff] }
0x1b7e   :  { %v2686_v13 = vmul.f32 %v2684_v43, %v2673_v14 }
0x1b80   :  { %2701 = vrot.lane.b32.xlu0 %v2686_v13, %s5487_s26 }
0x1bee   :  { %v2786_v33 = vpop.permute.xlu1 %2785 }
0x1bef   :  { %4748 = vmatmul.mubr.msk.f32.vlgmr.msra.gmra.mrb[40].mxu1 %vm247_vm2, %v2786_v33 }
0x1bf0   :  { %5056 = vmatpush3.bf16.msra.mxu1 %v6129_v11  ;;  %4769 = vmatprep.mubr.msk.f32.mxu1 %vm5485_vm1, %v5483_v0 }
0x1bf1   :  { %5057 = vmatprep.subr.bf16.mxu1 %v5484_v30 }
0x1bf2   :  { %v2702_v38 = vpop.permute.xlu0 %2701 }
0x1bf3   :  { %2704 = vst.msk [vmem:[#allocation3 + $0x8] sm:$0xff] %vm247_vm2, %v2702_v38  ;;  %4737 = vmatmul.mubr.msk.f32.vlgmr.msra.gmra.mrb[32].mxu0 %vm247_vm2, %v2702_v38 }
0x1bf4   :  { %5050 = vmatpush3.bf16.msra.mxu0 %v6082_v34  ;;  %5059 = vmatpush3.bf16.msra.mxu1 %v6139_v52 }
0x1bf5   :  { %5051 = vmatprep.subr.bf16.mxu0 %v5484_v30  ;;  %4758 = vmatprep.mubr.msk.f32.mxu0 %vm5485_vm1, %v5483_v0 }
0x1bf6   :  { %5066 = vmatprep.subr.bf16.mxu1 %v5484_v30 }
0x1bf8   :  { %5053 = vmatpush3.bf16.msra.mxu0 %v6104_v5 }
0x1bf9   :  { %5060 = vmatprep.subr.bf16.mxu0 %v5484_v30 }
0x1cc2   :  { %v2855_v23 = vpop.f32.mrb[40].mxu1 }
0x1cc3   :  { %v2859_v24 = vadd.f32 %v2855_v23, %v6208_v51  ;;  %v4749_v36 = vpop.f32.mrb[41].mxu1 }
0x1cc5   :  { %5305 = vtanh.f32 %v2859_v24  ;;  %v4302_v51 = vmul.f32 -1.442695, %v2859_v24 }
0x1cc6   :  { %v2779_v40 = vpop.f32.mrb[32].mxu0 }
0x1cc7   :  { %v2783_v44 = vadd.f32 %v2779_v40, %v6193_v21  ;;  %v4738_v53 = vpop.f32.mrb[33].mxu0 }
0x1cc9   :  { %5307 = vtanh.f32 %v2783_v44  ;;  %v4301_v12 = vmul.f32 -1.442695, %v2783_v44 }
0x1cca   :  { %5309 = vpow2.f32 %v4302_v51 }
0x1ccb   :  { %5311 = vpow2.f32 %v4301_v12 }
0x1ccf   :  { %v5306_v32 = vpop.eup %5305 }
0x1cd0   :  { %2887 = vrot.lane.b32.xlu1 %v5306_v32, %s5486_s25 }
0x1cd3   :  { %v5308_v4 = vpop.eup %5307 }
0x1cd4   :  { %2696 = vrot.lane.b32.xlu1 %v6266_v61, %s5487_s26  ;;  %2875 = vrot.lane.b32.xlu0 %v5308_v4, %s5486_s25  ;;  %v5310_v55 = vpop.eup %5309 }
0x1cd5   :  { %v2869_v21 = vadd.f32 1.0, %v5310_v55  ;;  %v5312_v41 = vpop.eup %5311 }
0x1cd6   :  { %v2863_v18 = vadd.f32 1.0, %v5312_v41 }
0x1cd7   :  { %5313 = vrcp.f32 %v2869_v21 }
0x1cd8   :  { %2687 = vrot.lane.b32.xlu1 %v6273_v9, %s5487_s26  ;;  %5315 = vrcp.f32 %v2863_v18 }
0x1ce1   :  { %v5314_v58 = vpop.eup %5313 }
0x1ce2   :  { %v5316_v54 = vpop.eup %5315 }
0x1d42   :  { %v2888_v19 = vpop.permute.xlu1 %2887 }
0x1d43   :  { %v2890_v26 = vmul.f32 %v5314_v58, %v2888_v19 }
0x1d45   :  { %2892 = vrot.lane.b32.xlu0 %v2890_v26, %s5487_s26 }
0x1d46   :  { %v2876_v63 = vpop.permute.xlu0 %2875  ;;  %v2697_v60 = vpop.permute.xlu1 %2696 }
0x1d47   :  { %v2878_v42 = vmul.f32 %v5316_v54, %v2876_v63  ;;  %v2699_v15 = vmul.f32 %v2697_v60, %v6279_v37  ;;  %v6374_v63 = vld [vmem:[%s6622_s1 + $0x20] sm:$0xff] }
0x1d49   :  { %2880 = vrot.lane.b32.xlu0 %v2878_v42, %s5487_s26  ;;  %v2884_v20 = vmul.f32 %v5314_v58, %v2699_v15  ;;  %v6381_v42 = vld [vmem:[%s6622_s1 + $0x18] sm:$0xff] }
0x1d4a   :  { %v2688_v27 = vpop.permute.xlu1 %2687 }
0x1d4b   :  { %v2690_v56 = vmul.f32 %v2688_v27, %v6282_v57 }
0x1d4d   :  { %2920 = vrot.lane.b32.xlu0 %v6320_v31, %s5488_s29  ;;  %v2872_v1 = vmul.f32 %v5316_v54, %v2690_v56 }
0x1d51   :  { %2911 = vrot.lane.b32.xlu0 %v6327_v16, %s5488_s29 }
0x1db7   :  { %v2893_v29 = vpop.permute.xlu0 %2892 }
0x1db8   :  { %v6333_v28 = vadd.f32 %v2893_v29, %v2884_v20 }
0x1dba   :  { %5317 = vtanh.f32 %v6333_v28 }
0x1dbb   :  { %v2881_v6 = vpop.permute.xlu0 %2880 }
0x1dbc   :  { %v6336_v59 = vadd.f32 %v2881_v6, %v2872_v1 }
0x1dbe   :  { %5319 = vtanh.f32 %v6336_v59 }
0x1dbf   :  { %v2921_v37 = vpop.permute.xlu0 %2920 }
0x1dc3   :  { %v2912_v43 = vpop.permute.xlu0 %2911 }
0x1dc4   :  { %v5318_v7 = vpop.eup %5317 }
0x1dc5   :  { %2904 = vrot.lane.b32.xlu1 %v5318_v7, %s5486_s25 }
0x1dc8   :  { %v5320_v10 = vpop.eup %5319 }
0x1dc9   :  { %2898 = vrot.lane.b32.xlu1 %v5320_v10, %s5486_s25 }
0x1e37   :  { %v2905_v57 = vpop.permute.xlu1 %2904 }
0x1e38   :  { %v2907_v2 = vmul.f32 %v5314_v58, %v2905_v57 }
0x1e3a   :  { %v6341_v8 = vmul.f32 %v2921_v37, %v2907_v2 }
0x1e3b   :  { %v2899_v62 = vpop.permute.xlu1 %2898 }
0x1e3c   :  { %v2901_v14 = vmul.f32 %v5316_v54, %v2899_v62  ;;  %3013 = vrot.lane.b32.xlu1 %v6341_v8, %s5487_s26 }
0x1e3e   :  { %v2914_v13 = vmul.f32 %v2912_v43, %v2901_v14 }
0x1e40   :  { %2929 = vrot.lane.b32.xlu0 %v2914_v13, %s5487_s26 }
0x1eae   :  { %v3014_v33 = vpop.permute.xlu1 %3013 }
0x1eaf   :  { %4770 = vmatmul.mubr.msk.f32.vlgmr.msra.gmra.mrb[42].mxu1 %vm247_vm2, %v3014_v33 }
0x1eb0   :  { %5068 = vmatpush3.bf16.msra.mxu1 %v6129_v11  ;;  %4791 = vmatprep.mubr.msk.f32.mxu1 %vm5485_vm1, %v5483_v0 }
0x1eb1   :  { %5069 = vmatprep.subr.bf16.mxu1 %v5484_v30 }
0x1eb2   :  { %v2930_v38 = vpop.permute.xlu0 %2929 }
0x1eb3   :  { %2932 = vst.msk [vmem:[#allocation3 + $0x10] sm:$0xff] %vm247_vm2, %v2930_v38  ;;  %4759 = vmatmul.mubr.msk.f32.vlgmr.msra.gmra.mrb[34].mxu0 %vm247_vm2, %v2930_v38 }
0x1eb4   :  { %5062 = vmatpush3.bf16.msra.mxu0 %v6082_v34  ;;  %5071 = vmatpush3.bf16.msra.mxu1 %v6139_v52 }
0x1eb5   :  { %5063 = vmatprep.subr.bf16.mxu0 %v5484_v30  ;;  %4780 = vmatprep.mubr.msk.f32.mxu0 %vm5485_vm1, %v5483_v0 }
0x1eb6   :  { %5078 = vmatprep.subr.bf16.mxu1 %v5484_v30 }
0x1eb8   :  { %5065 = vmatpush3.bf16.msra.mxu0 %v6104_v5 }
0x1eb9   :  { %5072 = vmatprep.subr.bf16.mxu0 %v5484_v30 }
0x1f82   :  { %v3083_v23 = vpop.f32.mrb[42].mxu1 }
0x1f83   :  { %v3087_v24 = vadd.f32 %v3083_v23, %v6204_v45  ;;  %v4771_v36 = vpop.f32.mrb[43].mxu1 }
0x1f85   :  { %5321 = vtanh.f32 %v3087_v24  ;;  %v4306_v45 = vmul.f32 -1.442695, %v3087_v24 }
0x1f86   :  { %v3007_v40 = vpop.f32.mrb[34].mxu0 }
0x1f87   :  { %v3011_v44 = vadd.f32 %v3007_v40, %v6197_v50  ;;  %v4760_v53 = vpop.f32.mrb[35].mxu0 }
0x1f89   :  { %5323 = vtanh.f32 %v3011_v44  ;;  %v4305_v51 = vmul.f32 -1.442695, %v3011_v44 }
0x1f8a   :  { %5325 = vpow2.f32 %v4306_v45 }
0x1f8b   :  { %5327 = vpow2.f32 %v4305_v51 }
0x1f8f   :  { %v5322_v32 = vpop.eup %5321 }
0x1f90   :  { %3115 = vrot.lane.b32.xlu1 %v5322_v32, %s5486_s25 }
0x1f93   :  { %v5324_v4 = vpop.eup %5323 }
0x1f94   :  { %2924 = vrot.lane.b32.xlu1 %v6320_v31, %s5487_s26  ;;  %3103 = vrot.lane.b32.xlu0 %v5324_v4, %s5486_s25  ;;  %v5326_v12 = vpop.eup %5325 }
0x1f95   :  { %v3097_v50 = vadd.f32 1.0, %v5326_v12  ;;  %v5328_v55 = vpop.eup %5327 }
0x1f96   :  { %v3091_v21 = vadd.f32 1.0, %v5328_v55 }
0x1f97   :  { %5329 = vrcp.f32 %v3097_v50 }
0x1f98   :  { %2915 = vrot.lane.b32.xlu1 %v6327_v16, %s5487_s26  ;;  %5331 = vrcp.f32 %v3091_v21 }
0x1fa1   :  { %v5330_v41 = vpop.eup %5329 }
0x1fa2   :  { %v5332_v19 = vpop.eup %5331 }
0x2002   :  { %v3116_v18 = vpop.permute.xlu1 %3115 }
0x2003   :  { %v3118_v58 = vmul.f32 %v5330_v41, %v3116_v18 }
0x2005   :  { %3120 = vrot.lane.b32.xlu0 %v3118_v58, %s5487_s26 }
0x2006   :  { %v3104_v26 = vpop.permute.xlu0 %3103  ;;  %v2925_v60 = vpop.permute.xlu1 %2924 }
0x2007   :  { %v3106_v54 = vmul.f32 %v5332_v19, %v3104_v26  ;;  %v2927_v15 = vmul.f32 %v2925_v60, %v6333_v28 }
0x2009   :  { %3108 = vrot.lane.b32.xlu0 %v3106_v54, %s5487_s26  ;;  %v3112_v20 = vmul.f32 %v5330_v41, %v2927_v15 }
0x200a   :  { %v2916_v27 = vpop.permute.xlu1 %2915 }
0x200b   :  { %v2918_v56 = vmul.f32 %v2916_v27, %v6336_v59 }
0x200d   :  { %3148 = vrot.lane.b32.xlu0 %v6374_v63, %s5488_s29  ;;  %v3100_v6 = vmul.f32 %v5332_v19, %v2918_v56 }
0x2011   :  { %3139 = vrot.lane.b32.xlu0 %v6381_v42, %s5488_s29 }
0x2077   :  { %v3121_v29 = vpop.permute.xlu0 %3120 }
0x2078   :  { %v6387_v1 = vadd.f32 %v3121_v29, %v3112_v20 }
0x207a   :  { %5333 = vtanh.f32 %v6387_v1 }
0x207b   :  { %v3109_v7 = vpop.permute.xlu0 %3108 }
0x207c   :  { %v6390_v10 = vadd.f32 %v3109_v7, %v3100_v6 }
0x207e   :  { %5335 = vtanh.f32 %v6390_v10 }
0x207f   :  { %v3149_v28 = vpop.permute.xlu0 %3148 }
0x2083   :  { %v3140_v14 = vpop.permute.xlu0 %3139 }
0x2084   :  { %v5334_v37 = vpop.eup %5333 }
0x2085   :  { %3132 = vrot.lane.b32.xlu1 %v5334_v37, %s5486_s25 }
0x2088   :  { %v5336_v57 = vpop.eup %5335 }
0x2089   :  { %3126 = vrot.lane.b32.xlu1 %v5336_v57, %s5486_s25 }
0x20f7   :  { %v3133_v59 = vpop.permute.xlu1 %3132 }
0x20f8   :  { %v3135_v2 = vmul.f32 %v5330_v41, %v3133_v59 }
0x20fa   :  { %v6395_v62 = vmul.f32 %v3149_v28, %v3135_v2 }
0x20fb   :  { %v3127_v43 = vpop.permute.xlu1 %3126 }
0x20fc   :  { %v3129_v13 = vmul.f32 %v5332_v19, %v3127_v43  ;;  %3241 = vrot.lane.b32.xlu1 %v6395_v62, %s5487_s26 }
0x20fe   :  { %v3142_v33 = vmul.f32 %v3140_v14, %v3129_v13 }
0x2100   :  { %3157 = vrot.lane.b32.xlu0 %v3142_v33, %s5487_s26 }
0x216e   :  { %v3242_v38 = vpop.permute.xlu1 %3241 }
0x216f   :  { %4792 = vmatmul.mubr.msk.f32.vlgmr.msra.gmra.mrb[44].mxu1 %vm247_vm2, %v3242_v38 }
0x2170   :  { %5080 = vmatpush3.bf16.msra.mxu1 %v6129_v11  ;;  %4813 = vmatprep.mubr.msk.f32.mxu1 %vm5485_vm1, %v5483_v0 }
0x2171   :  { %5081 = vmatprep.subr.bf16.mxu1 %v5484_v30 }
0x2172   :  { %v3158_v23 = vpop.permute.xlu0 %3157 }
0x2173   :  { %3160 = vst.msk [vmem:[#allocation3 + $0x18] sm:$0xff] %vm247_vm2, %v3158_v23  ;;  %4781 = vmatmul.mubr.msk.f32.vlgmr.msra.gmra.mrb[36].mxu0 %vm247_vm2, %v3158_v23 }
0x2174   :  { %5074 = vmatpush3.bf16.msra.mxu0 %v6082_v34  ;;  %5083 = vmatpush3.bf16.msra.mxu1 %v6139_v52 }
0x2175   :  { %5075 = vmatprep.subr.bf16.mxu0 %v5484_v30  ;;  %4802 = vmatprep.mubr.msk.f32.mxu0 %vm5485_vm1, %v5483_v0 }
0x2176   :  { %5090 = vmatprep.subr.bf16.mxu1 %v5484_v30 }
0x2178   :  { %5077 = vmatpush3.bf16.msra.mxu0 %v6104_v5 }
0x2179   :  { %5084 = vmatprep.subr.bf16.mxu0 %v5484_v30 }
0x2242   :  { %v3311_v24 = vpop.f32.mrb[44].mxu1 }
0x2243   :  { %v3315_v36 = vadd.f32 %v3311_v24, %v6199_v48  ;;  %v4793_v40 = vpop.f32.mrb[45].mxu1 }
0x2245   :  { %5337 = vtanh.f32 %v3315_v36  ;;  %v4310_v48 = vmul.f32 -1.442695, %v3315_v36 }
0x2246   :  { %v3235_v44 = vpop.f32.mrb[36].mxu0 }
0x2247   :  { %v3239_v53 = vadd.f32 %v3235_v44, %v6202_v25  ;;  %v4782_v32 = vpop.f32.mrb[37].mxu0 }
0x2249   :  { %5339 = vtanh.f32 %v3239_v53  ;;  %v4309_v51 = vmul.f32 -1.442695, %v3239_v53 }
0x224a   :  { %5341 = vpow2.f32 %v4310_v48 }
0x224b   :  { %5343 = vpow2.f32 %v4309_v51 }
0x224f   :  { %v5338_v4 = vpop.eup %5337 }
0x2250   :  { %3343 = vrot.lane.b32.xlu1 %v5338_v4, %s5486_s25 }
0x2253   :  { %v5340_v45 = vpop.eup %5339 }
0x2254   :  { %3152 = vrot.lane.b32.xlu1 %v6374_v63, %s5487_s26  ;;  %3331 = vrot.lane.b32.xlu0 %v5340_v45, %s5486_s25  ;;  %v5342_v12 = vpop.eup %5341 }
0x2255   :  { %v3325_v25 = vadd.f32 1.0, %v5342_v12  ;;  %v5344_v50 = vpop.eup %5343 }
0x2256   :  { %v3319_v55 = vadd.f32 1.0, %v5344_v50 }
0x2257   :  { %5345 = vrcp.f32 %v3325_v25 }
0x2258   :  { %3143 = vrot.lane.b32.xlu1 %v6381_v42, %s5487_s26  ;;  %5347 = vrcp.f32 %v3319_v55 }
0x2261   :  { %v5346_v21 = vpop.eup %5345 }
0x2262   :  { %v5348_v58 = vpop.eup %5347 }
0x22c2   :  { %v3344_v41 = vpop.permute.xlu1 %3343 }
0x22c3   :  { %v3346_v18 = vmul.f32 %v5346_v21, %v3344_v41 }
0x22c5   :  { %3348 = vrot.lane.b32.xlu0 %v3346_v18, %s5487_s26 }
0x22c6   :  { %v3332_v19 = vpop.permute.xlu0 %3331  ;;  %v3153_v54 = vpop.permute.xlu1 %3152 }
0x22c7   :  { %v3334_v26 = vmul.f32 %v5348_v58, %v3332_v19  ;;  %v3155_v60 = vmul.f32 %v3153_v54, %v6387_v1 }
0x22c9   :  { %3336 = vrot.lane.b32.xlu0 %v3334_v26, %s5487_s26  ;;  %v3340_v56 = vmul.f32 %v5346_v21, %v3155_v60 }
0x22ca   :  { %v3144_v15 = vpop.permute.xlu1 %3143 }
0x22cb   :  { %v3146_v27 = vmul.f32 %v3144_v15, %v6390_v10 }
0x22cd   :  { %3376 = vrot.lane.b32.xlu0 %v6381_v42, %s5488_s29  ;;  %v3328_v6 = vmul.f32 %v5348_v58, %v3146_v27 }
0x22d1   :  { %3367 = vrot.lane.b32.xlu0 %v6374_v63, %s5488_s29 }
0x2337   :  { %v3349_v20 = vpop.permute.xlu0 %3348 }
0x2338   :  { %v6431_v29 = vadd.f32 %v3349_v20, %v3340_v56 }
0x233a   :  { %5349 = vtanh.f32 %v6431_v29 }
0x233b   :  { %v3337_v7 = vpop.permute.xlu0 %3336 }
0x233c   :  { %v6434_v37 = vadd.f32 %v3337_v7, %v3328_v6 }
0x233e   :  { %5351 = vtanh.f32 %v6434_v37 }
0x233f   :  { %v3377_v1 = vpop.permute.xlu0 %3376 }
0x2343   :  { %v3368_v14 = vpop.permute.xlu0 %3367 }
0x2344   :  { %v5350_v57 = vpop.eup %5349 }
0x2345   :  { %3360 = vrot.lane.b32.xlu1 %v5350_v57, %s5486_s25 }
0x2348   :  { %v5352_v28 = vpop.eup %5351 }
0x2349   :  { %3354 = vrot.lane.b32.xlu1 %v5352_v28, %s5486_s25 }
0x23b7   :  { %v3361_v10 = vpop.permute.xlu1 %3360 }
0x23b8   :  { %v3363_v59 = vmul.f32 %v5346_v21, %v3361_v10 }
0x23ba   :  { %v6439_v2 = vmul.f32 %v3377_v1, %v3363_v59 }
0x23bb   :  { %v3355_v43 = vpop.permute.xlu1 %3354 }
0x23bc   :  { %v3357_v13 = vmul.f32 %v5348_v58, %v3355_v43  ;;  %3469 = vrot.lane.b32.xlu1 %v6439_v2, %s5487_s26 }
0x23be   :  { %v3370_v33 = vmul.f32 %v3368_v14, %v3357_v13 }
0x23c0   :  { %3385 = vrot.lane.b32.xlu0 %v3370_v33, %s5487_s26 }
0x242e   :  { %v3470_v38 = vpop.permute.xlu1 %3469 }
0x242f   :  { %4814 = vmatmul.mubr.msk.f32.vlgmr.msra.gmra.mrb[46].mxu1 %vm247_vm2, %v3470_v38 }
0x2430   :  { %5092 = vmatpush3.bf16.msra.mxu1 %v6129_v11  ;;  %4835 = vmatprep.mubr.msk.f32.mxu1 %vm5485_vm1, %v5483_v0 }
0x2431   :  { %5093 = vmatprep.subr.bf16.mxu1 %v5484_v30 }
0x2432   :  { %v6449_v23 = vpop.permute.xlu0 %3385 }
0x2433   :  { %4803 = vmatmul.mubr.msk.f32.vlgmr.msra.gmra.mrb[38].mxu0 %vm247_vm2, %v6449_v23 }
0x2434   :  { %5086 = vmatpush3.bf16.msra.mxu0 %v6082_v34  ;;  %5095 = vmatpush3.bf16.msra.mxu1 %v6139_v52 }
0x2435   :  { %5087 = vmatprep.subr.bf16.mxu0 %v5484_v30  ;;  %4824 = vmatprep.mubr.msk.f32.mxu0 %vm5485_vm1, %v5483_v0 }
0x2436   :  { %5102 = vmatprep.subr.bf16.mxu1 %v5484_v30 }
0x2438   :  { %5089 = vmatpush3.bf16.msra.mxu0 %v6104_v5 }
0x2439   :  { %5096 = vmatprep.subr.bf16.mxu0 %v5484_v30 }
0x2502   :  { %v3539_v24 = vpop.f32.mrb[46].mxu1 }
0x2503   :  { %v3543_v36 = vadd.f32 %v3539_v24, %v6195_v22  ;;  %v4815_v40 = vpop.f32.mrb[47].mxu1 }
0x2505   :  { %5353 = vtanh.f32 %v3543_v36  ;;  %v4314_v22 = vmul.f32 -1.442695, %v3543_v36 }
0x2506   :  { %v3463_v44 = vpop.f32.mrb[38].mxu0 }
0x2507   :  { %v3467_v53 = vadd.f32 %v3463_v44, %v6206_v46  ;;  %v4804_v32 = vpop.f32.mrb[39].mxu0 }
0x2509   :  { %5355 = vtanh.f32 %v3467_v53  ;;  %v4313_v48 = vmul.f32 -1.442695, %v3467_v53 }
0x250a   :  { %5357 = vpow2.f32 %v4314_v22 }
0x250b   :  { %5359 = vpow2.f32 %v4313_v48 }
0x250f   :  { %v5354_v4 = vpop.eup %5353 }
0x2510   :  { %3571 = vrot.lane.b32.xlu1 %v5354_v4, %s5486_s25 }
0x2513   :  { %v5356_v45 = vpop.eup %5355 }
0x2514   :  { %3380 = vrot.lane.b32.xlu1 %v6381_v42, %s5487_s26  ;;  %3559 = vrot.lane.b32.xlu0 %v5356_v45, %s5486_s25  ;;  %v5358_v51 = vpop.eup %5357 }
0x2515   :  { %v3553_v46 = vadd.f32 1.0, %v5358_v51  ;;  %v5360_v12 = vpop.eup %5359 }
0x2516   :  { %v3547_v25 = vadd.f32 1.0, %v5360_v12 }
0x2517   :  { %5361 = vrcp.f32 %v3553_v46 }
0x2518   :  { %3371 = vrot.lane.b32.xlu1 %v6374_v63, %s5487_s26  ;;  %5363 = vrcp.f32 %v3547_v25 }
0x2521   :  { %v5362_v50 = vpop.eup %5361 }
0x2522   :  { %v5364_v42 = vpop.eup %5363 }
0x2582   :  { %v3572_v55 = vpop.permute.xlu1 %3571 }
0x2583   :  { %v3574_v21 = vmul.f32 %v5362_v50, %v3572_v55 }
0x2585   :  { %3576 = vrot.lane.b32.xlu0 %v3574_v21, %s5487_s26 }
0x2586   :  { %v3560_v41 = vpop.permute.xlu0 %3559  ;;  %v3381_v63 = vpop.permute.xlu1 %3380 }
0x2587   :  { %v3562_v18 = vmul.f32 %v5364_v42, %v3560_v41  ;;  %v3383_v58 = vmul.f32 %v3381_v63, %v6431_v29 }
0x2589   :  { %3564 = vrot.lane.b32.xlu0 %v3562_v18, %s5487_s26  ;;  %v3568_v54 = vmul.f32 %v5362_v50, %v3383_v58 }
0x258a   :  { %v3372_v19 = vpop.permute.xlu1 %3371 }
0x258b   :  { %v3374_v26 = vmul.f32 %v3372_v19, %v6434_v37 }
0x258d   :  { %3604 = vrot.lane.b32.xlu0 %v6327_v16, %s5488_s29  ;;  %v3556_v27 = vmul.f32 %v5364_v42, %v3374_v26 }
0x2591   :  { %3595 = vrot.lane.b32.xlu0 %v6320_v31, %s5488_s29 }
0x25f7   :  { %v3577_v60 = vpop.permute.xlu0 %3576 }
0x25f8   :  { %v6477_v15 = vadd.f32 %v3577_v60, %v3568_v54 }
0x25fa   :  { %5365 = vtanh.f32 %v6477_v15 }
0x25fb   :  { %v3565_v56 = vpop.permute.xlu0 %3564 }
0x25fc   :  { %v6480_v20 = vadd.f32 %v3565_v56, %v3556_v27 }
0x25fe   :  { %5367 = vtanh.f32 %v6480_v20 }
0x25ff   :  { %v3605_v29 = vpop.permute.xlu0 %3604 }
0x2603   :  { %v3596_v10 = vpop.permute.xlu0 %3595 }
0x2604   :  { %v5366_v6 = vpop.eup %5365 }
0x2605   :  { %3588 = vrot.lane.b32.xlu1 %v5366_v6, %s5486_s25 }
0x2608   :  { %v5368_v7 = vpop.eup %5367 }
0x2609   :  { %3582 = vrot.lane.b32.xlu1 %v5368_v7, %s5486_s25 }
0x2677   :  { %v3589_v37 = vpop.permute.xlu1 %3588 }
0x2678   :  { %v3591_v57 = vmul.f32 %v5362_v50, %v3589_v37 }
0x267a   :  { %v6485_v28 = vmul.f32 %v3605_v29, %v3591_v57 }
0x267b   :  { %v3583_v1 = vpop.permute.xlu1 %3582 }
0x267c   :  { %v3585_v59 = vmul.f32 %v5364_v42, %v3583_v1  ;;  %3697 = vrot.lane.b32.xlu1 %v6485_v28, %s5487_s26 }
0x267e   :  { %v3598_v43 = vmul.f32 %v3596_v10, %v3585_v59 }
0x2680   :  { %3613 = vrot.lane.b32.xlu0 %v3598_v43, %s5487_s26 }
0x26ee   :  { %v3698_v14 = vpop.permute.xlu1 %3697 }
0x26ef   :  { %4836 = vmatmul.mubr.msk.f32.vlgmr.msra.gmra.mrb[48].mxu1 %vm247_vm2, %v3698_v14 }
0x26f0   :  { %5104 = vmatpush3.bf16.msra.mxu1 %v6129_v11  ;;  %4857 = vmatprep.mubr.msk.f32.mxu1 %vm5485_vm1, %v5483_v0 }
0x26f1   :  { %5105 = vmatprep.subr.bf16.mxu1 %v5484_v30 }
0x26f2   :  { %v6495_v13 = vpop.permute.xlu0 %3613 }
0x26f3   :  { %4825 = vmatmul.mubr.msk.f32.vlgmr.msra.gmra.mrb[40].mxu0 %vm247_vm2, %v6495_v13 }
0x26f4   :  { %5098 = vmatpush3.bf16.msra.mxu0 %v6082_v34  ;;  %5107 = vmatpush3.bf16.msra.mxu1 %v6139_v52 }
0x26f5   :  { %5099 = vmatprep.subr.bf16.mxu0 %v5484_v30  ;;  %4846 = vmatprep.mubr.msk.f32.mxu0 %vm5485_vm1, %v5483_v0 }
0x26f8   :  { %5101 = vmatpush3.bf16.msra.mxu0 %v6104_v5 }
0x27c2   :  { %v3767_v11 = vpop.f32.mrb[48].mxu1 }
0x27c3   :  { %v3771_v33 = vadd.f32 %v3767_v11, %v6191_v47  ;;  %v4837_v38 = vpop.f32.mrb[49].mxu1 }
0x27c5   :  { %5369 = vtanh.f32 %v3771_v33  ;;  %v4318_v0 = vmul.f32 -1.442695, %v3771_v33 }
0x27c6   :  { %v3691_v24 = vpop.f32.mrb[40].mxu0 }
0x27c7   :  { %v3695_v36 = vadd.f32 %v3691_v24, %v6210_v35  ;;  %v4826_v40 = vpop.f32.mrb[41].mxu0 }
0x27c9   :  { %5371 = vtanh.f32 %v3695_v36  ;;  %v4317_v30 = vmul.f32 -1.442695, %v3695_v36 }
0x27ca   :  { %5373 = vpow2.f32 %v4318_v0 }
0x27cb   :  { %5375 = vpow2.f32 %v4317_v30 }
0x27cf   :  { %v5370_v34 = vpop.eup %5369 }
0x27d0   :  { %3799 = vrot.lane.b32.xlu1 %v5370_v34, %s5486_s25  ;;  %v5403_v34 = vld [vmem:[%s6622_s1] sm:$0xff] }
0x27d3   :  { %v5372_v52 = vpop.eup %5371 }
0x27d4   :  { %3608 = vrot.lane.b32.xlu1 %v6327_v16, %s5487_s26  ;;  %3787 = vrot.lane.b32.xlu0 %v5372_v52, %s5486_s25  ;;  %v5374_v5 = vpop.eup %5373  ;;  %v5404_v52 = vld [vmem:[%s6622_s1 + $0x38] sm:$0xff]  ;;  %s5489_s1 = smov [#allocation9]  }
0x27d5   :  { %v3781_v47 = vadd.f32 1.0, %v5374_v5  ;;  %v5376_v35 = vpop.eup %5375 }
0x27d6   :  { %v3775_v44 = vadd.f32 1.0, %v5376_v35 }
0x27d7   :  { %5377 = vrcp.f32 %v3781_v47 }
0x27d8   :  { %3599 = vrot.lane.b32.xlu1 %v6320_v31, %s5487_s26  ;;  %5379 = vrcp.f32 %v3775_v44 }
0x27e1   :  { %v5378_v53 = vpop.eup %5377 }
0x27e2   :  { %v5380_v16 = vpop.eup %5379 }
0x2842   :  { %v3800_v32 = vpop.permute.xlu1 %3799 }
0x2843   :  { %v3802_v4 = vmul.f32 %v5378_v53, %v3800_v32 }
0x2845   :  { %3804 = vrot.lane.b32.xlu0 %v3802_v4, %s5487_s26 }
0x2846   :  { %v3788_v45 = vpop.permute.xlu0 %3787  ;;  %v3609_v31 = vpop.permute.xlu1 %3608 }
0x2847   :  { %v3790_v22 = vmul.f32 %v5380_v16, %v3788_v45  ;;  %v3611_v48 = vmul.f32 %v3609_v31, %v6477_v15 }
0x2849   :  { %3792 = vrot.lane.b32.xlu0 %v3790_v22, %s5487_s26  ;;  %v3796_v12 = vmul.f32 %v5378_v53, %v3611_v48  ;;  %v4078_v48 = vld [vmem:[#allocation7] sm:$0xff] }
0x284a   :  { %v3600_v51 = vpop.permute.xlu1 %3599 }
0x284b   :  { %v3602_v46 = vmul.f32 %v3600_v51, %v6480_v20  ;;  %v4079_v51 = vld [vmem:[#allocation7 + $0x8] sm:$0xff] }
0x284d   :  { %3832 = vrot.lane.b32.xlu0 %v6273_v9, %s5488_s29  ;;  %v3784_v55 = vmul.f32 %v5380_v16, %v3602_v46  ;;  %v4080_v46 = vld [vmem:[#allocation7 + $0x10] sm:$0xff] }
0x2851   :  { %3823 = vrot.lane.b32.xlu0 %v6266_v61, %s5488_s29 }
0x28b7   :  { %v3805_v25 = vpop.permute.xlu0 %3804 }
0x28b8   :  { %v6521_v50 = vadd.f32 %v3805_v25, %v3796_v12  ;;  %v5108_v12 = vpack.c.bf16 %v4079_v51, %v4078_v48  ;;  %v4081_v25 = vld [vmem:[#allocation7 + $0x18] sm:$0xff] }
0x28ba   :  { %5381 = vtanh.f32 %v6521_v50  ;;  %5109 = vmatprep.subr.bf16.mxu0 %v5108_v12 }
0x28bb   :  { %v3793_v21 = vpop.permute.xlu0 %3792 }
0x28bc   :  { %v6524_v42 = vadd.f32 %v3793_v21, %v3784_v55 }
0x28be   :  { %5383 = vtanh.f32 %v6524_v42 }
0x28bf   :  { %v3833_v63 = vpop.permute.xlu0 %3832 }
0x28c3   :  { %v3824_v60 = vpop.permute.xlu0 %3823 }
0x28c4   :  { %v5382_v41 = vpop.eup %5381 }
0x28c5   :  { %3816 = vrot.lane.b32.xlu1 %v5382_v41, %s5486_s25  ;;  %v4083_v41 = vld [vmem:[#allocation7 + $0x28] sm:$0xff] }
0x28c8   :  { %v5384_v18 = vpop.eup %5383 }
0x28c9   :  { %3810 = vrot.lane.b32.xlu1 %v5384_v18, %s5486_s25 }
0x2937   :  { %v3817_v58 = vpop.permute.xlu1 %3816 }
0x2938   :  { %v3819_v19 = vmul.f32 %v5378_v53, %v3817_v58  ;;  %v4085_v58 = vld [vmem:[#allocation7 + $0x38] sm:$0xff] }
0x293a   :  { %v3835_v26 = vmul.f32 %v3833_v63, %v3819_v19  ;;  %v4084_v63 = vld [vmem:[#allocation7 + $0x30] sm:$0xff] }
0x293b   :  { %v3811_v54 = vpop.permute.xlu1 %3810  ;;  %v5120_v19 = vpack.c.bf16 %v4085_v58, %v4084_v63 }
0x293c   :  { %v3813_v15 = vmul.f32 %v5380_v16, %v3811_v54  ;;  %3925 = vrot.lane.b32.xlu1 %v3835_v26, %s5487_s26 }
0x293e   :  { %v3826_v27 = vmul.f32 %v3824_v60, %v3813_v15 }
0x2940   :  { %3841 = vrot.lane.b32.xlu0 %v3826_v27, %s5487_s26 }
0x29ae   :  { %v3926_v56 = vpop.permute.xlu1 %3925 }
0x29af   :  { %4858 = vmatmul.mubr.msk.f32.vlgmr.msra.gmra.mrb[50].mxu1 %vm247_vm2, %v3926_v56 }
0x29b2   :  { %v6532_v20 = vpop.permute.xlu0 %3841 }
0x29b3   :  { %4847 = vmatmul.mubr.msk.f32.vlgmr.msra.gmra.mrb[42].mxu0 %vm247_vm2, %v6532_v20 }
0x29b4   :  { %5111 = vmatpush3.bf16.msra.mxu0 %v5108_v12 }
0x2a82   :  { %v3995_v6 = vpop.f32.mrb[50].mxu1 }
0x2a83   :  { %v3999_v7 = vadd.f32 %v3995_v6, %v6187_v3  ;;  %v4859_v29 = vpop.f32.mrb[51].mxu1 }
0x2a85   :  { %5385 = vtanh.f32 %v3999_v7  ;;  %v4322_v3 = vmul.f32 -1.442695, %v3999_v7 }
0x2a86   :  { %v3919_v37 = vpop.f32.mrb[42].mxu0 }
0x2a87   :  { %v3923_v57 = vadd.f32 %v3919_v37, %v6214_v17  ;;  %v4848_v1 = vpop.f32.mrb[43].mxu0 }
0x2a89   :  { %5387 = vtanh.f32 %v3923_v57  ;;  %v4321_v43 = vmul.f32 -1.442695, %v3923_v57 }
0x2a8a   :  { %5389 = vpow2.f32 %v4322_v3  ;;  %v4323_v3 = vld [vmem:[#allocation7 + $0x40] ss:$0 sm:$0xff] }
0x2a8b   :  { %5391 = vpow2.f32 %v4321_v43 }
0x2a8f   :  { %v5386_v10 = vpop.eup %5385 }
0x2a90   :  { %4027 = vrot.lane.b32.xlu1 %v5386_v10, %s5486_s25 }
0x2a93   :  { %v5388_v59 = vpop.eup %5387 }
0x2a94   :  { %3836 = vrot.lane.b32.xlu1 %v6273_v9, %s5487_s26  ;;  %4015 = vrot.lane.b32.xlu0 %v5388_v59, %s5486_s25  ;;  %v5390_v14 = vpop.eup %5389 }
0x2a95   :  { %v4009_v17 = vadd.f32 1.0, %v5390_v14  ;;  %v5392_v11 = vpop.eup %5391 }
0x2a96   :  { %v4003_v33 = vadd.f32 1.0, %v5392_v11 }
0x2a97   :  { %5393 = vrcp.f32 %v4009_v17 }
0x2a98   :  { %3827 = vrot.lane.b32.xlu1 %v6266_v61, %s5487_s26  ;;  %5395 = vrcp.f32 %v4003_v33 }
0x2aa1   :  { %v6544_v38 = vpop.eup %5393 }
0x2aa2   :  { %v6548_v36 = vpop.eup %5395 }
0x2b02   :  { %v4028_v24 = vpop.permute.xlu1 %4027 }
0x2b03   :  { %v4030_v9 = vmul.f32 %v6544_v38, %v4028_v24 }
0x2b05   :  { %4032 = vrot.lane.b32.xlu0 %v4030_v9, %s5487_s26 }
0x2b06   :  { %v4016_v61 = vpop.permute.xlu0 %4015  ;;  %v3837_v0 = vpop.permute.xlu1 %3836 }
0x2b07   :  { %v4018_v40 = vmul.f32 %v6548_v36, %v4016_v61  ;;  %v3839_v30 = vmul.f32 %v3837_v0, %v6521_v50  ;;  %v5112_v50 = vpack.c.bf16 %v4081_v25, %v4080_v46 }
0x2b09   :  { %4020 = vrot.lane.b32.xlu0 %v4018_v40, %s5487_s26  ;;  %v4024_v35 = vmul.f32 %v6544_v38, %v3839_v30  ;;  %5113 = vmatprep.subr.bf16.mxu0 %v5112_v50 }
0x2b0a   :  { %v3828_v5 = vpop.permute.xlu1 %3827  ;;  %5115 = vmatpush3.bf16.msra.mxu0 %v5112_v50 }
0x2b0b   :  { %v3830_v47 = vmul.f32 %v3828_v5, %v6524_v42  ;;  %v4082_v42 = vld [vmem:[#allocation7 + $0x20] sm:$0xff] }
0x2b0c   :  { %v5116_v18 = vpack.c.bf16 %v4083_v41, %v4082_v42 }
0x2b0d   :  { %4056 = vrot.lane.b32.xlu0 %v5403_v34, %s5488_s29  ;;  %v4012_v32 = vmul.f32 %v6548_v36, %v3830_v47 }
0x2b0e   :  { %5117 = vmatprep.subr.bf16.mxu0 %v5116_v18 }
0x2b0f   :  { %5119 = vmatpush3.bf16.msra.mxu0 %v5116_v18 }
0x2b10   :  { %5121 = vmatprep.subr.bf16.mxu0 %v5120_v19 }
0x2b11   :  { %4051 = vrot.lane.b32.xlu0 %v5404_v52, %s5488_s29 }
0x2b13   :  { %5123 = vmatpush3.bf16.msra.mxu0 %v5120_v19 }
0x2b15   :  { %3846 = vrot.lane.b32.xlu0 %v3835_v26, %s5486_s25 }
0x2b19   :  { %3390 = vrot.lane.b32.xlu0 %v6439_v2, %s5486_s25 }
0x2b1d   :  { %2934 = vrot.lane.b32.xlu0 %v6341_v8, %s5486_s25 }
0x2b21   :  { %2478 = vrot.lane.b32.xlu0 %v6236_v39, %s5486_s25 }
0x2b77   :  { %v4033_v44 = vpop.permute.xlu0 %4032 }
0x2b78   :  { %v4035_v53 = vadd.f32 %v4033_v44, %v4024_v35 }
0x2b7a   :  { %5397 = vtanh.f32 %v4035_v53 }
0x2b7b   :  { %v4021_v2 = vpop.permute.xlu0 %4020 }
0x2b7c   :  { %v4023_v4 = vadd.f32 %v4021_v2, %v4012_v32 }
0x2b7e   :  { %5399 = vtanh.f32 %v4023_v4 }
0x2b7f   :  { %v4057_v8 = vpop.permute.xlu0 %4056 }
0x2b83   :  { %v4052_v16 = vpop.permute.xlu0 %4051 }
0x2b84   :  { %v5398_v45 = vpop.eup %5397 }
0x2b85   :  { %4044 = vrot.lane.b32.xlu1 %v5398_v45, %s5486_s25 }
0x2b87   :  { %v3847_v39 = vpop.permute.xlu0 %3846 }
0x2b88   :  { %v5400_v22 = vpop.eup %5399  ;;  %3849 = vst.msk [vmem:[#allocation3 + $0x8] sm:$0xff] %vm471_vm3, %v3847_v39 }
0x2b89   :  { %4038 = vrot.lane.b32.xlu1 %v5400_v22, %s5486_s25 }
0x2b8b   :  { %v3391_v31 = vpop.permute.xlu0 %3390 }
0x2b8c   :  { %3393 = vst.msk [vmem:[#allocation3 + $0x18] sm:$0xff] %vm471_vm3, %v3391_v31 }
0x2b8f   :  { %v2935_v55 = vpop.permute.xlu0 %2934 }
0x2b90   :  { %2937 = vst.msk [vmem:[#allocation3 + $0x28] sm:$0xff] %vm471_vm3, %v2935_v55 }
0x2b91   :  { %3616 = vst.msk [vmem:[#allocation3 + $0x28] sm:$0xff] %vm247_vm2, %v6495_v13 }
0x2b93   :  { %v2479_v21 = vpop.permute.xlu0 %2478  ;;  %v4073_v37 = vld [vmem:[#allocation3 + $0x18] sm:$0xff] }
0x2b94   :  { %2481 = vst.msk [vmem:[#allocation3 + $0x38] sm:$0xff] %vm471_vm3, %v2479_v21 }
0x2bf7   :  { %v4045_v26 = vpop.permute.xlu1 %4044 }
0x2bf8   :  { %v4047_v54 = vmul.f32 %v6544_v38, %v4045_v26 }
0x2bfa   :  { %v4059_v60 = vmul.f32 %v4057_v8, %v4047_v54 }
0x2bfb   :  { %v4039_v13 = vpop.permute.xlu1 %4038 }
0x2bfc   :  { %4066 = vrot.lane.b32.xlu1 %v4059_v60, %s5486_s25  ;;  %v4041_v15 = vmul.f32 %v6548_v36, %v4039_v13 }
0x2bfe   :  { %v4054_v27 = vmul.f32 %v4052_v16, %v4041_v15 }
0x2c00   :  { %3618 = vrot.lane.b32.xlu1 %v6485_v28, %s5486_s25 }
0x2c04   :  { %3162 = vrot.lane.b32.xlu1 %v6395_v62, %s5486_s25  ;;  %v4071_v62 = vld [vmem:[#allocation3 + $0x8] sm:$0xff] }
0x2c08   :  { %2706 = vrot.lane.b32.xlu1 %v6287_v49, %s5486_s25  ;;  %s4233_s25 = sshll.u32 %s5489_s1, 4  ;;  %s4234_s25 = int_to_ptr.vmem [resolvable:$true] %s4233_s25 }
0x2c09   :  { %p5454_p3 = scmp.lt.s32.totalorder %s4234_s25, %s4234_s25 }
0x2c0c   :  { %4061 = vrot.lane.b32.xlu1 %v4054_v27, %s5487_s26  ;;  %s5449_s26 = scalar_lea.vmem %s4234_s25, 1024 }
0x2c0d   :  { %p5450_p2 = scmp.ne.s32.totalorder %s4234_s25, %s5449_s26  ;;  %p5455_p4 = scmp.lt.s32.totalorder %s5449_s26, %s5449_s26 }
0x2c0f   :  { %p5456_p5 = por %p5455_p4, %p5454_p3 }
0x2c11   :  { %p5457_p6 = pnand %p5456_p5, %p5450_p2 }
0x2c6e   :  { %v4067_v56 = vpop.permute.xlu1 %4066 }
0x2c6f   :  { %4069 = vst.msk [vmem:[#allocation3] sm:$0xff] %vm471_vm3, %v4067_v56 }
0x2c72   :  { %v3619_v6 = vpop.permute.xlu1 %3618 }
0x2c73   :  { %3621 = vst.msk [vmem:[#allocation3 + $0x10] sm:$0xff] %vm471_vm3, %v3619_v6 }
0x2c76   :  { %v3163_v7 = vpop.permute.xlu1 %3162  ;;  %v4070_v28 = vld [vmem:[#allocation3] sm:$0xff] }
0x2c77   :  { %3165 = vst.msk [vmem:[#allocation3 + $0x20] sm:$0xff] %vm471_vm3, %v3163_v7  ;;  %4876 = vmatprep.mubr.msk.f32.mxu0 %vm2106_vm4, %v4070_v28 }
0x2c78   :  { %3388 = vst.msk [vmem:[#allocation3 + $0x20] sm:$0xff] %vm247_vm2, %v6449_v23  ;;  %4877 = vmatmul.mubr.msk.f32.vlgmr.msra.gmra.mrb[44].mxu0 %vm2106_vm4, %v4071_v62  ;;  %v4075_v23 = vld [vmem:[#allocation3 + $0x28] sm:$0xff] }
0x2c7a   :  { %v2707_v49 = vpop.permute.xlu1 %2706  ;;  %v4072_v29 = vld [vmem:[#allocation3 + $0x10] sm:$0xff] }
0x2c7b   :  { %2709 = vst.msk [vmem:[#allocation3 + $0x30] sm:$0xff] %vm471_vm3, %v2707_v49  ;;  %4879 = vmatprep.mubr.msk.f32.mxu0 %vm2106_vm4, %v4072_v29 }
0x2c7c   :  { %3844 = vst.msk [vmem:[#allocation3 + $0x30] sm:$0xff] %vm247_vm2, %v6532_v20  ;;  %4880 = vmatmul.mubr.msk.f32.gmra.mrb[46].mxu0 %vm2106_vm4, %v4073_v37 }
0x2c7e   :  { %v4062_v57 = vpop.permute.xlu1 %4061 }
0x2c7f   :  { %4064 = vst.msk [vmem:[#allocation3 + $0x38] sm:$0xff] %vm247_vm2, %v4062_v57  ;;  %v4074_v1 = vld [vmem:[#allocation3 + $0x20] sm:$0xff] }
0x2c80   :  { %4882 = vmatprep.mubr.msk.f32.mxu0 %vm2106_vm4, %v4074_v1 }
0x2c81   :  { %4883 = vmatmul.mubr.msk.f32.gmra.mrb[48].mxu0 %vm2106_vm4, %v4075_v23 }
0x2c83   :  { %v4076_v10 = vld [vmem:[#allocation3 + $0x30] sm:$0xff] }
0x2c84   :  { %4885 = vmatprep.mubr.msk.f32.mxu0 %vm2106_vm4, %v4076_v10 }
0x2c86   :  { %v4077_v59 = vld [vmem:[#allocation3 + $0x38] sm:$0xff] }
0x2c87   :  { %4886 = vmatmul.mubr.msk.f32.gmra.mrb[50].mxu0 %vm2106_vm4, %v4077_v59 }
0x2d4b   :  { %v4878_v43 = vpop.f32.mrb[44].mxu0 }
0x2d4c   :  { %v4187_v20 = vadd.f32 %v4878_v43, %v4323_v3  ;;  %v4181_v14 = vpop.f32.mrb[45].mxu0 }
0x2d4d   :  { %v4182_v17 = vadd.f32 %v4323_v3, %v4181_v14 }
0x2d4e   :  { %4221 = vst [vmem:[#allocation9 + $0x8] sm:$0xff] %v4187_v20 }
0x2d4f   :  { %4220 = vst [vmem:[#allocation9] sm:$0xff] %v4182_v17  ;;  %v4881_v11 = vpop.f32.mrb[46].mxu0 }
0x2d50   :  { %v4197_v33 = vadd.f32 %v4881_v11, %v4323_v3  ;;  %v4191_v38 = vpop.f32.mrb[47].mxu0 }
0x2d51   :  { %v4192_v24 = vadd.f32 %v4323_v3, %v4191_v38 }
0x2d52   :  { %4223 = vst [vmem:[#allocation9 + $0x18] sm:$0xff] %v4197_v33 }
0x2d53   :  { %4222 = vst [vmem:[#allocation9 + $0x10] sm:$0xff] %v4192_v24 }
0x2d54   :  { %v4884_v9 = vpop.f32.mrb[48].mxu0 }
0x2d55   :  { %v4207_v36 = vadd.f32 %v4884_v9, %v4323_v3  ;;  %v4201_v61 = vpop.f32.mrb[49].mxu0 }
0x2d56   :  { %v4202_v40 = vadd.f32 %v4323_v3, %v4201_v61 }
0x2d57   :  { %4225 = vst [vmem:[#allocation9 + $0x28] sm:$0xff] %v4207_v36 }
0x2d58   :  { %4224 = vst [vmem:[#allocation9 + $0x20] sm:$0xff] %v4202_v40 }
0x2d5a   :  { %v4887_v34 = vpop.f32.mrb[50].mxu0 }
0x2d5b   :  { %v4217_v52 = vadd.f32 %v4887_v34, %v4323_v3  ;;  %v4211_v0 = vpop.f32.mrb[51].mxu0 }
0x2d5c   :  { %v4212_v30 = vadd.f32 %v4323_v3, %v4211_v0 }
0x2d5d   :  { %4227 = vst [vmem:[#allocation9 + $0x38] sm:$0xff] %v4217_v52 }
0x2d5e   :  { %4226 = vst [vmem:[#allocation9 + $0x30] sm:$0xff] %v4212_v30 }
0x2d5f   :  { %5460 = shalt.err (!%p5457_p6)
}
0x2d60   :  { %s5461_s11 = scalar_lea.hbm %s6626_s5, 1024 }
0x2d61   :  { %p5462_p7 = scmp.ne.s32.totalorder %s6626_s5, %s5461_s11  ;;  %p5465_p8 = scmp.lt.u32.totalorder %s5461_s11, %s6626_s5 }
0x2d63   :  { %p5467_p9 = pnand %p5465_p8, %p5462_p7 }
0x2d65   :  { %5470 = shalt.err (!%p5467_p9)
}
0x2d66   :  { %4239 = dma.vmem_to_hbm [thread:$0]  %s4234_s25, 1024, %s6626_s5, [#allocation6], %s5481_s2, %s5481_s2, %s5482_s17  }
0x2d67   :  { %5475 = dma.done.wait [#allocation6], 1024  }
0x2d68   :  { %5476 = vsyncadd [#allocation6], 4294966272 }
0x2d69   :  { %4243 = vsyncpa [#allocation5], 1 }
0x2d6a   :  { %4244 = vsyncpa [#allocation8], 1 }
0x2d6b   :  { %4245 = vsyncpa [#allocation6], 1 }

</bundles_post_ra>
